<compile_context>
chip_gen: v7x
topology: tpu7x:2x2x1
jax: 0.10.0
libtpu: 0.0.40
codegen_flags: <defaults>
</compile_context>

<pallas_src>
import jax
import jax.numpy as jnp
from jax.experimental import pallas as pl
from jax.experimental.pallas import tpu as pltpu

LANE = 128


def _round_up(x, m):
    return (x + m - 1) // m * m


def _conv3x3_kernel(x_ref, w_ref, o_ref):
    # x_ref: (1, TH+2, W_pad, Cin)   zero-padded halo tile (NHWC)
    # w_ref: (9, Cin, Cout_p)        tap-major HWIO weights, Cout zero-padded to 128
    # o_ref: (1, TH, W, Cout_p)
    th = o_ref.shape[1]
    w_out = o_ref.shape[2]
    w_pad = x_ref.shape[2]
    cin = x_ref.shape[3]
    cout_p = o_ref.shape[3]

    x = x_ref[0]                                       # (TH+2, W_pad, Cin)
    xf = x.reshape((th + 2) * w_pad, cin)              # cheap: W_pad is a multiple of 8

    acc = jnp.zeros((th, w_out, cout_p), jnp.float32)
    # 3x3 conv = 9 slab matmuls; tap offsets become shifts of the lane-dense result
    # (Cout_p = 128) instead of per-tap copies of the Cin-lane input tile.
    for dy in range(3):
        for dx in range(3):
            r = jnp.dot(xf, w_ref[dy * 3 + dx],
                        preferred_element_type=jnp.float32)   # MXU: (M, Cin) @ (Cin, 128)
            r = r.reshape(th + 2, w_pad, cout_p)
            acc = acc + r[dy:dy + th, dx:dx + w_out, :]
    o_ref[...] = acc[None].astype(o_ref.dtype)


def _pick_tile_h(h, w_pad, cin, cout_p, itemsize, vmem_budget=20 * 1024 * 1024):
    """Largest row tile whose (double-buffered) working set fits the VMEM budget."""
    cin_l = _round_up(cin, LANE)            # VMEM lane padding of the activation tile
    for th in (256, 128, 64, 32, 16, 8):
        if th > h or h % th != 0:
            continue
        in_tile = (th + 2) * w_pad * cin_l * itemsize       # halo input tile
        r_tile = (th + 2) * w_pad * cout_p * 4               # transient matmul result
        out_tile = th * w_pad * cout_p * 4                   # acc / output tile (upper bound)
        est = 2 * in_tile + 2 * out_tile + r_tile + out_tile
        if est <= vmem_budget:
            return th
    return h


def upsample_forward(x_nchw, weight_oihw, compute_dtype=None):
    """Matches PyTorch Upsample.forward: Conv2d(3x3, pad 1, no bias) + PixelShuffle(2).

    x_nchw: (N, n_feat, H, W); weight_oihw: (2*n_feat, n_feat, 3, 3); -> (N, n_feat//2, 2H, 2W)
    """
    n, cin, h, w = x_nchw.shape
    cout = weight_oihw.shape[0]
    assert weight_oihw.shape == (cout, cin, 3, 3)
    assert cout % 4 == 0, "PixelShuffle(2) needs Cout divisible by 4"

    out_dtype = x_nchw.dtype
    cdt = out_dtype if compute_dtype is None else compute_dtype
    itemsize = jnp.dtype(cdt).itemsize
    cout_p = _round_up(cout, LANE)
    w_pad = _round_up(w + 2, 8)

    # --- weights: OIHW -> tap-major (9, Cin, Cout_p); zero-pad Cout for lane density.
    w_hwio = jnp.transpose(weight_oihw, (2, 3, 1, 0)).astype(cdt)      # (3,3,Cin,Cout)
    w_hwio = jnp.pad(w_hwio, ((0, 0), (0, 0), (0, 0), (0, cout_p - cout)))
    w_k = w_hwio.reshape(9, cin, cout_p)                               # [dy*3+dx, c, o]

    # --- activations: NCHW -> NHWC, zero pad, carve halo'd row blocks (one fused pre-pass).
    # TODO(synk): replace the halo-gather pre-pass with an element-offset / manual-DMA halo
    #             BlockSpec so the kernel reads straight from the unpadded NHWC tensor.
    tile_h = _pick_tile_h(h, w_pad, cin, cout_p, itemsize)
    n_hb = h // tile_h
    nb = n * n_hb

    x_nhwc = jnp.transpose(x_nchw, (0, 2, 3, 1)).astype(cdt)           # (N, H, W, Cin)
    x_p = jnp.pad(x_nhwc, ((0, 0), (1, 1), (1, w_pad - w - 1), (0, 0)))
    if n_hb == 1:
        x_blocks = x_p[:, None]
    else:
        rows = jnp.arange(n_hb)[:, None] * tile_h + jnp.arange(tile_h + 2)[None, :]
        x_blocks = x_p[:, rows]                                        # (N, nHB, TH+2, Wp, Cin)
    x_blocks = x_blocks.reshape(nb, tile_h + 2, w_pad, cin)

    y = pl.pallas_call(
        _conv3x3_kernel,
        out_shape=jax.ShapeDtypeStruct((nb, tile_h, w, cout_p), out_dtype),
        grid_spec=pltpu.PrefetchScalarGridSpec(
            num_scalar_prefetch=0,
            grid=(nb,),
            in_specs=[
                pl.BlockSpec((1, tile_h + 2, w_pad, cin), lambda b: (b, 0, 0, 0)),
                pl.BlockSpec((9, cin, cout_p), lambda b: (0, 0, 0)),
            ],
            out_specs=pl.BlockSpec((1, tile_h, w, cout_p), lambda b: (b, 0, 0, 0)),
        ),
        compiler_params=pltpu.CompilerParams(
            dimension_semantics=("parallel",),
            vmem_limit_bytes=48 * 1024 * 1024,
        ),
    )(x_blocks, w_k)

    # --- single post-pass: drop pad channels + PixelShuffle(2) + NHWC->NCHW in one transpose.
    c2 = cout // 4
    y = y.reshape(n, h, w, cout_p)[..., :cout]
    y = y.reshape(n, h, w, c2, 2, 2)
    y = jnp.transpose(y, (0, 3, 1, 4, 2, 5)).reshape(n, c2, 2 * h, 2 * w)
    return y


if __name__ == "__main__":
    key = jax.random.PRNGKey(0)
    kx, kw = jax.random.split(key)

    N, n_feat, H, W = 2, 4, 16, 16
    x = jax.random.normal(kx, (N, n_feat, H, W), dtype=jnp.float32)
    # Conv2d(n_feat, 2*n_feat, 3, bias=False) weight: (2*n_feat, n_feat, 3, 3)
    weight = jax.random.normal(kw, (2 * n_feat, n_feat, 3, 3),
                               dtype=jnp.float32) * 0.1

    out = jax.jit(upsample_forward)(x, weight)
    out = jax.block_until_ready(out)
    assert out.shape == (N, n_feat // 2, 2 * H, 2 * W), out.shape

    # Cross-check against XLA's conv + pixel shuffle (pure JAX reference).
    ref_conv = jax.lax.conv_general_dilated(
        x, weight, window_strides=(1, 1), padding=((1, 1), (1, 1)),
        dimension_numbers=("NCHW", "OIHW", "NCHW"))
    c2 = (2 * n_feat) // 4
    ref = ref_conv.reshape(N, c2, 2, 2, H, W)
    ref = jnp.transpose(ref, (0, 1, 4, 2, 5, 3)).reshape(N, c2, 2 * H, 2 * W)
    assert jnp.allclose(out, ref, atol=1e-4, rtol=1e-4)

    print("KERNEL_OK")
</pallas_src>

<mosaic_0001>
module attributes {stable_mosaic.version = 11 : i64} {
  func.func @_conv3x3_kernel(%arg0: i32, %arg1: memref<1x18x24x4xf32, #tpu.memory_space<vmem>>, %arg2: memref<9x4x128xf32, #tpu.memory_space<vmem>>, %arg3: memref<1x16x16x128xf32, #tpu.memory_space<vmem>>) attributes {dimension_semantics = [#tpu.dimension_semantics<parallel>], iteration_bounds = array<i64: 2>, scalar_prefetch = 0 : i64, scratch_operands = 0 : i64, tpu.core_type = #tpu.core_type<tc>, window_params = [{transform_indices = @transform_0, window_bounds = array<i64: 1, 18, 24, 4>}, {pipeline_mode = #tpu.pipeline_mode<synchronous>, transform_indices = @transform_1, window_bounds = array<i64: 9, 4, 128>}, {transform_indices = @transform_2, window_bounds = array<i64: 1, 16, 16, 128>}]} {
    %c0 = arith.constant 0 : index
    %c0_0 = arith.constant 0 : index
    %c0_1 = arith.constant 0 : index
    %c0_2 = arith.constant 0 : index
    %0 = vector.load %arg1[%c0, %c0_0, %c0_1, %c0_2] : memref<1x18x24x4xf32, #tpu.memory_space<vmem>>, vector<1x18x24x4xf32>
    %1 = vector.shape_cast %0 : vector<1x18x24x4xf32> to vector<18x24x4xf32>
    %2 = vector.shape_cast %1 : vector<18x24x4xf32> to vector<432x4xf32>
    %cst = arith.constant 0.000000e+00 : f32
    %3 = vector.broadcast %cst : f32 to vector<16x16x128xf32>
    %c0_3 = arith.constant 0 : index
    %c0_4 = arith.constant 0 : index
    %c0_5 = arith.constant 0 : index
    %4 = vector.load %arg2[%c0_3, %c0_4, %c0_5] : memref<9x4x128xf32, #tpu.memory_space<vmem>>, vector<1x4x128xf32>
    %5 = vector.shape_cast %4 : vector<1x4x128xf32> to vector<4x128xf32>
    %cst_6 = arith.constant dense<0.000000e+00> : vector<432x128xf32>
    %6 = tpu.matmul %2, %5, %cst_6 {dimension_numbers = #tpu.dot_dimension_numbers<[1], [0], [0], [1], [0, 0, 1, 1], [], []>} : vector<432x4xf32>, vector<4x128xf32>, vector<432x128xf32> -> vector<432x128xf32>
    %7 = vector.shape_cast %6 : vector<432x128xf32> to vector<18x24x128xf32>
    %8 = vector.extract_strided_slice %7 {offsets = [0, 0, 0], sizes = [16, 16, 128], strides = [1, 1, 1]} : vector<18x24x128xf32> to vector<16x16x128xf32>
    %9 = arith.addf %3, %8 : vector<16x16x128xf32>
    %c1 = arith.constant 1 : index
    %c0_7 = arith.constant 0 : index
    %c0_8 = arith.constant 0 : index
    %10 = vector.load %arg2[%c1, %c0_7, %c0_8] : memref<9x4x128xf32, #tpu.memory_space<vmem>>, vector<1x4x128xf32>
    %11 = vector.shape_cast %10 : vector<1x4x128xf32> to vector<4x128xf32>
    %cst_9 = arith.constant dense<0.000000e+00> : vector<432x128xf32>
    %12 = tpu.matmul %2, %11, %cst_9 {dimension_numbers = #tpu.dot_dimension_numbers<[1], [0], [0], [1], [0, 0, 1, 1], [], []>} : vector<432x4xf32>, vector<4x128xf32>, vector<432x128xf32> -> vector<432x128xf32>
    %13 = vector.shape_cast %12 : vector<432x128xf32> to vector<18x24x128xf32>
    %14 = vector.extract_strided_slice %13 {offsets = [0, 1, 0], sizes = [16, 16, 128], strides = [1, 1, 1]} : vector<18x24x128xf32> to vector<16x16x128xf32>
    %15 = arith.addf %9, %14 : vector<16x16x128xf32>
    %c2 = arith.constant 2 : index
    %c0_10 = arith.constant 0 : index
    %c0_11 = arith.constant 0 : index
    %16 = vector.load %arg2[%c2, %c0_10, %c0_11] : memref<9x4x128xf32, #tpu.memory_space<vmem>>, vector<1x4x128xf32>
    %17 = vector.shape_cast %16 : vector<1x4x128xf32> to vector<4x128xf32>
    %cst_12 = arith.constant dense<0.000000e+00> : vector<432x128xf32>
    %18 = tpu.matmul %2, %17, %cst_12 {dimension_numbers = #tpu.dot_dimension_numbers<[1], [0], [0], [1], [0, 0, 1, 1], [], []>} : vector<432x4xf32>, vector<4x128xf32>, vector<432x128xf32> -> vector<432x128xf32>
    %19 = vector.shape_cast %18 : vector<432x128xf32> to vector<18x24x128xf32>
    %20 = vector.extract_strided_slice %19 {offsets = [0, 2, 0], sizes = [16, 16, 128], strides = [1, 1, 1]} : vector<18x24x128xf32> to vector<16x16x128xf32>
    %21 = arith.addf %15, %20 : vector<16x16x128xf32>
    %c3 = arith.constant 3 : index
    %c0_13 = arith.constant 0 : index
    %c0_14 = arith.constant 0 : index
    %22 = vector.load %arg2[%c3, %c0_13, %c0_14] : memref<9x4x128xf32, #tpu.memory_space<vmem>>, vector<1x4x128xf32>
    %23 = vector.shape_cast %22 : vector<1x4x128xf32> to vector<4x128xf32>
    %cst_15 = arith.constant dense<0.000000e+00> : vector<432x128xf32>
    %24 = tpu.matmul %2, %23, %cst_15 {dimension_numbers = #tpu.dot_dimension_numbers<[1], [0], [0], [1], [0, 0, 1, 1], [], []>} : vector<432x4xf32>, vector<4x128xf32>, vector<432x128xf32> -> vector<432x128xf32>
    %25 = vector.shape_cast %24 : vector<432x128xf32> to vector<18x24x128xf32>
    %26 = vector.extract_strided_slice %25 {offsets = [1, 0, 0], sizes = [16, 16, 128], strides = [1, 1, 1]} : vector<18x24x128xf32> to vector<16x16x128xf32>
    %27 = arith.addf %21, %26 : vector<16x16x128xf32>
    %c4 = arith.constant 4 : index
    %c0_16 = arith.constant 0 : index
    %c0_17 = arith.constant 0 : index
    %28 = vector.load %arg2[%c4, %c0_16, %c0_17] : memref<9x4x128xf32, #tpu.memory_space<vmem>>, vector<1x4x128xf32>
    %29 = vector.shape_cast %28 : vector<1x4x128xf32> to vector<4x128xf32>
    %cst_18 = arith.constant dense<0.000000e+00> : vector<432x128xf32>
    %30 = tpu.matmul %2, %29, %cst_18 {dimension_numbers = #tpu.dot_dimension_numbers<[1], [0], [0], [1], [0, 0, 1, 1], [], []>} : vector<432x4xf32>, vector<4x128xf32>, vector<432x128xf32> -> vector<432x128xf32>
    %31 = vector.shape_cast %30 : vector<432x128xf32> to vector<18x24x128xf32>
    %32 = vector.extract_strided_slice %31 {offsets = [1, 1, 0], sizes = [16, 16, 128], strides = [1, 1, 1]} : vector<18x24x128xf32> to vector<16x16x128xf32>
    %33 = arith.addf %27, %32 : vector<16x16x128xf32>
    %c5 = arith.constant 5 : index
    %c0_19 = arith.constant 0 : index
    %c0_20 = arith.constant 0 : index
    %34 = vector.load %arg2[%c5, %c0_19, %c0_20] : memref<9x4x128xf32, #tpu.memory_space<vmem>>, vector<1x4x128xf32>
    %35 = vector.shape_cast %34 : vector<1x4x128xf32> to vector<4x128xf32>
    %cst_21 = arith.constant dense<0.000000e+00> : vector<432x128xf32>
    %36 = tpu.matmul %2, %35, %cst_21 {dimension_numbers = #tpu.dot_dimension_numbers<[1], [0], [0], [1], [0, 0, 1, 1], [], []>} : vector<432x4xf32>, vector<4x128xf32>, vector<432x128xf32> -> vector<432x128xf32>
    %37 = vector.shape_cast %36 : vector<432x128xf32> to vector<18x24x128xf32>
    %38 = vector.extract_strided_slice %37 {offsets = [1, 2, 0], sizes = [16, 16, 128], strides = [1, 1, 1]} : vector<18x24x128xf32> to vector<16x16x128xf32>
    %39 = arith.addf %33, %38 : vector<16x16x128xf32>
    %c6 = arith.constant 6 : index
    %c0_22 = arith.constant 0 : index
    %c0_23 = arith.constant 0 : index
    %40 = vector.load %arg2[%c6, %c0_22, %c0_23] : memref<9x4x128xf32, #tpu.memory_space<vmem>>, vector<1x4x128xf32>
    %41 = vector.shape_cast %40 : vector<1x4x128xf32> to vector<4x128xf32>
    %cst_24 = arith.constant dense<0.000000e+00> : vector<432x128xf32>
    %42 = tpu.matmul %2, %41, %cst_24 {dimension_numbers = #tpu.dot_dimension_numbers<[1], [0], [0], [1], [0, 0, 1, 1], [], []>} : vector<432x4xf32>, vector<4x128xf32>, vector<432x128xf32> -> vector<432x128xf32>
    %43 = vector.shape_cast %42 : vector<432x128xf32> to vector<18x24x128xf32>
    %44 = vector.extract_strided_slice %43 {offsets = [2, 0, 0], sizes = [16, 16, 128], strides = [1, 1, 1]} : vector<18x24x128xf32> to vector<16x16x128xf32>
    %45 = arith.addf %39, %44 : vector<16x16x128xf32>
    %c7 = arith.constant 7 : index
    %c0_25 = arith.constant 0 : index
    %c0_26 = arith.constant 0 : index
    %46 = vector.load %arg2[%c7, %c0_25, %c0_26] : memref<9x4x128xf32, #tpu.memory_space<vmem>>, vector<1x4x128xf32>
    %47 = vector.shape_cast %46 : vector<1x4x128xf32> to vector<4x128xf32>
    %cst_27 = arith.constant dense<0.000000e+00> : vector<432x128xf32>
    %48 = tpu.matmul %2, %47, %cst_27 {dimension_numbers = #tpu.dot_dimension_numbers<[1], [0], [0], [1], [0, 0, 1, 1], [], []>} : vector<432x4xf32>, vector<4x128xf32>, vector<432x128xf32> -> vector<432x128xf32>
    %49 = vector.shape_cast %48 : vector<432x128xf32> to vector<18x24x128xf32>
    %50 = vector.extract_strided_slice %49 {offsets = [2, 1, 0], sizes = [16, 16, 128], strides = [1, 1, 1]} : vector<18x24x128xf32> to vector<16x16x128xf32>
    %51 = arith.addf %45, %50 : vector<16x16x128xf32>
    %c8 = arith.constant 8 : index
    %c0_28 = arith.constant 0 : index
    %c0_29 = arith.constant 0 : index
    %52 = vector.load %arg2[%c8, %c0_28, %c0_29] : memref<9x4x128xf32, #tpu.memory_space<vmem>>, vector<1x4x128xf32>
    %53 = vector.shape_cast %52 : vector<1x4x128xf32> to vector<4x128xf32>
    %cst_30 = arith.constant dense<0.000000e+00> : vector<432x128xf32>
    %54 = tpu.matmul %2, %53, %cst_30 {dimension_numbers = #tpu.dot_dimension_numbers<[1], [0], [0], [1], [0, 0, 1, 1], [], []>} : vector<432x4xf32>, vector<4x128xf32>, vector<432x128xf32> -> vector<432x128xf32>
    %55 = vector.shape_cast %54 : vector<432x128xf32> to vector<18x24x128xf32>
    %56 = vector.extract_strided_slice %55 {offsets = [2, 2, 0], sizes = [16, 16, 128], strides = [1, 1, 1]} : vector<18x24x128xf32> to vector<16x16x128xf32>
    %57 = arith.addf %51, %56 : vector<16x16x128xf32>
    %58 = vector.shape_cast %57 : vector<16x16x128xf32> to vector<1x16x16x128xf32>
    %c0_31 = arith.constant 0 : index
    %c0_32 = arith.constant 0 : index
    %c0_33 = arith.constant 0 : index
    %c0_34 = arith.constant 0 : index
    %59 = vector.load %arg3[%c0_31, %c0_32, %c0_33, %c0_34] : memref<1x16x16x128xf32, #tpu.memory_space<vmem>>, vector<1x16x16x128xf32>
    tpu.vector_store %arg3[%c0_31, %c0_32, %c0_33, %c0_34], %58 {strides = array<i32>} : memref<1x16x16x128xf32, #tpu.memory_space<vmem>>, vector<1x16x16x128xf32>,
    return
  }
  func.func @transform_0(%arg0: i32) -> (i32, i32, i32, i32) {
    %c0_i32 = arith.constant 0 : i32
    %c0_i32_0 = arith.constant 0 : i32
    %c0_i32_1 = arith.constant 0 : i32
    %c0_i32_2 = arith.constant 0 : i32
    return %arg0, %c0_i32, %c0_i32_0, %c0_i32_1 : i32, i32, i32, i32
  }
  func.func @transform_1(%arg0: i32) -> (i32, i32, i32) {
    %c0_i32 = arith.constant 0 : i32
    %c0_i32_0 = arith.constant 0 : i32
    %c0_i32_1 = arith.constant 0 : i32
    %c0_i32_2 = arith.constant 0 : i32
    return %c0_i32, %c0_i32_0, %c0_i32_1 : i32, i32, i32
  }
  func.func @transform_2(%arg0: i32) -> (i32, i32, i32, i32) {
    %c0_i32 = arith.constant 0 : i32
    %c0_i32_0 = arith.constant 0 : i32
    %c0_i32_1 = arith.constant 0 : i32
    %c0_i32_2 = arith.constant 0 : i32
    return %arg0, %c0_i32, %c0_i32_0, %c0_i32_1 : i32, i32, i32, i32
  }
}

</mosaic_0001>

<bundles_post_ra>
// kernel: upsample_forward.1
= control target key start
LH: loop header
LB: loop body
LE: loop exit
PB: predicated region body
PF: predicated region fallthrough
CT: control target
= control target key end

     0   :  { %s6500_s9 = smov 0   ;;  %s8412_s0 = inlined_call_operand.vmem [shape: f32[2,18,24,4], index: 0, kind: input, shape index: {}]   ;;  %s8413_s1 = inlined_call_operand.vmem [shape: f32[9,4,128], index: 1, kind: input, shape index: {}]   ;;  %s8414_s2 = inlined_call_operand.vmem [shape: f32[2,16,16,128], index: 2, kind: output, shape index: {}]  }
   0x1 LB: > { %s4656_s10 = sadd.s32 4294967295, %s6483_s9   ;;  %p4660_p0 = scmp.ge.s32.totalorder %s6483_s9, 1  ;;  %s6483_s9 = sphi %s6500_s9, %s12_s9  }
   0x2   : > { %p112_p1 = scmp.lt.s32.totalorder %s6483_s9, 3 }
   0x4   : > { %p113_p2 = pnand %p4660_p0, %p112_p1 }
   0x6   : > { %116 = sbr.rel (%p113_p2) target bundleno = 724 (0x2d4), region = 28 }
   0xd   : > { %v198_v0 = vld [vmem:[%s8413_s1] sm:$0xf]  ;;  %vm362_vm0 = vcmask 1043456   ;;  %p134_p3 = scmp.lt.s32.totalorder %s4656_s10, 1  ;;  %v4775_v1 = vld [vmem:[%s8413_s1 + $0x8] sm:$0xf] }
   0xe   : > { %5665 = vmatprep.subr.msk.mxu0 %vm362_vm0, %v198_v0  ;;  %6412 = vmatprep.subr.msk.mxu1 %vm362_vm0, %v198_v0  ;;  %v4719_v2 = vld [vmem:[%s8413_s1 + $0x4] sm:$0xf]  ;;  %vm199_vm1 = vcmask 31744   ;;  %v6560_v9 = vld [vmem:[%s8413_s1 + $0xc] sm:$0xf]  ;;  %vm1093_vm2 = vcmask 1046528  }
   0xf   : > { %5666 = vmatpush3.msk.msra.mxu0 %vm362_vm0, %v198_v0  ;;  %6413 = vmatpush3.msk.msra.mxu1 %vm362_vm0, %v198_v0  ;;  %s8498_s10 = smov (!%p134_p3, %s4656_s10), 1  ;;  %v6565_v10 = vld [vmem:[%s8413_s1 + $0x10] sm:$0xf]  ;;  %v6820_v59 = vld [vmem:[%s8413_s1 + $0x14] sm:$0xf]  ;;  %vm1620_vm3 = vcmask 1045504  }
  0x10   : > { %5831 = vmatprep.subr.msk.mxu0 %vm362_vm0, %v4775_v1  ;;  %5748 = vmatprep.subr.msk.mxu1 %vm362_vm0, %v4719_v2  ;;  %s6414_s17 = smul.u32 432, %s8498_s10  ;;  %v6837_v60 = vld [vmem:[%s8413_s1 + $0x18] sm:$0xf]  ;;  %v7054_v61 = vld [vmem:[%s8413_s1 + $0x1c] sm:$0xf]  ;;  %s5169_s5 = sshll.u32 %s8498_s10, 8 }
  0x11   : > { %v7071_v62 = vld [vmem:[%s8413_s1 + $0x20] sm:$0xf]  ;;  %s8282_s8 = scalar_lea.vmem %s8414_s2, %s5169_s5 }
  0x12   : > { %s6529_s20 = scalar_lea.vmem %s8412_s0, %s6414_s17 }
  0x13   : > { %v6532_v3 = vld [vmem:[%s6529_s20] sm:$0xff]  ;;  %v6538_v5 = vld [vmem:[%s6529_s20 + $0x8] sm:$0xff]  ;;  %v6548_v7 = vld [vmem:[%s6529_s20 + $0x10] sm:$0xff] }
  0x14   : > { %v6535_v4 = vld [vmem:[%s6529_s20 + $0xe0] sm:$0xff]  ;;  %5667 = vmatprep.mubr.msk.f32.mxu0 %vm199_vm1, %v6532_v3  ;;  %v6545_v6 = vld [vmem:[%s6529_s20 + $0xe8] sm:$0xff]  ;;  %v6551_v8 = vld [vmem:[%s6529_s20 + $0xf0] sm:$0xff] }
  0x15   : > { %5709 = vmatprep.mubr.msk.f32.mxu1 %vm199_vm1, %v6535_v4  ;;  %5668 = vmatmul.mubr.msk.f32.vlgmr.msra.gmra.mrb[0].mxu0 %vm199_vm1, %v6538_v5  ;;  %v6570_v11 = vld [vmem:[%s6529_s20 + $0x18] sm:$0xff]  ;;  %v6580_v13 = vld [vmem:[%s6529_s20 + $0x20] sm:$0xff]  ;;  %v6598_v15 = vld [vmem:[%s6529_s20 + $0x28] sm:$0xff] }
  0x16   : > { %5710 = vmatmul.mubr.msk.f32.vlgmr.msra.gmra.mrb[0].mxu1 %vm199_vm1, %v6545_v6  ;;  %5832 = vmatpush3.msk.msra.mxu0 %vm362_vm0, %v4775_v1  ;;  %v6573_v12 = vld [vmem:[%s6529_s20 + $0xf8] sm:$0xff]  ;;  %v6583_v14 = vld [vmem:[%s6529_s20 + $0x100] sm:$0xff]  ;;  %v6601_v16 = vld [vmem:[%s6529_s20 + $0x108] sm:$0xff] }
  0x17   : > { %5749 = vmatpush3.msk.msra.mxu1 %vm362_vm0, %v4719_v2  ;;  %5670 = vmatprep.mubr.msk.f32.mxu0 %vm199_vm1, %v6548_v7  ;;  %v6604_v17 = vld [vmem:[%s6529_s20 + $0x30] sm:$0xff]  ;;  %v6618_v19 = vld [vmem:[%s6529_s20 + $0x38] sm:$0xff]  ;;  %v6624_v21 = vld [vmem:[%s6529_s20 + $0x40] sm:$0xff] }
  0x18   : > { %5712 = vmatprep.mubr.msk.f32.mxu1 %vm199_vm1, %v6551_v8  ;;  %5914 = vmatprep.subr.msk.mxu1 %vm362_vm0, %v6560_v9  ;;  %v6607_v18 = vld [vmem:[%s6529_s20 + $0x110] sm:$0xff]  ;;  %v6621_v20 = vld [vmem:[%s6529_s20 + $0x118] sm:$0xff]  ;;  %v6627_v22 = vld [vmem:[%s6529_s20 + $0x120] sm:$0xff] }
  0x19   : > { %5997 = vmatprep.subr.msk.mxu0 %vm362_vm0, %v6565_v10  ;;  %5671 = vmatmul.mubr.msk.f32.gmra.mrb[2].mxu0 %vm199_vm1, %v6570_v11  ;;  %v6638_v23 = vld [vmem:[%s6529_s20 + $0x48] sm:$0xff]  ;;  %v6644_v25 = vld [vmem:[%s6529_s20 + $0x50] sm:$0xff]  ;;  %v6658_v27 = vld [vmem:[%s6529_s20 + $0x58] sm:$0xff] }
  0x1a   : > { %5713 = vmatmul.mubr.msk.f32.gmra.mrb[2].mxu1 %vm199_vm1, %v6573_v12  ;;  %5673 = vmatprep.mubr.msk.f32.mxu0 %vm199_vm1, %v6580_v13  ;;  %v6641_v24 = vld [vmem:[%s6529_s20 + $0x128] sm:$0xff]  ;;  %v6647_v26 = vld [vmem:[%s6529_s20 + $0x130] sm:$0xff]  ;;  %v6661_v28 = vld [vmem:[%s6529_s20 + $0x138] sm:$0xff] }
  0x1b   : > { %5715 = vmatprep.mubr.msk.f32.mxu1 %vm199_vm1, %v6583_v14  ;;  %v6664_v29 = vld [vmem:[%s6529_s20 + $0x60] sm:$0xff]  ;;  %v6678_v31 = vld [vmem:[%s6529_s20 + $0x68] sm:$0xff]  ;;  %v6684_v33 = vld [vmem:[%s6529_s20 + $0x70] sm:$0xff] }
  0x1c   : > { %v6667_v30 = vld [vmem:[%s6529_s20 + $0x140] sm:$0xff]  ;;  %v6681_v32 = vld [vmem:[%s6529_s20 + $0x148] sm:$0xff]  ;;  %v6687_v34 = vld [vmem:[%s6529_s20 + $0x150] sm:$0xff] }
  0x1d   : > { %5674 = vmatmul.mubr.msk.f32.gmra.mrb[4].mxu0 %vm199_vm1, %v6598_v15  ;;  %v6698_v35 = vld [vmem:[%s6529_s20 + $0x78] sm:$0xff]  ;;  %v6704_v37 = vld [vmem:[%s6529_s20 + $0x80] sm:$0xff]  ;;  %v6718_v39 = vld [vmem:[%s6529_s20 + $0x88] sm:$0xff] }
  0x1e   : > { %5716 = vmatmul.mubr.msk.f32.gmra.mrb[4].mxu1 %vm199_vm1, %v6601_v16  ;;  %5676 = vmatprep.mubr.msk.f32.mxu0 %vm199_vm1, %v6604_v17  ;;  %v6701_v36 = vld [vmem:[%s6529_s20 + $0x158] sm:$0xff]  ;;  %v6707_v38 = vld [vmem:[%s6529_s20 + $0x160] sm:$0xff]  ;;  %v6721_v40 = vld [vmem:[%s6529_s20 + $0x168] sm:$0xff] }
  0x1f   : > { %5718 = vmatprep.mubr.msk.f32.mxu1 %vm199_vm1, %v6607_v18  ;;  %v6724_v41 = vld [vmem:[%s6529_s20 + $0x90] sm:$0xff]  ;;  %v6738_v43 = vld [vmem:[%s6529_s20 + $0x98] sm:$0xff]  ;;  %v6744_v45 = vld [vmem:[%s6529_s20 + $0xa0] sm:$0xff] }
  0x20   : > { %v6727_v42 = vld [vmem:[%s6529_s20 + $0x170] sm:$0xff]  ;;  %v6741_v44 = vld [vmem:[%s6529_s20 + $0x178] sm:$0xff]  ;;  %v6747_v46 = vld [vmem:[%s6529_s20 + $0x180] sm:$0xff] }
  0x21   : > { %5677 = vmatmul.mubr.msk.f32.gmra.mrb[6].mxu0 %vm199_vm1, %v6618_v19  ;;  %v6758_v47 = vld [vmem:[%s6529_s20 + $0xa8] sm:$0xff]  ;;  %v6764_v49 = vld [vmem:[%s6529_s20 + $0xb0] sm:$0xff]  ;;  %v6778_v51 = vld [vmem:[%s6529_s20 + $0xb8] sm:$0xff] }
  0x22   : > { %5719 = vmatmul.mubr.msk.f32.gmra.mrb[6].mxu1 %vm199_vm1, %v6621_v20  ;;  %5679 = vmatprep.mubr.msk.f32.mxu0 %vm199_vm1, %v6624_v21  ;;  %v6761_v48 = vld [vmem:[%s6529_s20 + $0x188] sm:$0xff]  ;;  %v6767_v50 = vld [vmem:[%s6529_s20 + $0x190] sm:$0xff]  ;;  %v6781_v52 = vld [vmem:[%s6529_s20 + $0x198] sm:$0xff] }
  0x23   : > { %5721 = vmatprep.mubr.msk.f32.mxu1 %vm199_vm1, %v6627_v22  ;;  %v6784_v53 = vld [vmem:[%s6529_s20 + $0xc0] sm:$0xff]  ;;  %v6798_v55 = vld [vmem:[%s6529_s20 + $0xc8] sm:$0xff]  ;;  %v6804_v57 = vld [vmem:[%s6529_s20 + $0xd0] sm:$0xff] }
  0x24   : > { %v6787_v54 = vld [vmem:[%s6529_s20 + $0x1a0] sm:$0xff]  ;;  %v6801_v56 = vld [vmem:[%s6529_s20 + $0x1a8] sm:$0xff]  ;;  %v6815_v58 = vld [vmem:[%s6529_s20 + $0xd8] sm:$0xff] }
  0x25   : > { %5680 = vmatmul.mubr.msk.f32.gmra.mrb[8].mxu0 %vm199_vm1, %v6638_v23 }
  0x26   : > { %5722 = vmatmul.mubr.msk.f32.gmra.mrb[8].mxu1 %vm199_vm1, %v6641_v24  ;;  %5682 = vmatprep.mubr.msk.f32.mxu0 %vm199_vm1, %v6644_v25 }
  0x27   : > { %5724 = vmatprep.mubr.msk.f32.mxu1 %vm199_vm1, %v6647_v26 }
  0x29   : > { %5683 = vmatmul.mubr.msk.f32.gmra.mrb[10].mxu0 %vm199_vm1, %v6658_v27 }
  0x2a   : > { %5725 = vmatmul.mubr.msk.f32.gmra.mrb[10].mxu1 %vm199_vm1, %v6661_v28  ;;  %5685 = vmatprep.mubr.msk.f32.mxu0 %vm199_vm1, %v6664_v29 }
  0x2b   : > { %5727 = vmatprep.mubr.msk.f32.mxu1 %vm199_vm1, %v6667_v30 }
  0x2d   : > { %5686 = vmatmul.mubr.msk.f32.gmra.mrb[12].mxu0 %vm199_vm1, %v6678_v31 }
  0x2e   : > { %5728 = vmatmul.mubr.msk.f32.gmra.mrb[12].mxu1 %vm199_vm1, %v6681_v32  ;;  %5688 = vmatprep.mubr.msk.f32.mxu0 %vm199_vm1, %v6684_v33 }
  0x2f   : > { %5730 = vmatprep.mubr.msk.f32.mxu1 %vm199_vm1, %v6687_v34 }
  0x31   : > { %5689 = vmatmul.mubr.msk.f32.gmra.mrb[14].mxu0 %vm199_vm1, %v6698_v35 }
  0x32   : > { %5731 = vmatmul.mubr.msk.f32.gmra.mrb[14].mxu1 %vm199_vm1, %v6701_v36  ;;  %5691 = vmatprep.mubr.msk.f32.mxu0 %vm199_vm1, %v6704_v37 }
  0x33   : > { %5733 = vmatprep.mubr.msk.f32.mxu1 %vm199_vm1, %v6707_v38 }
  0x35   : > { %5692 = vmatmul.mubr.msk.f32.gmra.mrb[16].mxu0 %vm199_vm1, %v6718_v39 }
  0x36   : > { %5734 = vmatmul.mubr.msk.f32.gmra.mrb[16].mxu1 %vm199_vm1, %v6721_v40  ;;  %5694 = vmatprep.mubr.msk.f32.mxu0 %vm199_vm1, %v6724_v41 }
  0x37   : > { %5736 = vmatprep.mubr.msk.f32.mxu1 %vm199_vm1, %v6727_v42 }
  0x39   : > { %5695 = vmatmul.mubr.msk.f32.gmra.mrb[18].mxu0 %vm199_vm1, %v6738_v43 }
  0x3a   : > { %5737 = vmatmul.mubr.msk.f32.gmra.mrb[18].mxu1 %vm199_vm1, %v6741_v44  ;;  %5697 = vmatprep.mubr.msk.f32.mxu0 %vm199_vm1, %v6744_v45 }
  0x3b   : > { %5739 = vmatprep.mubr.msk.f32.mxu1 %vm199_vm1, %v6747_v46 }
  0x3d   : > { %5698 = vmatmul.mubr.msk.f32.gmra.mrb[20].mxu0 %vm199_vm1, %v6758_v47 }
  0x3e   : > { %5740 = vmatmul.mubr.msk.f32.gmra.mrb[20].mxu1 %vm199_vm1, %v6761_v48  ;;  %5700 = vmatprep.mubr.msk.f32.mxu0 %vm199_vm1, %v6764_v49 }
  0x3f   : > { %5742 = vmatprep.mubr.msk.f32.mxu1 %vm199_vm1, %v6767_v50 }
  0x41   : > { %5701 = vmatmul.mubr.msk.f32.gmra.mrb[22].mxu0 %vm199_vm1, %v6778_v51 }
  0x42   : > { %5743 = vmatmul.mubr.msk.f32.gmra.mrb[22].mxu1 %vm199_vm1, %v6781_v52  ;;  %5703 = vmatprep.mubr.msk.f32.mxu0 %vm199_vm1, %v6784_v53 }
  0x43   : > { %5745 = vmatprep.mubr.msk.f32.mxu1 %vm199_vm1, %v6787_v54 }
  0x45   : > { %5704 = vmatmul.mubr.msk.f32.gmra.mrb[24].mxu0 %vm199_vm1, %v6798_v55 }
  0x46   : > { %5746 = vmatmul.mubr.msk.f32.gmra.mrb[24].mxu1 %vm199_vm1, %v6801_v56  ;;  %5706 = vmatprep.mubr.msk.f32.mxu0 %vm199_vm1, %v6804_v57 }
  0x47   : > { %5750 = vmatprep.mubr.msk.f32.mxu1 %vm199_vm1, %v6532_v3 }
  0x49   : > { %5707 = vmatmul.mubr.msk.f32.gmra.mrb[26].mxu0 %vm199_vm1, %v6815_v58 }
  0x4a   : > { %5751 = vmatmul.mubr.msk.f32.vlgmr.msra.gmra.mrb[26].mxu1 %vm199_vm1, %v6538_v5  ;;  %5833 = vmatprep.mubr.msk.f32.mxu0 %vm199_vm1, %v6532_v3 }
  0x4b   : > { %5915 = vmatpush3.msk.msra.mxu1 %vm362_vm0, %v6560_v9  ;;  %5753 = vmatprep.mubr.msk.f32.mxu1 %vm199_vm1, %v6548_v7 }
  0x4c   : > { %6080 = vmatprep.subr.msk.mxu1 %vm362_vm0, %v6820_v59 }
  0x4d   : > { %5834 = vmatmul.mubr.msk.f32.vlgmr.msra.gmra.mrb[28].mxu0 %vm199_vm1, %v6538_v5 }
  0x4e   : > { %5754 = vmatmul.mubr.msk.f32.gmra.mrb[28].mxu1 %vm199_vm1, %v6570_v11  ;;  %5998 = vmatpush3.msk.msra.mxu0 %vm362_vm0, %v6565_v10 }
  0x4f   : > { %5756 = vmatprep.mubr.msk.f32.mxu1 %vm199_vm1, %v6580_v13  ;;  %5836 = vmatprep.mubr.msk.f32.mxu0 %vm199_vm1, %v6548_v7 }
  0x50   : > { %6163 = vmatprep.subr.msk.mxu0 %vm362_vm0, %v6837_v60 }
  0x51   : > { %5837 = vmatmul.mubr.msk.f32.gmra.mrb[30].mxu0 %vm199_vm1, %v6570_v11 }
  0x52   : > { %5757 = vmatmul.mubr.msk.f32.gmra.mrb[30].mxu1 %vm199_vm1, %v6598_v15  ;;  %5839 = vmatprep.mubr.msk.f32.mxu0 %vm199_vm1, %v6580_v13 }
  0x53   : > { %5759 = vmatprep.mubr.msk.f32.mxu1 %vm199_vm1, %v6604_v17 }
  0x55   : > { %5840 = vmatmul.mubr.msk.f32.gmra.mrb[32].mxu0 %vm199_vm1, %v6598_v15 }
  0x56   : > { %5760 = vmatmul.mubr.msk.f32.gmra.mrb[32].mxu1 %vm199_vm1, %v6618_v19  ;;  %5842 = vmatprep.mubr.msk.f32.mxu0 %vm199_vm1, %v6604_v17 }
  0x57   : > { %5762 = vmatprep.mubr.msk.f32.mxu1 %vm199_vm1, %v6624_v21 }
  0x59   : > { %5843 = vmatmul.mubr.msk.f32.gmra.mrb[34].mxu0 %vm199_vm1, %v6618_v19 }
  0x5a   : > { %5763 = vmatmul.mubr.msk.f32.gmra.mrb[34].mxu1 %vm199_vm1, %v6638_v23  ;;  %5845 = vmatprep.mubr.msk.f32.mxu0 %vm199_vm1, %v6624_v21 }
  0x5b   : > { %5765 = vmatprep.mubr.msk.f32.mxu1 %vm199_vm1, %v6644_v25 }
  0x5d   : > { %5846 = vmatmul.mubr.msk.f32.gmra.mrb[36].mxu0 %vm199_vm1, %v6638_v23 }
  0x5e   : > { %5766 = vmatmul.mubr.msk.f32.gmra.mrb[36].mxu1 %vm199_vm1, %v6658_v27  ;;  %5848 = vmatprep.mubr.msk.f32.mxu0 %vm199_vm1, %v6644_v25 }
  0x5f   : > { %5768 = vmatprep.mubr.msk.f32.mxu1 %vm199_vm1, %v6664_v29 }
  0x61   : > { %5849 = vmatmul.mubr.msk.f32.gmra.mrb[38].mxu0 %vm199_vm1, %v6658_v27 }
  0x62   : > { %5769 = vmatmul.mubr.msk.f32.gmra.mrb[38].mxu1 %vm199_vm1, %v6678_v31  ;;  %5851 = vmatprep.mubr.msk.f32.mxu0 %vm199_vm1, %v6664_v29 }
  0x63   : > { %5771 = vmatprep.mubr.msk.f32.mxu1 %vm199_vm1, %v6684_v33 }
  0x65   : > { %5852 = vmatmul.mubr.msk.f32.gmra.mrb[40].mxu0 %vm199_vm1, %v6678_v31 }
  0x66   : > { %5772 = vmatmul.mubr.msk.f32.gmra.mrb[40].mxu1 %vm199_vm1, %v6698_v35  ;;  %5854 = vmatprep.mubr.msk.f32.mxu0 %vm199_vm1, %v6684_v33 }
  0x67   : > { %5774 = vmatprep.mubr.msk.f32.mxu1 %vm199_vm1, %v6704_v37 }
  0x69   : > { %5855 = vmatmul.mubr.msk.f32.gmra.mrb[42].mxu0 %vm199_vm1, %v6698_v35 }
  0x6a   : > { %5775 = vmatmul.mubr.msk.f32.gmra.mrb[42].mxu1 %vm199_vm1, %v6718_v39  ;;  %5857 = vmatprep.mubr.msk.f32.mxu0 %vm199_vm1, %v6704_v37 }
  0x6b   : > { %5777 = vmatprep.mubr.msk.f32.mxu1 %vm199_vm1, %v6724_v41 }
  0x6d   : > { %5858 = vmatmul.mubr.msk.f32.gmra.mrb[44].mxu0 %vm199_vm1, %v6718_v39 }
  0x6e   : > { %5778 = vmatmul.mubr.msk.f32.gmra.mrb[44].mxu1 %vm199_vm1, %v6738_v43  ;;  %5860 = vmatprep.mubr.msk.f32.mxu0 %vm199_vm1, %v6724_v41 }
  0x6f   : > { %5780 = vmatprep.mubr.msk.f32.mxu1 %vm199_vm1, %v6744_v45 }
  0x71   : > { %5861 = vmatmul.mubr.msk.f32.gmra.mrb[46].mxu0 %vm199_vm1, %v6738_v43 }
  0x72   : > { %5781 = vmatmul.mubr.msk.f32.gmra.mrb[46].mxu1 %vm199_vm1, %v6758_v47  ;;  %5863 = vmatprep.mubr.msk.f32.mxu0 %vm199_vm1, %v6744_v45 }
  0x73   : > { %5783 = vmatprep.mubr.msk.f32.mxu1 %vm199_vm1, %v6764_v49 }
  0x75   : > { %5864 = vmatmul.mubr.msk.f32.gmra.mrb[48].mxu0 %vm199_vm1, %v6758_v47 }
  0x76   : > { %5784 = vmatmul.mubr.msk.f32.gmra.mrb[48].mxu1 %vm199_vm1, %v6778_v51  ;;  %5866 = vmatprep.mubr.msk.f32.mxu0 %vm199_vm1, %v6764_v49 }
  0x77   : > { %5786 = vmatprep.mubr.msk.f32.mxu1 %vm199_vm1, %v6784_v53 }
  0x79   : > { %5867 = vmatmul.mubr.msk.f32.gmra.mrb[50].mxu0 %vm199_vm1, %v6778_v51 }
  0x7a   : > { %5787 = vmatmul.mubr.msk.f32.gmra.mrb[50].mxu1 %vm199_vm1, %v6798_v55  ;;  %5869 = vmatprep.mubr.msk.f32.mxu0 %vm199_vm1, %v6784_v53 }
  0x7b   : > { %5789 = vmatprep.mubr.msk.f32.mxu1 %vm199_vm1, %v6804_v57 }
  0x7d   : > { %5870 = vmatmul.mubr.msk.f32.gmra.mrb[52].mxu0 %vm199_vm1, %v6798_v55 }
  0x7e   : > { %5790 = vmatmul.mubr.msk.f32.gmra.mrb[52].mxu1 %vm199_vm1, %v6815_v58  ;;  %5872 = vmatprep.mubr.msk.f32.mxu0 %vm199_vm1, %v6804_v57 }
  0x7f   : > { %5792 = vmatprep.mubr.msk.f32.mxu1 %vm199_vm1, %v6535_v4 }
  0x81   : > { %5873 = vmatmul.mubr.msk.f32.gmra.mrb[54].mxu0 %vm199_vm1, %v6815_v58 }
  0x82   : > { %5793 = vmatmul.mubr.msk.f32.gmra.mrb[54].mxu1 %vm199_vm1, %v6545_v6  ;;  %5875 = vmatprep.mubr.msk.f32.mxu0 %vm199_vm1, %v6535_v4 }
  0x83   : > { %5795 = vmatprep.mubr.msk.f32.mxu1 %vm199_vm1, %v6551_v8 }
  0x85   : > { %5876 = vmatmul.mubr.msk.f32.gmra.mrb[56].mxu0 %vm199_vm1, %v6545_v6 }
  0x86   : > { %5796 = vmatmul.mubr.msk.f32.gmra.mrb[56].mxu1 %vm199_vm1, %v6573_v12  ;;  %5878 = vmatprep.mubr.msk.f32.mxu0 %vm199_vm1, %v6551_v8 }
  0x87   : > { %5798 = vmatprep.mubr.msk.f32.mxu1 %vm199_vm1, %v6583_v14 }
  0x89   : > { %5879 = vmatmul.mubr.msk.f32.gmra.mrb[58].mxu0 %vm199_vm1, %v6573_v12 }
  0x8a   : > { %5799 = vmatmul.mubr.msk.f32.gmra.mrb[58].mxu1 %vm199_vm1, %v6601_v16  ;;  %5881 = vmatprep.mubr.msk.f32.mxu0 %vm199_vm1, %v6583_v14 }
  0x8b   : > { %5801 = vmatprep.mubr.msk.f32.mxu1 %vm199_vm1, %v6607_v18 }
  0x8d   : > { %5882 = vmatmul.mubr.msk.f32.gmra.mrb[60].mxu0 %vm199_vm1, %v6601_v16 }
  0x8e   : > { %5802 = vmatmul.mubr.msk.f32.gmra.mrb[60].mxu1 %vm199_vm1, %v6621_v20  ;;  %5884 = vmatprep.mubr.msk.f32.mxu0 %vm199_vm1, %v6607_v18 }
  0x8f   : > { %5804 = vmatprep.mubr.msk.f32.mxu1 %vm199_vm1, %v6627_v22 }
  0x91   : > { %5885 = vmatmul.mubr.msk.f32.gmra.mrb[62].mxu0 %vm199_vm1, %v6621_v20 }
  0x92   : > { %5805 = vmatmul.mubr.msk.f32.gmra.mrb[62].mxu1 %vm199_vm1, %v6641_v24  ;;  %5887 = vmatprep.mubr.msk.f32.mxu0 %vm199_vm1, %v6627_v22 }
  0x93   : > { %5807 = vmatprep.mubr.msk.f32.mxu1 %vm199_vm1, %v6647_v26 }
  0x95   : > { %5888 = vmatmul.mubr.msk.f32.gmra.mrb[64].mxu0 %vm199_vm1, %v6641_v24 }
  0x96   : > { %5808 = vmatmul.mubr.msk.f32.gmra.mrb[64].mxu1 %vm199_vm1, %v6661_v28  ;;  %5890 = vmatprep.mubr.msk.f32.mxu0 %vm199_vm1, %v6647_v26 }
  0x97   : > { %5810 = vmatprep.mubr.msk.f32.mxu1 %vm199_vm1, %v6667_v30 }
  0x99   : > { %5891 = vmatmul.mubr.msk.f32.gmra.mrb[66].mxu0 %vm199_vm1, %v6661_v28 }
  0x9a   : > { %5811 = vmatmul.mubr.msk.f32.gmra.mrb[66].mxu1 %vm199_vm1, %v6681_v32  ;;  %5893 = vmatprep.mubr.msk.f32.mxu0 %vm199_vm1, %v6667_v30 }
  0x9b   : > { %5813 = vmatprep.mubr.msk.f32.mxu1 %vm199_vm1, %v6687_v34 }
  0x9d   : > { %5894 = vmatmul.mubr.msk.f32.gmra.mrb[68].mxu0 %vm199_vm1, %v6681_v32 }
  0x9e   : > { %5814 = vmatmul.mubr.msk.f32.gmra.mrb[68].mxu1 %vm199_vm1, %v6701_v36  ;;  %5896 = vmatprep.mubr.msk.f32.mxu0 %vm199_vm1, %v6687_v34 }
  0x9f   : > { %5816 = vmatprep.mubr.msk.f32.mxu1 %vm199_vm1, %v6707_v38 }
  0xa1   : > { %5897 = vmatmul.mubr.msk.f32.gmra.mrb[70].mxu0 %vm199_vm1, %v6701_v36 }
  0xa2   : > { %5817 = vmatmul.mubr.msk.f32.gmra.mrb[70].mxu1 %vm199_vm1, %v6721_v40  ;;  %5899 = vmatprep.mubr.msk.f32.mxu0 %vm199_vm1, %v6707_v38 }
  0xa3   : > { %5819 = vmatprep.mubr.msk.f32.mxu1 %vm199_vm1, %v6727_v42 }
  0xa5   : > { %5900 = vmatmul.mubr.msk.f32.gmra.mrb[72].mxu0 %vm199_vm1, %v6721_v40 }
  0xa6   : > { %5820 = vmatmul.mubr.msk.f32.gmra.mrb[72].mxu1 %vm199_vm1, %v6741_v44  ;;  %5902 = vmatprep.mubr.msk.f32.mxu0 %vm199_vm1, %v6727_v42 }
  0xa7   : > { %5822 = vmatprep.mubr.msk.f32.mxu1 %vm199_vm1, %v6747_v46 }
  0xa9   : > { %5903 = vmatmul.mubr.msk.f32.gmra.mrb[74].mxu0 %vm199_vm1, %v6741_v44 }
  0xaa   : > { %5823 = vmatmul.mubr.msk.f32.gmra.mrb[74].mxu1 %vm199_vm1, %v6761_v48  ;;  %5905 = vmatprep.mubr.msk.f32.mxu0 %vm199_vm1, %v6747_v46 }
  0xab   : > { %5825 = vmatprep.mubr.msk.f32.mxu1 %vm199_vm1, %v6767_v50 }
  0xad   : > { %5906 = vmatmul.mubr.msk.f32.gmra.mrb[76].mxu0 %vm199_vm1, %v6761_v48 }
  0xae   : > { %5826 = vmatmul.mubr.msk.f32.gmra.mrb[76].mxu1 %vm199_vm1, %v6781_v52  ;;  %5908 = vmatprep.mubr.msk.f32.mxu0 %vm199_vm1, %v6767_v50 }
  0xaf   : > { %5828 = vmatprep.mubr.msk.f32.mxu1 %vm199_vm1, %v6787_v54 }
  0xb1   : > { %5909 = vmatmul.mubr.msk.f32.gmra.mrb[78].mxu0 %vm199_vm1, %v6781_v52 }
  0xb2   : > { %5829 = vmatmul.mubr.msk.f32.gmra.mrb[78].mxu1 %vm199_vm1, %v6801_v56  ;;  %5911 = vmatprep.mubr.msk.f32.mxu0 %vm199_vm1, %v6787_v54 }
  0xb3   : > { %5916 = vmatprep.mubr.msk.f32.mxu1 %vm199_vm1, %v6532_v3 }
  0xb5   : > { %5912 = vmatmul.mubr.msk.f32.gmra.mrb[80].mxu0 %vm199_vm1, %v6801_v56 }
  0xb6   : > { %5917 = vmatmul.mubr.msk.f32.vlgmr.msra.gmra.mrb[80].mxu1 %vm199_vm1, %v6538_v5  ;;  %5999 = vmatprep.mubr.msk.f32.mxu0 %vm199_vm1, %v6532_v3 }
  0xb7   : > { %6081 = vmatpush3.msk.msra.mxu1 %vm362_vm0, %v6820_v59  ;;  %5919 = vmatprep.mubr.msk.f32.mxu1 %vm199_vm1, %v6548_v7 }
  0xb8   : > { %6246 = vmatprep.subr.msk.mxu1 %vm362_vm0, %v7054_v61 }
  0xb9   : > { %6000 = vmatmul.mubr.msk.f32.vlgmr.msra.gmra.mrb[82].mxu0 %vm199_vm1, %v6538_v5 }
  0xba   : > { %5920 = vmatmul.mubr.msk.f32.gmra.mrb[82].mxu1 %vm199_vm1, %v6570_v11  ;;  %6164 = vmatpush3.msk.msra.mxu0 %vm362_vm0, %v6837_v60 }
  0xbb   : > { %5922 = vmatprep.mubr.msk.f32.mxu1 %vm199_vm1, %v6580_v13  ;;  %6002 = vmatprep.mubr.msk.f32.mxu0 %vm199_vm1, %v6548_v7 }
  0xbc   : > { %6329 = vmatprep.subr.msk.mxu0 %vm362_vm0, %v7071_v62 }
  0xbd   : > { %6003 = vmatmul.mubr.msk.f32.gmra.mrb[84].mxu0 %vm199_vm1, %v6570_v11 }
  0xbe   : > { %5923 = vmatmul.mubr.msk.f32.gmra.mrb[84].mxu1 %vm199_vm1, %v6598_v15  ;;  %6005 = vmatprep.mubr.msk.f32.mxu0 %vm199_vm1, %v6580_v13 }
  0xbf   : > { %5925 = vmatprep.mubr.msk.f32.mxu1 %vm199_vm1, %v6604_v17 }
  0xc1   : > { %6006 = vmatmul.mubr.msk.f32.gmra.mrb[86].mxu0 %vm199_vm1, %v6598_v15 }
  0xc2   : > { %5926 = vmatmul.mubr.msk.f32.gmra.mrb[86].mxu1 %vm199_vm1, %v6618_v19  ;;  %6008 = vmatprep.mubr.msk.f32.mxu0 %vm199_vm1, %v6604_v17 }
  0xc3   : > { %5928 = vmatprep.mubr.msk.f32.mxu1 %vm199_vm1, %v6624_v21 }
  0xc5   : > { %6009 = vmatmul.mubr.msk.f32.gmra.mrb[88].mxu0 %vm199_vm1, %v6618_v19 }
  0xc6   : > { %5929 = vmatmul.mubr.msk.f32.gmra.mrb[88].mxu1 %vm199_vm1, %v6638_v23  ;;  %6011 = vmatprep.mubr.msk.f32.mxu0 %vm199_vm1, %v6624_v21 }
  0xc7   : > { %5931 = vmatprep.mubr.msk.f32.mxu1 %vm199_vm1, %v6644_v25 }
  0xc9   : > { %6012 = vmatmul.mubr.msk.f32.gmra.mrb[90].mxu0 %vm199_vm1, %v6638_v23 }
  0xca   : > { %5932 = vmatmul.mubr.msk.f32.gmra.mrb[90].mxu1 %vm199_vm1, %v6658_v27  ;;  %6014 = vmatprep.mubr.msk.f32.mxu0 %vm199_vm1, %v6644_v25 }
  0xcb   : > { %5934 = vmatprep.mubr.msk.f32.mxu1 %vm199_vm1, %v6664_v29 }
  0xcd   : > { %6015 = vmatmul.mubr.msk.f32.gmra.mrb[92].mxu0 %vm199_vm1, %v6658_v27 }
  0xce   : > { %5935 = vmatmul.mubr.msk.f32.gmra.mrb[92].mxu1 %vm199_vm1, %v6678_v31  ;;  %6017 = vmatprep.mubr.msk.f32.mxu0 %vm199_vm1, %v6664_v29 }
  0xcf   : > { %5937 = vmatprep.mubr.msk.f32.mxu1 %vm199_vm1, %v6684_v33 }
  0xd1   : > { %6018 = vmatmul.mubr.msk.f32.gmra.mrb[94].mxu0 %vm199_vm1, %v6678_v31 }
  0xd2   : > { %5938 = vmatmul.mubr.msk.f32.gmra.mrb[94].mxu1 %vm199_vm1, %v6698_v35  ;;  %6020 = vmatprep.mubr.msk.f32.mxu0 %vm199_vm1, %v6684_v33 }
  0xd3   : > { %5940 = vmatprep.mubr.msk.f32.mxu1 %vm199_vm1, %v6704_v37 }
  0xd5   : > { %6021 = vmatmul.mubr.msk.f32.gmra.mrb[96].mxu0 %vm199_vm1, %v6698_v35 }
  0xd6   : > { %5941 = vmatmul.mubr.msk.f32.gmra.mrb[96].mxu1 %vm199_vm1, %v6718_v39  ;;  %6023 = vmatprep.mubr.msk.f32.mxu0 %vm199_vm1, %v6704_v37 }
  0xd7   : > { %5943 = vmatprep.mubr.msk.f32.mxu1 %vm199_vm1, %v6724_v41 }
  0xd9   : > { %6024 = vmatmul.mubr.msk.f32.gmra.mrb[98].mxu0 %vm199_vm1, %v6718_v39 }
  0xda   : > { %5944 = vmatmul.mubr.msk.f32.gmra.mrb[98].mxu1 %vm199_vm1, %v6738_v43  ;;  %6026 = vmatprep.mubr.msk.f32.mxu0 %vm199_vm1, %v6724_v41 }
  0xdb   : > { %5946 = vmatprep.mubr.msk.f32.mxu1 %vm199_vm1, %v6744_v45 }
  0xdd   : > { %6027 = vmatmul.mubr.msk.f32.gmra.mrb[100].mxu0 %vm199_vm1, %v6738_v43 }
  0xde   : > { %5947 = vmatmul.mubr.msk.f32.gmra.mrb[100].mxu1 %vm199_vm1, %v6758_v47  ;;  %6029 = vmatprep.mubr.msk.f32.mxu0 %vm199_vm1, %v6744_v45 }
  0xdf   : > { %5949 = vmatprep.mubr.msk.f32.mxu1 %vm199_vm1, %v6764_v49 }
  0xe1   : > { %6030 = vmatmul.mubr.msk.f32.gmra.mrb[102].mxu0 %vm199_vm1, %v6758_v47 }
  0xe2   : > { %5950 = vmatmul.mubr.msk.f32.gmra.mrb[102].mxu1 %vm199_vm1, %v6778_v51  ;;  %6032 = vmatprep.mubr.msk.f32.mxu0 %vm199_vm1, %v6764_v49 }
  0xe3   : > { %5952 = vmatprep.mubr.msk.f32.mxu1 %vm199_vm1, %v6784_v53 }
  0xe5   : > { %6033 = vmatmul.mubr.msk.f32.gmra.mrb[104].mxu0 %vm199_vm1, %v6778_v51 }
  0xe6   : > { %5953 = vmatmul.mubr.msk.f32.gmra.mrb[104].mxu1 %vm199_vm1, %v6798_v55  ;;  %6035 = vmatprep.mubr.msk.f32.mxu0 %vm199_vm1, %v6784_v53 }
  0xe7   : > { %5955 = vmatprep.mubr.msk.f32.mxu1 %vm199_vm1, %v6804_v57 }
  0xe8   : > { %v7173_v63 = vpop.f32.mrb[0].mxu0 }
  0xe9   : > { %v5711_v0 = vpop.f32.mrb[0].mxu1  ;;  %v7175_v1 = vpop.f32.mrb[1].mxu0  ;;  %6036 = vmatmul.mubr.msk.f32.gmra.mrb[106].mxu0 %vm199_vm1, %v6798_v55 }
  0xea   : > { %5956 = vmatmul.mubr.msk.f32.gmra.mrb[106].mxu1 %vm199_vm1, %v6815_v58  ;;  %v7181_v2 = vpop.f32.mrb[1].mxu1  ;;  %6038 = vmatprep.mubr.msk.f32.mxu0 %vm199_vm1, %v6804_v57 }
  0xeb   : > { %8441 = vst [vmem:[#allocation2_spill] sm:$0xff] %v7181_v2  ;;  %5958 = vmatprep.mubr.msk.f32.mxu1 %vm199_vm1, %v6535_v4 }
  0xec   : > { %v7187_v9 = vpop.f32.mrb[2].mxu0 }
  0xed   : > { %v7189_v10 = vpop.f32.mrb[2].mxu1  ;;  %v442_v59 = vpop.f32.mrb[3].mxu0  ;;  %6039 = vmatmul.mubr.msk.f32.gmra.mrb[108].mxu0 %vm199_vm1, %v6815_v58 }
  0xee   : > { %5959 = vmatmul.mubr.msk.f32.gmra.mrb[108].mxu1 %vm199_vm1, %v6545_v6  ;;  %v7195_v60 = vpop.f32.mrb[3].mxu1  ;;  %6041 = vmatprep.mubr.msk.f32.mxu0 %vm199_vm1, %v6535_v4 }
  0xef   : > { %5961 = vmatprep.mubr.msk.f32.mxu1 %vm199_vm1, %v6551_v8 }
  0xf0   : > { %v5675_v57 = vpop.f32.mrb[4].mxu0 }
  0xf1   : > { %v7201_v0 = vpop.f32.mrb[4].mxu1  ;;  %v7203_v2 = vpop.f32.mrb[5].mxu0  ;;  %6042 = vmatmul.mubr.msk.f32.gmra.mrb[110].mxu0 %vm199_vm1, %v6545_v6 }
  0xf2   : > { %8442 = vst [vmem:[#allocation3_spill] sm:$0xff] %v7201_v0  ;;  %5962 = vmatmul.mubr.msk.f32.gmra.mrb[110].mxu1 %vm199_vm1, %v6573_v12  ;;  %v582_v58 = vpop.f32.mrb[5].mxu1  ;;  %6044 = vmatprep.mubr.msk.f32.mxu0 %vm199_vm1, %v6551_v8 }
  0xf3   : > { %5964 = vmatprep.mubr.msk.f32.mxu1 %vm199_vm1, %v6583_v14 }
  0xf4   : > { %v7213_v59 = vpop.f32.mrb[6].mxu0 }
  0xf5   : > { %v5720_v4 = vpop.f32.mrb[6].mxu1  ;;  %v7215_v57 = vpop.f32.mrb[7].mxu0  ;;  %6045 = vmatmul.mubr.msk.f32.gmra.mrb[112].mxu0 %vm199_vm1, %v6573_v12 }
  0xf6   : > { %5965 = vmatmul.mubr.msk.f32.gmra.mrb[112].mxu1 %vm199_vm1, %v6601_v16  ;;  %v7221_v0 = vpop.f32.mrb[7].mxu1  ;;  %6047 = vmatprep.mubr.msk.f32.mxu0 %vm199_vm1, %v6583_v14 }
  0xf7   : > { %8443 = vst [vmem:[#allocation4_spill] sm:$0xff] %v7221_v0  ;;  %5967 = vmatprep.mubr.msk.f32.mxu1 %vm199_vm1, %v6607_v18 }
  0xf8   : > { %v7227_v6 = vpop.f32.mrb[8].mxu0 }
  0xf9   : > { %v7229_v8 = vpop.f32.mrb[8].mxu1  ;;  %v470_v58 = vpop.f32.mrb[9].mxu0  ;;  %6048 = vmatmul.mubr.msk.f32.gmra.mrb[114].mxu0 %vm199_vm1, %v6601_v16 }
  0xfa   : > { %8444 = vst [vmem:[#allocation5_spill] sm:$0xff] %v7229_v8  ;;  %5968 = vmatmul.mubr.msk.f32.gmra.mrb[114].mxu1 %vm199_vm1, %v6621_v20  ;;  %v7235_v12 = vpop.f32.mrb[9].mxu1  ;;  %6050 = vmatprep.mubr.msk.f32.mxu0 %vm199_vm1, %v6607_v18 }
  0xfb   : > { %5970 = vmatprep.mubr.msk.f32.mxu1 %vm199_vm1, %v6627_v22 }
  0xfc   : > { %v5684_v14 = vpop.f32.mrb[10].mxu0 }
  0xfd   : > { %v7241_v4 = vpop.f32.mrb[10].mxu1  ;;  %v7243_v0 = vpop.f32.mrb[11].mxu0  ;;  %6051 = vmatmul.mubr.msk.f32.gmra.mrb[116].mxu0 %vm199_vm1, %v6621_v20 }
  0xfe   : > { %8445 = vst [vmem:[#allocation6_spill] sm:$0xff] %v7241_v4  ;;  %5971 = vmatmul.mubr.msk.f32.gmra.mrb[116].mxu1 %vm199_vm1, %v6641_v24  ;;  %v610_v16 = vpop.f32.mrb[11].mxu1  ;;  %6053 = vmatprep.mubr.msk.f32.mxu0 %vm199_vm1, %v6627_v22 }
  0xff   : > { %5973 = vmatprep.mubr.msk.f32.mxu1 %vm199_vm1, %v6647_v26 }
 0x100   : > { %v7253_v58 = vpop.f32.mrb[12].mxu0 }
 0x101   : > { %v5729_v18 = vpop.f32.mrb[12].mxu1  ;;  %v7255_v14 = vpop.f32.mrb[13].mxu0  ;;  %6054 = vmatmul.mubr.msk.f32.gmra.mrb[118].mxu0 %vm199_vm1, %v6641_v24 }
 0x102   : > { %5974 = vmatmul.mubr.msk.f32.gmra.mrb[118].mxu1 %vm199_vm1, %v6661_v28  ;;  %v7261_v4 = vpop.f32.mrb[13].mxu1  ;;  %6056 = vmatprep.mubr.msk.f32.mxu0 %vm199_vm1, %v6647_v26 }
 0x103   : > { %8446 = vst [vmem:[#allocation7_spill] sm:$0xff] %v7261_v4  ;;  %5976 = vmatprep.mubr.msk.f32.mxu1 %vm199_vm1, %v6667_v30 }
 0x104   : > { %v7267_v20 = vpop.f32.mrb[14].mxu0 }
 0x105   : > { %v7269_v22 = vpop.f32.mrb[14].mxu1  ;;  %v498_v16 = vpop.f32.mrb[15].mxu0  ;;  %6057 = vmatmul.mubr.msk.f32.gmra.mrb[120].mxu0 %vm199_vm1, %v6661_v28 }
 0x106   : > { %8447 = vst [vmem:[#allocation8_spill] sm:$0xff] %v7269_v22  ;;  %5977 = vmatmul.mubr.msk.f32.gmra.mrb[120].mxu1 %vm199_vm1, %v6681_v32  ;;  %v7275_v24 = vpop.f32.mrb[15].mxu1  ;;  %6059 = vmatprep.mubr.msk.f32.mxu0 %vm199_vm1, %v6667_v30 }
 0x107   : > { %8448 = vst [vmem:[#allocation9_spill] sm:$0xff] %v7275_v24  ;;  %5979 = vmatprep.mubr.msk.f32.mxu1 %vm199_vm1, %v6687_v34 }
 0x108   : > { %v5693_v26 = vpop.f32.mrb[16].mxu0 }
 0x109   : > { %v7281_v18 = vpop.f32.mrb[16].mxu1  ;;  %v7283_v4 = vpop.f32.mrb[17].mxu0  ;;  %6060 = vmatmul.mubr.msk.f32.gmra.mrb[122].mxu0 %vm199_vm1, %v6681_v32 }
 0x10a   : > { %8449 = vst [vmem:[#allocation10_spill] sm:$0xff] %v7281_v18  ;;  %5980 = vmatmul.mubr.msk.f32.gmra.mrb[122].mxu1 %vm199_vm1, %v6701_v36  ;;  %v638_v28 = vpop.f32.mrb[17].mxu1  ;;  %6062 = vmatprep.mubr.msk.f32.mxu0 %vm199_vm1, %v6687_v34 }
 0x10b   : > { %5982 = vmatprep.mubr.msk.f32.mxu1 %vm199_vm1, %v6707_v38 }
 0x10c   : > { %v7293_v16 = vpop.f32.mrb[18].mxu0 }
 0x10d   : > { %v5738_v30 = vpop.f32.mrb[18].mxu1  ;;  %v7295_v26 = vpop.f32.mrb[19].mxu0  ;;  %6063 = vmatmul.mubr.msk.f32.gmra.mrb[124].mxu0 %vm199_vm1, %v6701_v36 }
 0x10e   : > { %5983 = vmatmul.mubr.msk.f32.gmra.mrb[124].mxu1 %vm199_vm1, %v6721_v40  ;;  %v7301_v18 = vpop.f32.mrb[19].mxu1  ;;  %6065 = vmatprep.mubr.msk.f32.mxu0 %vm199_vm1, %v6707_v38 }
 0x10f   : > { %8450 = vst [vmem:[#allocation11_spill] sm:$0xff] %v7301_v18  ;;  %5985 = vmatprep.mubr.msk.f32.mxu1 %vm199_vm1, %v6727_v42 }
 0x110   : > { %v7307_v32 = vpop.f32.mrb[20].mxu0 }
 0x111   : > { %v5741_v34 = vpop.f32.mrb[20].mxu1  ;;  %v526_v28 = vpop.f32.mrb[21].mxu0  ;;  %6066 = vmatmul.mubr.msk.f32.gmra.mrb[126].mxu0 %vm199_vm1, %v6721_v40 }
 0x112   : > { %5986 = vmatmul.mubr.msk.f32.gmra.mrb[126].mxu1 %vm199_vm1, %v6741_v44  ;;  %v656_v30 = vpop.f32.mrb[21].mxu1  ;;  %6068 = vmatprep.mubr.msk.f32.mxu0 %vm199_vm1, %v6727_v42 }
 0x113   : > { %5988 = vmatprep.mubr.msk.f32.mxu1 %vm199_vm1, %v6747_v46 }
 0x114   : > { %v5702_v36 = vpop.f32.mrb[22].mxu0 }
 0x115   : > { %v5744_v18 = vpop.f32.mrb[22].mxu1  ;;  %v7317_v38 = vpop.f32.mrb[23].mxu0  ;;  %6069 = vmatmul.mubr.msk.f32.gmra.mrb[128].mxu0 %vm199_vm1, %v6741_v44 }
 0x116   : > { %5989 = vmatmul.mubr.msk.f32.gmra.mrb[128].mxu1 %vm199_vm1, %v6761_v48  ;;  %v664_v34 = vpop.f32.mrb[23].mxu1  ;;  %6071 = vmatprep.mubr.msk.f32.mxu0 %vm199_vm1, %v6747_v46 }
 0x117   : > { %5991 = vmatprep.mubr.msk.f32.mxu1 %vm199_vm1, %v6767_v50 }
 0x118   : > { %v7327_v40 = vpop.f32.mrb[24].mxu0 }
 0x119   : > { %v5747_v42 = vpop.f32.mrb[24].mxu1  ;;  %v7329_v28 = vpop.f32.mrb[25].mxu0  ;;  %6072 = vmatmul.mubr.msk.f32.gmra.mrb[130].mxu0 %vm199_vm1, %v6761_v48 }
 0x11a   : > { %5992 = vmatmul.mubr.msk.f32.gmra.mrb[130].mxu1 %vm199_vm1, %v6781_v52  ;;  %v672_v18 = vpop.f32.mrb[25].mxu1  ;;  %6074 = vmatprep.mubr.msk.f32.mxu0 %vm199_vm1, %v6767_v50 }
 0x11b   : > { %5994 = vmatprep.mubr.msk.f32.mxu1 %vm199_vm1, %v6787_v54 }
 0x11c   : > { %v7339_v44 = vpop.f32.mrb[26].mxu0 }
 0x11d   : > { %v5752_v46 = vpop.f32.mrb[26].mxu1  ;;  %v554_v36 = vpop.f32.mrb[27].mxu0  ;;  %6075 = vmatmul.mubr.msk.f32.gmra.mrb[132].mxu0 %vm199_vm1, %v6781_v52 }
 0x11e   : > { %v1095_v30 = vrot.slane %v5752_v46, 1  ;;  %v782_v34 = vpop.f32.mrb[27].mxu1  ;;  %5995 = vmatmul.mubr.msk.f32.gmra.mrb[132].mxu1 %vm199_vm1, %v6801_v56  ;;  %6077 = vmatprep.mubr.msk.f32.mxu0 %vm199_vm1, %v6787_v54 }
 0x11f   : > { %v1094_v48 = vrot.slane %v782_v34, 1  ;;  %6082 = vmatprep.mubr.msk.f32.mxu1 %vm199_vm1, %v6532_v3 }
 0x120   : > { %v5835_v18 = vpop.f32.mrb[28].mxu0 }
 0x121   : > { %v1096_v50 = vsel %vm1093_vm2, %v1094_v48, %v1095_v30  ;;  %v5755_v42 = vpop.f32.mrb[28].mxu1  ;;  %v1622_v46 = vrot.slane %v5835_v18, 2  ;;  %v1309_v22 = vpop.f32.mrb[29].mxu0  ;;  %6078 = vmatmul.mubr.msk.f32.gmra.mrb[134].mxu0 %vm199_vm1, %v6801_v56 }
 0x122   : > { %v792_v36 = vpop.f32.mrb[29].mxu1  ;;  %6083 = vmatmul.mubr.msk.f32.vlgmr.msra.gmra.mrb[134].mxu1 %vm199_vm1, %v6538_v5  ;;  %v1206_v52 = vadd.f32 %v1096_v50, %v7175_v1  ;;  %v1621_v34 = vrot.slane %v1309_v22, 2  ;;  %6165 = vmatprep.mubr.msk.f32.mxu0 %vm199_vm1, %v6532_v3  ;;  %v1099_v3 = vrot.slane %v5755_v42, 1 }
 0x123   : > { %v1097_v54 = vrot.slane %v792_v36, 1  ;;  %6247 = vmatpush3.msk.msra.mxu1 %vm362_vm0, %v7054_v61  ;;  %6085 = vmatprep.mubr.msk.f32.mxu1 %vm199_vm1, %v6548_v7 }
 0x124   : > { %v5838_v18 = vpop.f32.mrb[30].mxu0  ;;  %v1623_v24 = vsel %vm1620_vm3, %v1621_v34, %v1622_v46 }
 0x125   : > { %v1098_v48 = vsel %vm1093_vm2, %v1095_v30, %v1097_v54  ;;  %v5758_v56 = vpop.f32.mrb[30].mxu1  ;;  %v1319_v50 = vpop.f32.mrb[31].mxu0  ;;  %6166 = vmatmul.mubr.msk.f32.vlgmr.msra.gmra.mrb[136].mxu0 %vm199_vm1, %v6538_v5  ;;  %v7367_v61 = vadd.f32 %v1623_v24, %v1206_v52 }
 0x126   : > { %v1102_v8 = vrot.slane %v5758_v56, 1  ;;  %v802_v1 = vpop.f32.mrb[31].mxu1  ;;  %6086 = vmatmul.mubr.msk.f32.gmra.mrb[136].mxu1 %vm199_vm1, %v6570_v11  ;;  %v1207_v22 = vadd.f32 %v7173_v63, %v1098_v48  ;;  %v1624_v30 = vrot.slane %v1319_v50, 2  ;;  %6330 = vmatpush3.msk.msra.mxu0 %vm362_vm0, %v7071_v62 }
 0x127   : > { %v1100_v36 = vrot.slane %v802_v1, 1  ;;  %6088 = vmatprep.mubr.msk.f32.mxu1 %vm199_vm1, %v6580_v13  ;;  %6168 = vmatprep.mubr.msk.f32.mxu0 %vm199_vm1, %v6548_v7  ;;  %v1626_v1 = vrot.slane %v5838_v18, 2 }
 0x128   : > { %v5841_v52 = vpop.f32.mrb[32].mxu0  ;;  %v1625_v63 = vsel %vm1620_vm3, %v1622_v46, %v1624_v30 }
 0x129   : > { %v1101_v54 = vsel %vm1093_vm2, %v1099_v3, %v1100_v36  ;;  %v1103_v5 = vsel %vm1093_vm2, %v1100_v36, %v1102_v8  ;;  %v5761_v24 = vpop.f32.mrb[32].mxu1  ;;  %v1629_v34 = vrot.slane %v5841_v52, 2  ;;  %v1329_v56 = vpop.f32.mrb[33].mxu0  ;;  %6169 = vmatmul.mubr.msk.f32.gmra.mrb[138].mxu0 %vm199_vm1, %v6570_v11  ;;  %v7383_v62 = vadd.f32 %v1625_v63, %v1207_v22 }
 0x12a   : > { %v1105_v42 = vrot.slane %v5761_v24, 1  ;;  %v812_v48 = vpop.f32.mrb[33].mxu1  ;;  %6089 = vmatmul.mubr.msk.f32.gmra.mrb[138].mxu1 %vm199_vm1, %v6598_v15  ;;  %v1209_v7 = vadd.f32 %v1103_v5, %v7203_v2  ;;  %v1627_v50 = vrot.slane %v1329_v56, 2  ;;  %6171 = vmatprep.mubr.msk.f32.mxu0 %vm199_vm1, %v6580_v13  ;;  %v1208_v46 = vadd.f32 %v7187_v9, %v1101_v54 }
 0x12b   : > { %v1104_v8 = vrot.slane %v812_v48, 1  ;;  %6091 = vmatprep.mubr.msk.f32.mxu1 %vm199_vm1, %v6604_v17 }
 0x12c   : > { %v5844_v30 = vpop.f32.mrb[34].mxu0  ;;  %v1630_v11 = vsel %vm1620_vm3, %v1627_v50, %v1629_v34  ;;  %v1628_v22 = vsel %vm1620_vm3, %v1626_v1, %v1627_v50 }
 0x12d   : > { %v1106_v3 = vsel %vm1093_vm2, %v1104_v8, %v1105_v42  ;;  %v5764_v36 = vpop.f32.mrb[34].mxu1  ;;  %v1632_v2 = vrot.slane %v5844_v30, 2  ;;  %v1339_v5 = vpop.f32.mrb[35].mxu0  ;;  %6172 = vmatmul.mubr.msk.f32.gmra.mrb[140].mxu0 %vm199_vm1, %v6598_v15  ;;  %v7398_v13 = vadd.f32 %v1630_v11, %v1209_v7  ;;  %v7400_v9 = vadd.f32 %v1628_v22, %v1208_v46 }
 0x12e   : > { %v822_v18 = vpop.f32.mrb[35].mxu1  ;;  %6092 = vmatmul.mubr.msk.f32.gmra.mrb[140].mxu1 %vm199_vm1, %v6618_v19  ;;  %v1631_v24 = vrot.slane %v1339_v5, 2  ;;  %6174 = vmatprep.mubr.msk.f32.mxu0 %vm199_vm1, %v6604_v17  ;;  %v1210_v52 = vadd.f32 %v1106_v3, %v7215_v57  ;;  %v1109_v57 = vrot.slane %v5764_v36, 1 }
 0x12f   : > { %v1107_v54 = vrot.slane %v822_v18, 1  ;;  %6094 = vmatprep.mubr.msk.f32.mxu1 %vm199_vm1, %v6624_v21 }
 0x130   : > { %v5847_v48 = vpop.f32.mrb[36].mxu0  ;;  %v1633_v15 = vsel %vm1620_vm3, %v1631_v24, %v1632_v2 }
 0x131   : > { %v1108_v63 = vsel %vm1093_vm2, %v1105_v42, %v1107_v54  ;;  %v5767_v34 = vpop.f32.mrb[36].mxu1  ;;  %v1349_v1 = vpop.f32.mrb[37].mxu0  ;;  %6175 = vmatmul.mubr.msk.f32.gmra.mrb[142].mxu0 %vm199_vm1, %v6618_v19  ;;  %v7413_v8 = vadd.f32 %v1633_v15, %v1210_v52  ;;  %v1636_v54 = vrot.slane %v5847_v48, 2 }
 0x132   : > { %v1112_v56 = vrot.slane %v5767_v34, 1  ;;  %v832_v7 = vpop.f32.mrb[37].mxu1  ;;  %6095 = vmatmul.mubr.msk.f32.gmra.mrb[142].mxu1 %vm199_vm1, %v6638_v23  ;;  %v1211_v17 = vadd.f32 %v7213_v59, %v1108_v63  ;;  %v1634_v42 = vrot.slane %v1349_v1, 2  ;;  %6177 = vmatprep.mubr.msk.f32.mxu0 %vm199_vm1, %v6624_v21 }
 0x133   : > { %v1110_v50 = vrot.slane %v832_v7, 1  ;;  %6097 = vmatprep.mubr.msk.f32.mxu1 %vm199_vm1, %v6644_v25 }
 0x134   : > { %v5850_v11 = vpop.f32.mrb[38].mxu0  ;;  %v1635_v19 = vsel %vm1620_vm3, %v1632_v2, %v1634_v42 }
 0x135   : > { %v1111_v46 = vsel %vm1093_vm2, %v1109_v57, %v1110_v50  ;;  %v1113_v3 = vsel %vm1093_vm2, %v1110_v50, %v1112_v56  ;;  %v5770_v30 = vpop.f32.mrb[38].mxu1  ;;  %v1639_v18 = vrot.slane %v5850_v11, 2  ;;  %v1359_v36 = vpop.f32.mrb[39].mxu0  ;;  %6178 = vmatmul.mubr.msk.f32.gmra.mrb[144].mxu0 %vm199_vm1, %v6638_v23  ;;  %v7427_v5 = vadd.f32 %v1635_v19, %v1211_v17 }
 0x136   : > { %v1115_v22 = vrot.slane %v5770_v30, 1  ;;  %v842_v59 = vpop.f32.mrb[39].mxu1  ;;  %6098 = vmatmul.mubr.msk.f32.gmra.mrb[144].mxu1 %vm199_vm1, %v6658_v27  ;;  %v1213_v21 = vadd.f32 %v1113_v3, %v7243_v0  ;;  %v1637_v52 = vrot.slane %v1359_v36, 2  ;;  %6180 = vmatprep.mubr.msk.f32.mxu0 %vm199_vm1, %v6644_v25  ;;  %v1212_v2 = vadd.f32 %v7227_v6, %v1111_v46 }
 0x137   : > { %v1114_v24 = vrot.slane %v842_v59, 1  ;;  %6100 = vmatprep.mubr.msk.f32.mxu1 %vm199_vm1, %v6664_v29 }
 0x138   : > { %v5853_v15 = vpop.f32.mrb[40].mxu0  ;;  %v1640_v23 = vsel %vm1620_vm3, %v1637_v52, %v1639_v18  ;;  %v1638_v56 = vsel %vm1620_vm3, %v1636_v54, %v1637_v52 }
 0x139   : > { %v1116_v63 = vsel %vm1093_vm2, %v1114_v24, %v1115_v22  ;;  %v5773_v34 = vpop.f32.mrb[40].mxu1  ;;  %v1642_v0 = vrot.slane %v5853_v15, 2  ;;  %v1369_v7 = vpop.f32.mrb[41].mxu0  ;;  %6181 = vmatmul.mubr.msk.f32.gmra.mrb[146].mxu0 %vm199_vm1, %v6658_v27  ;;  %v7442_v25 = vadd.f32 %v1640_v23, %v1213_v21  ;;  %v7444_v6 = vadd.f32 %v1638_v56, %v1212_v2 }
 0x13a   : > { %v852_v48 = vpop.f32.mrb[41].mxu1  ;;  %6101 = vmatmul.mubr.msk.f32.gmra.mrb[146].mxu1 %vm199_vm1, %v6678_v31  ;;  %v1641_v17 = vrot.slane %v1369_v7, 2  ;;  %6183 = vmatprep.mubr.msk.f32.mxu0 %vm199_vm1, %v6664_v29  ;;  %v1214_v57 = vadd.f32 %v1116_v63, %v7255_v14  ;;  %v1119_v14 = vrot.slane %v5773_v34, 1 }
 0x13b   : > { %v1117_v1 = vrot.slane %v852_v48, 1  ;;  %6103 = vmatprep.mubr.msk.f32.mxu1 %vm199_vm1, %v6684_v33 }
 0x13c   : > { %v5856_v46 = vpop.f32.mrb[42].mxu0  ;;  %v1643_v27 = vsel %vm1620_vm3, %v1641_v17, %v1642_v0 }
 0x13d   : > { %v1118_v50 = vsel %vm1093_vm2, %v1115_v22, %v1117_v1  ;;  %v5776_v42 = vpop.f32.mrb[42].mxu1  ;;  %v1379_v11 = vpop.f32.mrb[43].mxu0  ;;  %6184 = vmatmul.mubr.msk.f32.gmra.mrb[148].mxu0 %vm199_vm1, %v6678_v31  ;;  %v7457_v19 = vadd.f32 %v1643_v27, %v1214_v57  ;;  %v1646_v34 = vrot.slane %v5856_v46, 2 }
 0x13e   : > { %v1122_v3 = vrot.slane %v5776_v42, 1  ;;  %v862_v30 = vpop.f32.mrb[43].mxu1  ;;  %6104 = vmatmul.mubr.msk.f32.gmra.mrb[148].mxu1 %vm199_vm1, %v6698_v35  ;;  %v1215_v29 = vadd.f32 %v7253_v58, %v1118_v50  ;;  %v1644_v22 = vrot.slane %v1379_v11, 2  ;;  %6186 = vmatprep.mubr.msk.f32.mxu0 %vm199_vm1, %v6684_v33 }
 0x13f   : > { %v1120_v18 = vrot.slane %v862_v30, 1  ;;  %6106 = vmatprep.mubr.msk.f32.mxu1 %vm199_vm1, %v6704_v37 }
 0x140   : > { %v5859_v54 = vpop.f32.mrb[44].mxu0  ;;  %v1645_v31 = vsel %vm1620_vm3, %v1642_v0, %v1644_v22 }
 0x141   : > { %v1121_v59 = vsel %vm1093_vm2, %v1119_v14, %v1120_v18  ;;  %v1123_v36 = vsel %vm1093_vm2, %v1120_v18, %v1122_v3  ;;  %v5779_v21 = vpop.f32.mrb[44].mxu1  ;;  %v1649_v52 = vrot.slane %v5859_v54, 2  ;;  %v1389_v2 = vpop.f32.mrb[45].mxu0  ;;  %6187 = vmatmul.mubr.msk.f32.gmra.mrb[150].mxu0 %vm199_vm1, %v6698_v35  ;;  %v7471_v63 = vadd.f32 %v1645_v31, %v1215_v29 }
 0x142   : > { %v1125_v24 = vrot.slane %v5779_v21, 1  ;;  %v872_v58 = vpop.f32.mrb[45].mxu1  ;;  %6107 = vmatmul.mubr.msk.f32.gmra.mrb[150].mxu1 %vm199_vm1, %v6718_v39  ;;  %v1217_v33 = vadd.f32 %v1123_v36, %v7283_v4  ;;  %v1647_v23 = vrot.slane %v1389_v2, 2  ;;  %6189 = vmatprep.mubr.msk.f32.mxu0 %vm199_vm1, %v6704_v37  ;;  %v1216_v56 = vadd.f32 %v7267_v20, %v1121_v59 }
 0x143   : > { %v1124_v15 = vrot.slane %v872_v58, 1  ;;  %6109 = vmatprep.mubr.msk.f32.mxu1 %vm199_vm1, %v6724_v41 }
 0x144   : > { %v5862_v7 = vpop.f32.mrb[46].mxu0  ;;  %v1650_v35 = vsel %vm1620_vm3, %v1647_v23, %v1649_v52  ;;  %v1648_v1 = vsel %vm1620_vm3, %v1646_v34, %v1647_v23 }
 0x145   : > { %v1126_v0 = vsel %vm1093_vm2, %v1124_v15, %v1125_v24  ;;  %v5782_v48 = vpop.f32.mrb[46].mxu1  ;;  %v1652_v4 = vrot.slane %v5862_v7, 2  ;;  %v1399_v57 = vpop.f32.mrb[47].mxu0  ;;  %6190 = vmatmul.mubr.msk.f32.gmra.mrb[152].mxu0 %vm199_vm1, %v6718_v39  ;;  %v7486_v37 = vadd.f32 %v1650_v35, %v1217_v33  ;;  %v7488_v20 = vadd.f32 %v1648_v1, %v1216_v56  ;;  %v7521_v15 = vld [vmem:[%s6529_s20 + $0xb0] sm:$0xff]  ;;  %v7532_v35 = vld [vmem:[%s6529_s20 + $0xb8] sm:$0xff] }
 0x146   : > { %v882_v17 = vpop.f32.mrb[47].mxu1  ;;  %6110 = vmatmul.mubr.msk.f32.gmra.mrb[152].mxu1 %vm199_vm1, %v6738_v43  ;;  %v1651_v42 = vrot.slane %v1399_v57, 2  ;;  %6192 = vmatprep.mubr.msk.f32.mxu0 %vm199_vm1, %v6724_v41  ;;  %v1218_v46 = vadd.f32 %v1126_v0, %v7295_v26  ;;  %v1129_v26 = vrot.slane %v5782_v48, 1  ;;  %v7541_v57 = vld [vmem:[%s6529_s20 + $0xd0] sm:$0xff] }
 0x147   : > { %v1127_v50 = vrot.slane %v882_v17, 1  ;;  %6112 = vmatprep.mubr.msk.f32.mxu1 %vm199_vm1, %v6744_v45 }
 0x148   : > { %v5865_v30 = vpop.f32.mrb[48].mxu0  ;;  %v1653_v39 = vsel %vm1620_vm3, %v1651_v42, %v1652_v4 }
 0x149   : > { %v1128_v27 = vsel %vm1093_vm2, %v1125_v24, %v1127_v50  ;;  %v5785_v3 = vpop.f32.mrb[48].mxu1  ;;  %v1409_v14 = vpop.f32.mrb[49].mxu0  ;;  %6193 = vmatmul.mubr.msk.f32.gmra.mrb[154].mxu0 %vm199_vm1, %v6738_v43  ;;  %v7501_v18 = vadd.f32 %v1653_v39, %v1218_v46  ;;  %v1656_v2 = vrot.slane %v5865_v30, 2  ;;  %v7546_v50 = vld [vmem:[%s6529_s20 + $0xc0] sm:$0xff] }
 0x14a   : > { %v1132_v11 = vrot.slane %v5785_v3, 1  ;;  %v892_v29 = vpop.f32.mrb[49].mxu1  ;;  %6113 = vmatmul.mubr.msk.f32.gmra.mrb[154].mxu1 %vm199_vm1, %v6758_v47  ;;  %v1219_v41 = vadd.f32 %v7293_v16, %v1128_v27  ;;  %v1654_v59 = vrot.slane %v1409_v14, 2  ;;  %6195 = vmatprep.mubr.msk.f32.mxu0 %vm199_vm1, %v6744_v45  ;;  %v7559_v14 = vld [vmem:[%s6529_s20 + $0xc8] sm:$0xff] }
 0x14b   : > { %v1130_v22 = vrot.slane %v892_v29, 1  ;;  %6115 = vmatprep.mubr.msk.f32.mxu1 %vm199_vm1, %v6764_v49  ;;  %v7554_v29 = vld [vmem:[%s6529_s20 + $0xd8] sm:$0xff] }
 0x14c   : > { %v5868_v43 = vpop.f32.mrb[50].mxu0  ;;  %v1655_v31 = vsel %vm1620_vm3, %v1652_v4, %v1654_v59 }
 0x14d   : > { %v1131_v36 = vsel %vm1093_vm2, %v1129_v26, %v1130_v22  ;;  %v1133_v21 = vsel %vm1093_vm2, %v1130_v22, %v1132_v11  ;;  %v5788_v54 = vpop.f32.mrb[50].mxu1  ;;  %v1659_v16 = vrot.slane %v5868_v43, 2  ;;  %v1419_v58 = vpop.f32.mrb[51].mxu0  ;;  %6196 = vmatmul.mubr.msk.f32.gmra.mrb[156].mxu0 %vm199_vm1, %v6758_v47  ;;  %v7515_v45 = vadd.f32 %v1655_v31, %v1219_v41 }
 0x14e   : > { %v1135_v24 = vrot.slane %v5788_v54, 1  ;;  %v902_v52 = vpop.f32.mrb[51].mxu1  ;;  %6116 = vmatmul.mubr.msk.f32.gmra.mrb[156].mxu1 %vm199_vm1, %v6778_v51  ;;  %v1221_v49 = vadd.f32 %v1133_v21, %v7317_v38  ;;  %v1657_v34 = vrot.slane %v1419_v58, 2  ;;  %6198 = vmatprep.mubr.msk.f32.mxu0 %vm199_vm1, %v7521_v15  ;;  %v1220_v51 = vadd.f32 %v7307_v32, %v1131_v36  ;;  %v7567_v36 = vld [vmem:[%s6529_s20 + $0xe0] sm:$0xff] }
 0x14f   : > { %v1134_v33 = vrot.slane %v902_v52, 1  ;;  %6118 = vmatprep.mubr.msk.f32.mxu1 %vm199_vm1, %v6784_v53 }
 0x150   : > { %v5871_v38 = vpop.f32.mrb[52].mxu0  ;;  %v1660_v56 = vsel %vm1620_vm3, %v1657_v34, %v1659_v16  ;;  %v1658_v0 = vsel %vm1620_vm3, %v1656_v2, %v1657_v34 }
 0x151   : > { %v1136_v47 = vsel %vm1093_vm2, %v1134_v33, %v1135_v24  ;;  %v5791_v23 = vpop.f32.mrb[52].mxu1  ;;  %v1662_v48 = vrot.slane %v5871_v38, 2  ;;  %v1429_v53 = vpop.f32.mrb[53].mxu0  ;;  %6199 = vmatmul.mubr.msk.f32.gmra.mrb[158].mxu0 %vm199_vm1, %v7532_v35  ;;  %v7536_v32 = vadd.f32 %v1660_v56, %v1221_v49  ;;  %v7538_v1 = vadd.f32 %v1658_v0, %v1220_v51  ;;  %v7577_v49 = vld [vmem:[%s6529_s20 + $0xe8] sm:$0xff]  ;;  %v8451_v33 = vld [vmem:[#allocation2_spill] sm:$0xff]  ;;  %v7587_v38 = vld [vmem:[%s6529_s20 + $0xf0] sm:$0xff] }
 0x152   : > { %v912_v7 = vpop.f32.mrb[53].mxu1  ;;  %6119 = vmatmul.mubr.msk.f32.gmra.mrb[158].mxu1 %vm199_vm1, %v6798_v55  ;;  %v1661_v17 = vrot.slane %v1429_v53, 2  ;;  %6201 = vmatprep.mubr.msk.f32.mxu0 %vm199_vm1, %v7546_v50  ;;  %v1222_v55 = vadd.f32 %v1136_v47, %v7329_v28  ;;  %v1139_v26 = vrot.slane %v5791_v23, 1 }
 0x153   : > { %v1137_v4 = vrot.slane %v912_v7, 1  ;;  %6121 = vmatprep.mubr.msk.f32.mxu1 %vm199_vm1, %v7541_v57 }
 0x154   : > { %v5874_v27 = vpop.f32.mrb[54].mxu0  ;;  %v1663_v3 = vsel %vm1620_vm3, %v1661_v17, %v1662_v48 }
 0x155   : > { %v1138_v42 = vsel %vm1093_vm2, %v1135_v24, %v1137_v4  ;;  %v5794_v46 = vpop.f32.mrb[54].mxu1  ;;  %v1439_v11 = vpop.f32.mrb[55].mxu0  ;;  %6202 = vmatmul.mubr.msk.f32.gmra.mrb[160].mxu0 %vm199_vm1, %v7559_v14  ;;  %v7563_v28 = vadd.f32 %v1663_v3, %v1222_v55  ;;  %v1666_v51 = vrot.slane %v5874_v27, 2 }
 0x156   : > { %v1142_v30 = vrot.slane %v5794_v46, 1  ;;  %v922_v39 = vpop.f32.mrb[55].mxu1  ;;  %6122 = vmatmul.mubr.msk.f32.gmra.mrb[160].mxu1 %vm199_vm1, %v7554_v29  ;;  %v1223_v41 = vadd.f32 %v7327_v40, %v1138_v42  ;;  %v1664_v59 = vrot.slane %v1439_v11, 2  ;;  %6204 = vmatprep.mubr.msk.f32.mxu0 %vm199_vm1, %v7541_v57  ;;  %v7598_v46 = vld [vmem:[%s6529_s20 + $0xf8] sm:$0xff] }
 0x157   : > { %v1140_v22 = vrot.slane %v922_v39, 1  ;;  %6124 = vmatprep.mubr.msk.f32.mxu1 %vm199_vm1, %v7567_v36  ;;  %v7609_v39 = vld [vmem:[%s6529_s20 + $0x100] sm:$0xff] }
 0x158   : > { %v5877_v31 = vpop.f32.mrb[56].mxu0  ;;  %v1665_v40 = vsel %vm1620_vm3, %v1662_v48, %v1664_v59 }
 0x159   : > { %v1141_v21 = vsel %vm1093_vm2, %v1139_v26, %v1140_v22  ;;  %v1143_v54 = vsel %vm1093_vm2, %v1140_v22, %v1142_v30  ;;  %v5797_v43 = vpop.f32.mrb[56].mxu1  ;;  %v1669_v16 = vrot.slane %v5877_v31, 2  ;;  %v1449_v58 = vpop.f32.mrb[57].mxu0  ;;  %6205 = vmatmul.mubr.msk.f32.gmra.mrb[162].mxu0 %vm199_vm1, %v7554_v29  ;;  %v7583_v2 = vadd.f32 %v1665_v40, %v1223_v41  ;;  %v7619_v31 = vld [vmem:[%s6529_s20 + $0x108] sm:$0xff] }
 0x15a   : > { %v1145_v24 = vrot.slane %v5797_v43, 1  ;;  %v932_v52 = vpop.f32.mrb[57].mxu1  ;;  %6125 = vmatmul.mubr.msk.f32.gmra.mrb[162].mxu1 %vm199_vm1, %v7577_v49  ;;  %v1225_v34 = vadd.f32 %v1143_v54, %v8451_v33  ;;  %v1667_v23 = vrot.slane %v1449_v58, 2  ;;  %6207 = vmatprep.mubr.msk.f32.mxu0 %vm199_vm1, %v7567_v36  ;;  %v1224_v56 = vadd.f32 %v7339_v44, %v1141_v21  ;;  %v7629_v58 = vld [vmem:[%s6529_s20 + $0x110] sm:$0xff] }
 0x15b   : > { %v1144_v47 = vrot.slane %v932_v52, 1  ;;  %6127 = vmatprep.mubr.msk.f32.mxu1 %vm199_vm1, %v7587_v38 }
 0x15c   : > { %v5880_v7 = vpop.f32.mrb[58].mxu0  ;;  %v1670_v53 = vsel %vm1620_vm3, %v1667_v23, %v1669_v16  ;;  %v1668_v4 = vsel %vm1620_vm3, %v1666_v51, %v1667_v23 }
 0x15d   : > { %v1146_v0 = vsel %vm1093_vm2, %v1144_v47, %v1145_v24  ;;  %v5800_v48 = vpop.f32.mrb[58].mxu1  ;;  %v1672_v17 = vrot.slane %v5880_v7, 2  ;;  %v1459_v42 = vpop.f32.mrb[59].mxu0  ;;  %6208 = vmatmul.mubr.msk.f32.gmra.mrb[164].mxu0 %vm199_vm1, %v7577_v49  ;;  %v7604_v44 = vadd.f32 %v1670_v53, %v1225_v34  ;;  %v7606_v27 = vadd.f32 %v1668_v4, %v1224_v56  ;;  %v7639_v7 = vld [vmem:[%s6529_s20 + $0x118] sm:$0xff]  ;;  %v8452_v4 = vld [vmem:[#allocation4_spill] sm:$0xff] }
 0x15e   : > { %v942_v55 = vpop.f32.mrb[59].mxu1  ;;  %6128 = vmatmul.mubr.msk.f32.gmra.mrb[164].mxu1 %vm199_vm1, %v7598_v46  ;;  %v1671_v30 = vrot.slane %v1459_v42, 2  ;;  %6210 = vmatprep.mubr.msk.f32.mxu0 %vm199_vm1, %v7587_v38  ;;  %v1226_v11 = vadd.f32 %v1146_v0, %v7195_v60 }
 0x15f   : > { %v1147_v3 = vrot.slane %v942_v55, 1  ;;  %6130 = vmatprep.mubr.msk.f32.mxu1 %vm199_vm1, %v7609_v39 }
 0x160   : > { %v5883_v22 = vpop.f32.mrb[60].mxu0  ;;  %v1673_v59 = vsel %vm1620_vm3, %v1671_v30, %v1672_v17  ;;  %v7649_v30 = vld [vmem:[%s6529_s20 + $0x120] sm:$0xff] }
 0x161   : > { %v1148_v41 = vsel %vm1093_vm2, %v1145_v24, %v1147_v3  ;;  %v5803_v26 = vpop.f32.mrb[60].mxu1  ;;  %v1469_v43 = vpop.f32.mrb[61].mxu0  ;;  %6211 = vmatmul.mubr.msk.f32.gmra.mrb[166].mxu0 %vm199_vm1, %v7598_v46  ;;  %v7625_v40 = vadd.f32 %v1673_v59, %v1226_v11  ;;  %v1149_v24 = vrot.slane %v5800_v48, 1  ;;  %v1676_v42 = vrot.slane %v5883_v22, 2  ;;  %v8453_v11 = vld [vmem:[#allocation3_spill] sm:$0xff] }
 0x162   : > { %v1152_v21 = vrot.slane %v5803_v26, 1  ;;  %v952_v54 = vpop.f32.mrb[61].mxu1  ;;  %6131 = vmatmul.mubr.msk.f32.gmra.mrb[166].mxu1 %vm199_vm1, %v7619_v31  ;;  %v1227_v60 = vadd.f32 %v7189_v10, %v1148_v41  ;;  %v1674_v52 = vrot.slane %v1469_v43, 2  ;;  %6213 = vmatprep.mubr.msk.f32.mxu0 %vm199_vm1, %v7609_v39 }
 0x163   : > { %v1150_v16 = vrot.slane %v952_v54, 1  ;;  %6133 = vmatprep.mubr.msk.f32.mxu1 %vm199_vm1, %v7629_v58 }
 0x164   : > { %v5886_v47 = vpop.f32.mrb[62].mxu0  ;;  %v1675_v10 = vsel %vm1620_vm3, %v1672_v17, %v1674_v52 }
 0x165   : > { %v1151_v33 = vsel %vm1093_vm2, %v1149_v24, %v1150_v16  ;;  %v1153_v34 = vsel %vm1093_vm2, %v1150_v16, %v1152_v21  ;;  %v5806_v51 = vpop.f32.mrb[62].mxu1  ;;  %v1679_v56 = vrot.slane %v5886_v47, 2  ;;  %v1479_v48 = vpop.f32.mrb[63].mxu0  ;;  %6214 = vmatmul.mubr.msk.f32.gmra.mrb[168].mxu0 %vm199_vm1, %v7619_v31  ;;  %v7645_v53 = vadd.f32 %v1675_v10, %v1227_v60  ;;  %v7660_v16 = vld [vmem:[%s6529_s20 + $0x128] sm:$0xff]  ;;  %v7671_v47 = vld [vmem:[%s6529_s20 + $0x130] sm:$0xff] }
 0x166   : > { %v1155_v23 = vrot.slane %v5806_v51, 1  ;;  %v962_v0 = vpop.f32.mrb[63].mxu1  ;;  %6134 = vmatmul.mubr.msk.f32.gmra.mrb[168].mxu1 %vm199_vm1, %v7639_v7  ;;  %v1229_v55 = vadd.f32 %v1153_v34, %v8452_v4  ;;  %v1677_v17 = vrot.slane %v1479_v48, 2  ;;  %6216 = vmatprep.mubr.msk.f32.mxu0 %vm199_vm1, %v7629_v58  ;;  %v1228_v41 = vadd.f32 %v8453_v11, %v1151_v33 }
 0x167   : > { %v1154_v3 = vrot.slane %v962_v0, 1  ;;  %6136 = vmatprep.mubr.msk.f32.mxu1 %vm199_vm1, %v7649_v30 }
 0x168   : > { %v5889_v21 = vpop.f32.mrb[64].mxu0  ;;  %v1680_v54 = vsel %vm1620_vm3, %v1677_v17, %v1679_v56  ;;  %v1678_v22 = vsel %vm1620_vm3, %v1676_v42, %v1677_v17  ;;  %v7681_v17 = vld [vmem:[%s6529_s20 + $0x138] sm:$0xff] }
 0x169   : > { %v1156_v26 = vsel %vm1093_vm2, %v1154_v3, %v1155_v23  ;;  %v5809_v59 = vpop.f32.mrb[64].mxu1  ;;  %v1682_v43 = vrot.slane %v5889_v21, 2  ;;  %v1489_v24 = vpop.f32.mrb[65].mxu0  ;;  %6217 = vmatmul.mubr.msk.f32.gmra.mrb[170].mxu0 %vm199_vm1, %v7639_v7  ;;  %v7666_v52 = vadd.f32 %v1680_v54, %v1229_v55  ;;  %v7668_v33 = vadd.f32 %v1678_v22, %v1228_v41  ;;  %v7691_v54 = vld [vmem:[%s6529_s20 + $0x140] sm:$0xff] }
 0x16a   : > { %v972_v60 = vpop.f32.mrb[65].mxu1  ;;  %6137 = vmatmul.mubr.msk.f32.gmra.mrb[170].mxu1 %vm199_vm1, %v7660_v16  ;;  %v1681_v51 = vrot.slane %v1489_v24, 2  ;;  %6219 = vmatprep.mubr.msk.f32.mxu0 %vm199_vm1, %v7649_v30  ;;  %v1230_v10 = vadd.f32 %v1156_v26, %v7235_v12  ;;  %v8454_v12 = vld [vmem:[#allocation5_spill] sm:$0xff]  ;;  %8455 = vst [vmem:[#allocation2_spill] sm:$0xff] %v7691_v54 }
 0x16b   : > { %v1157_v34 = vrot.slane %v972_v60, 1  ;;  %6139 = vmatprep.mubr.msk.f32.mxu1 %vm199_vm1, %v7671_v47 }
 0x16c   : > { %v5892_v48 = vpop.f32.mrb[66].mxu0  ;;  %v1683_v4 = vsel %vm1620_vm3, %v1681_v51, %v1682_v43 }
 0x16d   : > { %v1158_v56 = vsel %vm1093_vm2, %v1155_v23, %v1157_v34  ;;  %v5812_v0 = vpop.f32.mrb[66].mxu1  ;;  %v1499_v3 = vpop.f32.mrb[67].mxu0  ;;  %6220 = vmatmul.mubr.msk.f32.gmra.mrb[172].mxu0 %vm199_vm1, %v7660_v16  ;;  %v7687_v11 = vadd.f32 %v1683_v4, %v1230_v10  ;;  %v1159_v23 = vrot.slane %v5809_v59, 1  ;;  %v7701_v4 = vld [vmem:[%s6529_s20 + $0x148] sm:$0xff] }
 0x16e   : > { %v1162_v55 = vrot.slane %v5812_v0, 1  ;;  %v982_v42 = vpop.f32.mrb[67].mxu1  ;;  %6140 = vmatmul.mubr.msk.f32.gmra.mrb[172].mxu1 %vm199_vm1, %v7681_v17  ;;  %v1231_v41 = vadd.f32 %v8454_v12, %v1158_v56  ;;  %v1684_v21 = vrot.slane %v1499_v3, 2  ;;  %6222 = vmatprep.mubr.msk.f32.mxu0 %vm199_vm1, %v7671_v47  ;;  %8456 = vst [vmem:[#allocation4_spill] sm:$0xff] %v7701_v4  ;;  %v1686_v12 = vrot.slane %v5892_v48, 2 }
 0x16f   : > { %v1160_v26 = vrot.slane %v982_v42, 1  ;;  %6142 = vmatprep.mubr.msk.f32.mxu1 %vm199_vm1, %v7691_v54 }
 0x170   : > { %v5895_v34 = vpop.f32.mrb[68].mxu0  ;;  %v1685_v51 = vsel %vm1620_vm3, %v1682_v43, %v1684_v21  ;;  %v8460_v21 = vld [vmem:[#allocation6_spill] sm:$0xff] }
 0x171   : > { %v1161_v22 = vsel %vm1093_vm2, %v1159_v23, %v1160_v26  ;;  %v1163_v60 = vsel %vm1093_vm2, %v1160_v26, %v1162_v55  ;;  %v5815_v24 = vpop.f32.mrb[68].mxu1  ;;  %v1689_v10 = vrot.slane %v5895_v34, 2  ;;  %v1509_v0 = vpop.f32.mrb[69].mxu0  ;;  %6223 = vmatmul.mubr.msk.f32.gmra.mrb[174].mxu0 %vm199_vm1, %v7681_v17  ;;  %v7707_v42 = vadd.f32 %v1685_v51, %v1231_v41  ;;  %v8458_v55 = vld [vmem:[#allocation7_spill] sm:$0xff]  ;;  %v7711_v26 = vld [vmem:[%s6529_s20 + $0x150] sm:$0xff] }
 0x172   : > { %v1165_v59 = vrot.slane %v5815_v24, 1  ;;  %v992_v56 = vpop.f32.mrb[69].mxu1  ;;  %6143 = vmatmul.mubr.msk.f32.gmra.mrb[174].mxu1 %vm199_vm1, %v7701_v4  ;;  %v1233_v3 = vadd.f32 %v1163_v60, %v8458_v55  ;;  %v1687_v43 = vrot.slane %v1509_v0, 2  ;;  %8459 = vst [vmem:[#allocation5_spill] sm:$0xff] %v7711_v26  ;;  %6225 = vmatprep.mubr.msk.f32.mxu0 %vm199_vm1, %v7691_v54  ;;  %v1232_v24 = vadd.f32 %v8460_v21, %v1161_v22  ;;  %v7733_v54 = vld [vmem:[%s6529_s20 + $0x160] sm:$0xff] }
 0x173   : > { %8457 = vst [vmem:[#allocation3_spill] sm:$0xff] %v7707_v42  ;;  %v1164_v23 = vrot.slane %v992_v56, 1  ;;  %6145 = vmatprep.mubr.msk.f32.mxu1 %vm199_vm1, %v7711_v26  ;;  %v7722_v42 = vld [vmem:[%s6529_s20 + $0x158] sm:$0xff]  ;;  %8463 = vst [vmem:[#allocation12_spill] sm:$0xff] %v7733_v54 }
 0x174   : > { %v5898_v51 = vpop.f32.mrb[70].mxu0  ;;  %v1690_v60 = vsel %vm1620_vm3, %v1687_v43, %v1689_v10  ;;  %v1688_v48 = vsel %vm1620_vm3, %v1686_v12, %v1687_v43  ;;  %8461 = vst [vmem:[#allocation7_spill] sm:$0xff] %v7722_v42  ;;  %v8464_v12 = vld [vmem:[#allocation9_spill] sm:$0xff] }
 0x175   : > { %v1166_v41 = vsel %vm1093_vm2, %v1164_v23, %v1165_v59  ;;  %v5818_v34 = vpop.f32.mrb[70].mxu1  ;;  %v1692_v56 = vrot.slane %v5898_v51, 2  ;;  %v1519_v55 = vpop.f32.mrb[71].mxu0  ;;  %6226 = vmatmul.mubr.msk.f32.gmra.mrb[176].mxu0 %vm199_vm1, %v7701_v4  ;;  %v7728_v22 = vadd.f32 %v1690_v60, %v1233_v3  ;;  %v7730_v23 = vadd.f32 %v1688_v48, %v1232_v24 }
 0x176   : > { %v1002_v0 = vpop.f32.mrb[71].mxu1  ;;  %6146 = vmatmul.mubr.msk.f32.gmra.mrb[176].mxu1 %vm199_vm1, %v7722_v42  ;;  %v1691_v10 = vrot.slane %v1519_v55, 2  ;;  %6228 = vmatprep.mubr.msk.f32.mxu0 %vm199_vm1, %v7711_v26  ;;  %v1234_v43 = vadd.f32 %v1166_v41, %v8464_v12  ;;  %v7743_v55 = vld [vmem:[%s6529_s20 + $0x168] sm:$0xff]  ;;  %v8467_v12 = vld [vmem:[#allocation8_spill] sm:$0xff] }
 0x177   : > { %8462 = vst [vmem:[#allocation6_spill] sm:$0xff] %v7730_v23  ;;  %v1167_v21 = vrot.slane %v1002_v0, 1  ;;  %6148 = vmatprep.mubr.msk.f32.mxu1 %vm199_vm1, %v7733_v54  ;;  %8465 = vst [vmem:[#allocation9_spill] sm:$0xff] %v7743_v55 }
 0x178   : > { %v5901_v3 = vpop.f32.mrb[72].mxu0  ;;  %v1693_v24 = vsel %vm1620_vm3, %v1691_v10, %v1692_v56  ;;  %v7753_v10 = vld [vmem:[%s6529_s20 + $0x170] sm:$0xff] }
 0x179   : > { %v1168_v51 = vsel %vm1093_vm2, %v1165_v59, %v1167_v21  ;;  %v5821_v4 = vpop.f32.mrb[72].mxu1  ;;  %v1529_v0 = vpop.f32.mrb[73].mxu0  ;;  %6229 = vmatmul.mubr.msk.f32.gmra.mrb[178].mxu0 %vm199_vm1, %v7722_v42  ;;  %v7749_v41 = vadd.f32 %v1693_v24, %v1234_v43  ;;  %v1169_v21 = vrot.slane %v5818_v34, 1 }
 0x17a   : > { %v1172_v60 = vrot.slane %v5821_v4, 1  ;;  %v1012_v48 = vpop.f32.mrb[73].mxu1  ;;  %6149 = vmatmul.mubr.msk.f32.gmra.mrb[178].mxu1 %vm199_vm1, %v7743_v55  ;;  %v1235_v59 = vadd.f32 %v8467_v12, %v1168_v51  ;;  %v1694_v23 = vrot.slane %v1529_v0, 2  ;;  %6231 = vmatprep.mubr.msk.f32.mxu0 %vm199_vm1, %v7733_v54  ;;  %v7763_v0 = vld [vmem:[%s6529_s20 + $0x178] sm:$0xff]  ;;  %v8469_v54 = vld [vmem:[#allocation11_spill] sm:$0xff] }
 0x17b   : > { %8466 = vst [vmem:[#allocation13_spill] sm:$0xff] %v7749_v41  ;;  %v1170_v26 = vrot.slane %v1012_v48, 1  ;;  %6151 = vmatprep.mubr.msk.f32.mxu1 %vm199_vm1, %v7753_v10  ;;  %8468 = vst [vmem:[#allocation8_spill] sm:$0xff] %v7763_v0  ;;  %v1696_v41 = vrot.slane %v5901_v3, 2 }
 0x17c   : > { %v5904_v43 = vpop.f32.mrb[74].mxu0  ;;  %v1695_v51 = vsel %vm1620_vm3, %v1692_v56, %v1694_v23  ;;  %v7774_v23 = vld [vmem:[%s6529_s20 + $0x180] sm:$0xff] }
 0x17d   : > { %v1171_v4 = vsel %vm1093_vm2, %v1169_v21, %v1170_v26  ;;  %v1173_v42 = vsel %vm1093_vm2, %v1170_v26, %v1172_v60  ;;  %v5824_v24 = vpop.f32.mrb[74].mxu1  ;;  %v1699_v34 = vrot.slane %v5904_v43, 2  ;;  %v1539_v48 = vpop.f32.mrb[75].mxu0  ;;  %6232 = vmatmul.mubr.msk.f32.gmra.mrb[180].mxu0 %vm199_vm1, %v7743_v55  ;;  %v7769_v21 = vadd.f32 %v1695_v51, %v1235_v59  ;;  %v8470_v60 = vld [vmem:[#allocation10_spill] sm:$0xff]  ;;  %8471 = vst [vmem:[#allocation11_spill] sm:$0xff] %v7774_v23 }
 0x17e   : > { %6152 = vmatmul.mubr.msk.f32.gmra.mrb[180].mxu1 %vm199_vm1, %v7763_v0  ;;  %v1022_v12 = vpop.f32.mrb[75].mxu1  ;;  %v1237_v26 = vadd.f32 %v1173_v42, %v8469_v54  ;;  %v1236_v24 = vadd.f32 %v8470_v60, %v1171_v4  ;;  %v1697_v56 = vrot.slane %v1539_v48, 2  ;;  %6234 = vmatprep.mubr.msk.f32.mxu0 %vm199_vm1, %v7753_v10  ;;  %v7783_v4 = vld [vmem:[%s6529_s20 + $0x188] sm:$0xff]  ;;  %v7801_v60 = vld [vmem:[%s6529_s20 + $0x198] sm:$0xff] }
 0x17f   : > { %6154 = vmatprep.mubr.msk.f32.mxu1 %vm199_vm1, %v7774_v23  ;;  %8472 = vst [vmem:[#allocation10_spill] sm:$0xff] %v7783_v4  ;;  %8476 = vst [vmem:[#allocation17_spill] sm:$0xff] %v7801_v60 }
 0x180   : > { %v5907_v43 = vpop.f32.mrb[76].mxu0  ;;  %v1700_v59 = vsel %vm1620_vm3, %v1697_v56, %v1699_v34  ;;  %v1698_v54 = vsel %vm1620_vm3, %v1696_v41, %v1697_v56 }
 0x181   : > { %v5827_v55 = vpop.f32.mrb[76].mxu1  ;;  %v1549_v42 = vpop.f32.mrb[77].mxu0  ;;  %6235 = vmatmul.mubr.msk.f32.gmra.mrb[182].mxu0 %vm199_vm1, %v7763_v0  ;;  %v7789_v51 = vadd.f32 %v1700_v59, %v1237_v26  ;;  %v7791_v48 = vadd.f32 %v1698_v54, %v1236_v24  ;;  %v7808_v24 = vld [vmem:[%s6529_s20 + $0x1a0] sm:$0xff]  ;;  %v7815_v54 = vld [vmem:[%s6529_s20 + $0x1a8] sm:$0xff] }
 0x182   : > { %6155 = vmatmul.mubr.msk.f32.gmra.mrb[182].mxu1 %vm199_vm1, %v7783_v4  ;;  %v1030_v3 = vpop.f32.mrb[77].mxu1  ;;  %v7794_v55 = vld [vmem:[%s6529_s20 + $0x190] sm:$0xff]  ;;  %6237 = vmatprep.mubr.msk.f32.mxu0 %vm199_vm1, %v7774_v23  ;;  %8477 = vst [vmem:[#allocation18_spill] sm:$0xff] %v7808_v24  ;;  %8478 = vst [vmem:[#allocation19_spill] sm:$0xff] %v7815_v54 }
 0x183   : > { %8473 = vst [vmem:[#allocation14_spill] sm:$0xff] %v7789_v51  ;;  %8474 = vst [vmem:[#allocation15_spill] sm:$0xff] %v7791_v48  ;;  %6157 = vmatprep.mubr.msk.f32.mxu1 %vm199_vm1, %v7794_v55  ;;  %v6455_v3 = vld [vmem:[%s6529_s20] sm:$0xff]  ;;  %v6461_v23 = vld [vmem:[%s6529_s20 + $0x30] sm:$0xff] }
 0x184   : > { %8475 = vst [vmem:[#allocation16_spill] sm:$0xff] %v7794_v55  ;;  %v5910_v41 = vpop.f32.mrb[78].mxu0  ;;  %v6464_v51 = vld [vmem:[%s6529_s20 + $0x48] sm:$0xff] }
 0x185   : > { %v5830_v34 = vpop.f32.mrb[78].mxu1  ;;  %v1557_v12 = vpop.f32.mrb[79].mxu0  ;;  %6238 = vmatmul.mubr.msk.f32.gmra.mrb[184].mxu0 %vm199_vm1, %v7783_v4  ;;  %v6460_v4 = vld [vmem:[%s6529_s20 + $0x28] sm:$0xff] }
 0x186   : > { %6158 = vmatmul.mubr.msk.f32.gmra.mrb[184].mxu1 %vm199_vm1, %v7801_v60  ;;  %v1038_v26 = vpop.f32.mrb[79].mxu1  ;;  %6240 = vmatprep.mubr.msk.f32.mxu0 %vm199_vm1, %v7794_v55 }
 0x187   : > { %6160 = vmatprep.mubr.msk.f32.mxu1 %vm199_vm1, %v7808_v24 }
 0x188   : > { %v5913_v56 = vpop.f32.mrb[80].mxu0 }
 0x189   : > { %v5918_v43 = vpop.f32.mrb[80].mxu1  ;;  %v1565_v59 = vpop.f32.mrb[81].mxu0  ;;  %6241 = vmatmul.mubr.msk.f32.gmra.mrb[186].mxu0 %vm199_vm1, %v7801_v60  ;;  %v6456_v56 = vld [vmem:[%s6529_s20 + $0x8] sm:$0xff] }
 0x18a   : > { %6161 = vmatmul.mubr.msk.f32.gmra.mrb[186].mxu1 %vm199_vm1, %v7815_v54  ;;  %v1836_v42 = vpop.f32.mrb[81].mxu1  ;;  %6243 = vmatprep.mubr.msk.f32.mxu0 %vm199_vm1, %v7808_v24  ;;  %v6457_v59 = vld [vmem:[%s6529_s20 + $0x10] sm:$0xff] }
 0x18b   : > { %6248 = vmatprep.mubr.msk.f32.mxu1 %vm199_vm1, %v6455_v3 }
 0x18c   : > { %v6001_v34 = vpop.f32.mrb[82].mxu0 }
 0x18d   : > { %v5921_v41 = vpop.f32.mrb[82].mxu1  ;;  %v2186_v26 = vpop.f32.mrb[83].mxu0  ;;  %6244 = vmatmul.mubr.msk.f32.gmra.mrb[188].mxu0 %vm199_vm1, %v7815_v54 }
 0x18e   : > { %v2083_v12 = vadd.f32 %v5921_v41, %v7367_v61  ;;  %6249 = vmatmul.mubr.msk.f32.vlgmr.msra.gmra.mrb[188].mxu1 %vm199_vm1, %v6456_v56  ;;  %v1844_v43 = vpop.f32.mrb[83].mxu1  ;;  %6331 = vmatprep.mubr.msk.f32.mxu0 %vm199_vm1, %v6455_v3  ;;  %v6458_v61 = vld [vmem:[%s6529_s20 + $0x18] sm:$0xff]  ;;  %v6459_v26 = vld [vmem:[%s6529_s20 + $0x20] sm:$0xff] }
 0x18f   : > { %6251 = vmatprep.mubr.msk.f32.mxu1 %vm199_vm1, %v6457_v59 }
 0x190   : > { %v6004_v24 = vpop.f32.mrb[84].mxu0 }
 0x191   : > { %v5924_v42 = vpop.f32.mrb[84].mxu1  ;;  %v2194_v60 = vpop.f32.mrb[85].mxu0  ;;  %6332 = vmatmul.mubr.msk.f32.vlgmr.msra.gmra.mrb[190].mxu0 %vm199_vm1, %v6456_v56 }
 0x192   : > { %v1853_v34 = vpop.f32.mrb[85].mxu1  ;;  %6252 = vmatmul.mubr.msk.f32.gmra.mrb[190].mxu1 %vm199_vm1, %v6458_v61  ;;  %6334 = vmatprep.mubr.msk.f32.mxu0 %vm199_vm1, %v6457_v59 }
 0x193   : > { %v2084_v41 = vadd.f32 %v1853_v34, %v7383_v62  ;;  %6254 = vmatprep.mubr.msk.f32.mxu1 %vm199_vm1, %v6459_v26  ;;  %v2497_v62 = vrot.slane %v6004_v24, 1  ;;  %v6462_v24 = vld [vmem:[%s6529_s20 + $0x38] sm:$0xff] }
 0x194   : > { %v6007_v3 = vpop.f32.mrb[86].mxu0 }
 0x195   : > { %v5927_v43 = vpop.f32.mrb[86].mxu1  ;;  %v2500_v54 = vrot.slane %v6007_v3, 1  ;;  %v2203_v60 = vpop.f32.mrb[87].mxu0  ;;  %6335 = vmatmul.mubr.msk.f32.gmra.mrb[192].mxu0 %vm199_vm1, %v6458_v61 }
 0x196   : > { %v2086_v42 = vadd.f32 %v5927_v43, %v7398_v13  ;;  %v1862_v55 = vpop.f32.mrb[87].mxu1  ;;  %6255 = vmatmul.mubr.msk.f32.gmra.mrb[192].mxu1 %vm199_vm1, %v6460_v4  ;;  %v2498_v34 = vrot.slane %v2203_v60, 1  ;;  %6337 = vmatprep.mubr.msk.f32.mxu0 %vm199_vm1, %v6459_v26 }
 0x197   : > { %v2085_v56 = vadd.f32 %v1862_v55, %v7400_v9  ;;  %6257 = vmatprep.mubr.msk.f32.mxu1 %vm199_vm1, %v6461_v23 }
 0x198   : > { %v2499_v13 = vsel %vm1093_vm2, %v2497_v62, %v2498_v34  ;;  %v2501_v59 = vsel %vm1093_vm2, %v2498_v34, %v2500_v54  ;;  %v6010_v3 = vpop.f32.mrb[88].mxu0  ;;  %v6463_v54 = vld [vmem:[%s6529_s20 + $0x40] sm:$0xff] }
 0x199   : > { %v5930_v43 = vpop.f32.mrb[88].mxu1  ;;  %v2503_v0 = vrot.slane %v6010_v3, 1  ;;  %v2213_v61 = vpop.f32.mrb[89].mxu0  ;;  %6338 = vmatmul.mubr.msk.f32.gmra.mrb[194].mxu0 %vm199_vm1, %v6460_v4  ;;  %v7854_v55 = vadd.f32 %v2501_v59, %v2084_v41  ;;  %v7856_v26 = vadd.f32 %v2499_v13, %v2083_v12  ;;  %v6465_v13 = vld [vmem:[%s6529_s20 + $0x50] sm:$0xff] }
 0x19a   : > { %v2087_v48 = vadd.f32 %v5930_v43, %v7413_v8  ;;  %6258 = vmatmul.mubr.msk.f32.gmra.mrb[194].mxu1 %vm199_vm1, %v6462_v24  ;;  %v1872_v9 = vpop.f32.mrb[89].mxu1  ;;  %v2502_v60 = vrot.slane %v2213_v61, 1  ;;  %6340 = vmatprep.mubr.msk.f32.mxu0 %vm199_vm1, %v6461_v23 }
 0x19b   : > { %6260 = vmatprep.mubr.msk.f32.mxu1 %vm199_vm1, %v6463_v54 }
 0x19c   : > { %v2504_v8 = vsel %vm1093_vm2, %v2502_v60, %v2503_v0  ;;  %v6013_v34 = vpop.f32.mrb[90].mxu0 }
 0x19d   : > { %v5933_v62 = vpop.f32.mrb[90].mxu1  ;;  %v2223_v3 = vpop.f32.mrb[91].mxu0  ;;  %6341 = vmatmul.mubr.msk.f32.gmra.mrb[196].mxu0 %vm199_vm1, %v6462_v24  ;;  %v7865_v4 = vadd.f32 %v2504_v8, %v2085_v56  ;;  %v6466_v56 = vld [vmem:[%s6529_s20 + $0x58] sm:$0xff]  ;;  %v2507_v8 = vrot.slane %v6013_v34, 1  ;;  %v6468_v34 = vld [vmem:[%s6529_s20 + $0x68] sm:$0xff] }
 0x19e   : > { %v1881_v43 = vpop.f32.mrb[91].mxu1  ;;  %6261 = vmatmul.mubr.msk.f32.gmra.mrb[196].mxu1 %vm199_vm1, %v6464_v51  ;;  %v2505_v41 = vrot.slane %v2223_v3, 1  ;;  %6343 = vmatprep.mubr.msk.f32.mxu0 %vm199_vm1, %v6463_v54 }
 0x19f   : > { %v2088_v12 = vadd.f32 %v1881_v43, %v7427_v5  ;;  %6263 = vmatprep.mubr.msk.f32.mxu1 %vm199_vm1, %v6465_v13 }
 0x1a0   : > { %v2506_v23 = vsel %vm1093_vm2, %v2503_v0, %v2505_v41  ;;  %v6016_v61 = vpop.f32.mrb[92].mxu0  ;;  %v6467_v0 = vld [vmem:[%s6529_s20 + $0x60] sm:$0xff] }
 0x1a1   : > { %v5936_v59 = vpop.f32.mrb[92].mxu1  ;;  %v2510_v60 = vrot.slane %v6016_v61, 1  ;;  %v2233_v24 = vpop.f32.mrb[93].mxu0  ;;  %6344 = vmatmul.mubr.msk.f32.gmra.mrb[198].mxu0 %vm199_vm1, %v6464_v51  ;;  %v7876_v5 = vadd.f32 %v2506_v23, %v2086_v42 }
 0x1a2   : > { %v2090_v9 = vadd.f32 %v5936_v59, %v7442_v25  ;;  %v1890_v62 = vpop.f32.mrb[93].mxu1  ;;  %6264 = vmatmul.mubr.msk.f32.gmra.mrb[198].mxu1 %vm199_vm1, %v6466_v56  ;;  %v2508_v43 = vrot.slane %v2233_v24, 1  ;;  %6346 = vmatprep.mubr.msk.f32.mxu0 %vm199_vm1, %v6465_v13 }
 0x1a3   : > { %v2089_v54 = vadd.f32 %v1890_v62, %v7444_v6  ;;  %6266 = vmatprep.mubr.msk.f32.mxu1 %vm199_vm1, %v6467_v0 }
 0x1a4   : > { %v2509_v25 = vsel %vm1093_vm2, %v2507_v8, %v2508_v43  ;;  %v2511_v3 = vsel %vm1093_vm2, %v2508_v43, %v2510_v60  ;;  %v6019_v59 = vpop.f32.mrb[94].mxu0  ;;  %v6469_v60 = vld [vmem:[%s6529_s20 + $0x70] sm:$0xff] }
 0x1a5   : > { %v5939_v41 = vpop.f32.mrb[94].mxu1  ;;  %v2513_v42 = vrot.slane %v6019_v59, 1  ;;  %v2243_v23 = vpop.f32.mrb[95].mxu0  ;;  %6347 = vmatmul.mubr.msk.f32.gmra.mrb[200].mxu0 %vm199_vm1, %v6466_v56  ;;  %v7888_v61 = vadd.f32 %v2511_v3, %v2088_v12  ;;  %v7890_v13 = vadd.f32 %v2509_v25, %v2087_v48  ;;  %v6470_v59 = vld [vmem:[%s6529_s20 + $0x78] sm:$0xff]  ;;  %v6471_v25 = vld [vmem:[%s6529_s20 + $0x80] sm:$0xff] }
 0x1a6   : > { %v2091_v51 = vadd.f32 %v5939_v41, %v7457_v19  ;;  %6267 = vmatmul.mubr.msk.f32.gmra.mrb[200].mxu1 %vm199_vm1, %v6468_v34  ;;  %v1900_v6 = vpop.f32.mrb[95].mxu1  ;;  %v2512_v62 = vrot.slane %v2243_v23, 1  ;;  %6349 = vmatprep.mubr.msk.f32.mxu0 %vm199_vm1, %v6467_v0 }
 0x1a7   : > { %6269 = vmatprep.mubr.msk.f32.mxu1 %vm199_vm1, %v6469_v60 }
 0x1a8   : > { %v2514_v19 = vsel %vm1093_vm2, %v2512_v62, %v2513_v42  ;;  %v6022_v8 = vpop.f32.mrb[96].mxu0 }
 0x1a9   : > { %v5942_v24 = vpop.f32.mrb[96].mxu1  ;;  %v2253_v41 = vpop.f32.mrb[97].mxu0  ;;  %6350 = vmatmul.mubr.msk.f32.gmra.mrb[202].mxu0 %vm199_vm1, %v6468_v34  ;;  %v7899_v48 = vadd.f32 %v2514_v19, %v2089_v54  ;;  %v6472_v54 = vld [vmem:[%s6529_s20 + $0x88] sm:$0xff]  ;;  %v2517_v19 = vrot.slane %v6022_v8, 1  ;;  %v6474_v8 = vld [vmem:[%s6529_s20 + $0x98] sm:$0xff] }
 0x1aa   : > { %v1909_v43 = vpop.f32.mrb[97].mxu1  ;;  %6270 = vmatmul.mubr.msk.f32.gmra.mrb[202].mxu1 %vm199_vm1, %v6470_v59  ;;  %v2515_v56 = vrot.slane %v2253_v41, 1  ;;  %6352 = vmatprep.mubr.msk.f32.mxu0 %vm199_vm1, %v6469_v60 }
 0x1ab   : > { %v2092_v12 = vadd.f32 %v1909_v43, %v7471_v63  ;;  %6272 = vmatprep.mubr.msk.f32.mxu1 %vm199_vm1, %v6471_v25 }
 0x1ac   : > { %v2516_v0 = vsel %vm1093_vm2, %v2513_v42, %v2515_v56  ;;  %v6025_v23 = vpop.f32.mrb[98].mxu0  ;;  %v6473_v42 = vld [vmem:[%s6529_s20 + $0x90] sm:$0xff] }
 0x1ad   : > { %v5945_v3 = vpop.f32.mrb[98].mxu1  ;;  %v2520_v62 = vrot.slane %v6025_v23, 1  ;;  %v2263_v34 = vpop.f32.mrb[99].mxu0  ;;  %6353 = vmatmul.mubr.msk.f32.gmra.mrb[204].mxu0 %vm199_vm1, %v6470_v59  ;;  %v7910_v63 = vadd.f32 %v2516_v0, %v2090_v9 }
 0x1ae   : > { %v2094_v6 = vadd.f32 %v5945_v3, %v7486_v37  ;;  %v1918_v24 = vpop.f32.mrb[99].mxu1  ;;  %6273 = vmatmul.mubr.msk.f32.gmra.mrb[204].mxu1 %vm199_vm1, %v6472_v54  ;;  %v2518_v43 = vrot.slane %v2263_v34, 1  ;;  %6355 = vmatprep.mubr.msk.f32.mxu0 %vm199_vm1, %v6471_v25  ;;  %v6475_v34 = vld [vmem:[%s6529_s20 + $0xa0] sm:$0xff] }
 0x1af   : > { %v2093_v60 = vadd.f32 %v1918_v24, %v7488_v20  ;;  %6275 = vmatprep.mubr.msk.f32.mxu1 %vm199_vm1, %v6473_v42 }
 0x1b0   : > { %v2519_v37 = vsel %vm1093_vm2, %v2517_v19, %v2518_v43  ;;  %v2521_v41 = vsel %vm1093_vm2, %v2518_v43, %v2520_v62  ;;  %v6028_v3 = vpop.f32.mrb[100].mxu0 }
 0x1b1   : > { %v5948_v56 = vpop.f32.mrb[100].mxu1  ;;  %v2523_v9 = vrot.slane %v6028_v3, 1  ;;  %v2273_v0 = vpop.f32.mrb[101].mxu0  ;;  %6356 = vmatmul.mubr.msk.f32.gmra.mrb[206].mxu0 %vm199_vm1, %v6472_v54  ;;  %v7922_v23 = vadd.f32 %v2521_v41, %v2092_v12  ;;  %v7924_v25 = vadd.f32 %v2519_v37, %v2091_v51  ;;  %v6476_v3 = vld [vmem:[%s6529_s20 + $0xa8] sm:$0xff] }
 0x1b2   : > { %v2095_v59 = vadd.f32 %v5948_v56, %v7501_v18  ;;  %6276 = vmatmul.mubr.msk.f32.gmra.mrb[206].mxu1 %vm199_vm1, %v6474_v8  ;;  %v1928_v20 = vpop.f32.mrb[101].mxu1  ;;  %v2522_v24 = vrot.slane %v2273_v0, 1  ;;  %6358 = vmatprep.mubr.msk.f32.mxu0 %vm199_vm1, %v6473_v42 }
 0x1b3   : > { %6278 = vmatprep.mubr.msk.f32.mxu1 %vm199_vm1, %v6475_v34 }
 0x1b4   : > { %v2524_v18 = vsel %vm1093_vm2, %v2522_v24, %v2523_v9  ;;  %v6031_v19 = vpop.f32.mrb[102].mxu0 }
 0x1b5   : > { %v5951_v62 = vpop.f32.mrb[102].mxu1  ;;  %v2283_v56 = vpop.f32.mrb[103].mxu0  ;;  %6359 = vmatmul.mubr.msk.f32.gmra.mrb[208].mxu0 %vm199_vm1, %v6474_v8  ;;  %v7933_v12 = vadd.f32 %v2524_v18, %v2093_v60  ;;  %v2527_v60 = vrot.slane %v6031_v19, 1 }
 0x1b6   : > { %v1937_v43 = vpop.f32.mrb[103].mxu1  ;;  %6279 = vmatmul.mubr.msk.f32.gmra.mrb[208].mxu1 %vm199_vm1, %v6476_v3  ;;  %v2525_v54 = vrot.slane %v2283_v56, 1  ;;  %6361 = vmatprep.mubr.msk.f32.mxu0 %vm199_vm1, %v6475_v34 }
 0x1b7   : > { %v2096_v51 = vadd.f32 %v1937_v43, %v7515_v45  ;;  %6281 = vmatprep.mubr.msk.f32.mxu1 %vm199_vm1, %v7521_v15 }
 0x1b8   : > { %v2526_v42 = vsel %vm1093_vm2, %v2523_v9, %v2525_v54  ;;  %v6034_v41 = vpop.f32.mrb[104].mxu0 }
 0x1b9   : > { %v5954_v37 = vpop.f32.mrb[104].mxu1  ;;  %v2530_v20 = vrot.slane %v6034_v41, 1  ;;  %v2293_v62 = vpop.f32.mrb[105].mxu0  ;;  %6362 = vmatmul.mubr.msk.f32.gmra.mrb[210].mxu0 %vm199_vm1, %v6476_v3  ;;  %v7944_v45 = vadd.f32 %v2526_v42, %v2094_v6 }
 0x1ba   : > { %v2098_v0 = vadd.f32 %v5954_v37, %v7536_v32  ;;  %v1946_v24 = vpop.f32.mrb[105].mxu1  ;;  %6282 = vmatmul.mubr.msk.f32.gmra.mrb[210].mxu1 %vm199_vm1, %v7532_v35  ;;  %v2528_v34 = vrot.slane %v2293_v62, 1  ;;  %6364 = vmatprep.mubr.msk.f32.mxu0 %vm199_vm1, %v7521_v15 }
 0x1bb   : > { %v2097_v8 = vadd.f32 %v1946_v24, %v7538_v1  ;;  %6284 = vmatprep.mubr.msk.f32.mxu1 %vm199_vm1, %v7546_v50 }
 0x1bc   : > { %v2529_v32 = vsel %vm1093_vm2, %v2527_v60, %v2528_v34  ;;  %v2531_v9 = vsel %vm1093_vm2, %v2528_v34, %v2530_v20  ;;  %v6037_v43 = vpop.f32.mrb[106].mxu0 }
 0x1bd   : > { %v5957_v18 = vpop.f32.mrb[106].mxu1  ;;  %v2533_v6 = vrot.slane %v6037_v43, 1  ;;  %v2303_v3 = vpop.f32.mrb[107].mxu0  ;;  %6365 = vmatmul.mubr.msk.f32.gmra.mrb[212].mxu0 %vm199_vm1, %v7532_v35  ;;  %v7958_v19 = vadd.f32 %v2531_v9, %v2096_v51  ;;  %v7960_v15 = vadd.f32 %v2529_v32, %v2095_v59 }
 0x1be   : > { %v2099_v56 = vadd.f32 %v5957_v18, %v7563_v28  ;;  %6285 = vmatmul.mubr.msk.f32.gmra.mrb[212].mxu1 %vm199_vm1, %v7559_v14  ;;  %v1956_v1 = vpop.f32.mrb[107].mxu1  ;;  %v2532_v54 = vrot.slane %v2303_v3, 1  ;;  %6367 = vmatprep.mubr.msk.f32.mxu0 %vm199_vm1, %v7546_v50 }
 0x1bf   : > { %6287 = vmatprep.mubr.msk.f32.mxu1 %vm199_vm1, %v7541_v57 }
 0x1c0   : > { %v2534_v28 = vsel %vm1093_vm2, %v2532_v54, %v2533_v6  ;;  %v6040_v37 = vpop.f32.mrb[108].mxu0 }
 0x1c1   : > { %v5960_v42 = vpop.f32.mrb[108].mxu1  ;;  %v2313_v20 = vpop.f32.mrb[109].mxu0  ;;  %6368 = vmatmul.mubr.msk.f32.gmra.mrb[214].mxu0 %vm199_vm1, %v7559_v14  ;;  %v7971_v35 = vadd.f32 %v2534_v28, %v2097_v8  ;;  %v2537_v8 = vrot.slane %v6040_v37, 1 }
 0x1c2   : > { %v1965_v41 = vpop.f32.mrb[109].mxu1  ;;  %6288 = vmatmul.mubr.msk.f32.gmra.mrb[214].mxu1 %vm199_vm1, %v7554_v29  ;;  %v2535_v51 = vrot.slane %v2313_v20, 1  ;;  %6370 = vmatprep.mubr.msk.f32.mxu0 %vm199_vm1, %v7541_v57 }
 0x1c3   : > { %v2100_v59 = vadd.f32 %v1965_v41, %v7583_v2  ;;  %6290 = vmatprep.mubr.msk.f32.mxu1 %vm199_vm1, %v7567_v36 }
 0x1c4   : > { %v2536_v50 = vsel %vm1093_vm2, %v2533_v6, %v2535_v51  ;;  %v6043_v62 = vpop.f32.mrb[110].mxu0 }
 0x1c5   : > { %v5963_v24 = vpop.f32.mrb[110].mxu1  ;;  %v2540_v34 = vrot.slane %v6043_v62, 1  ;;  %v2323_v14 = vpop.f32.mrb[111].mxu0  ;;  %6371 = vmatmul.mubr.msk.f32.gmra.mrb[216].mxu0 %vm199_vm1, %v7554_v29  ;;  %v7984_v2 = vadd.f32 %v2536_v50, %v2098_v0 }
 0x1c6   : > { %v2102_v60 = vadd.f32 %v5963_v24, %v7604_v44  ;;  %v1974_v32 = vpop.f32.mrb[111].mxu1  ;;  %6291 = vmatmul.mubr.msk.f32.gmra.mrb[216].mxu1 %vm199_vm1, %v7577_v49  ;;  %v2538_v9 = vrot.slane %v2323_v14, 1  ;;  %6373 = vmatprep.mubr.msk.f32.mxu0 %vm199_vm1, %v7567_v36 }
 0x1c7   : > { %v2101_v57 = vadd.f32 %v1974_v32, %v7606_v27  ;;  %6293 = vmatprep.mubr.msk.f32.mxu1 %vm199_vm1, %v7587_v38 }
 0x1c8   : > { %v2539_v44 = vsel %vm1093_vm2, %v2537_v8, %v2538_v9  ;;  %v2541_v18 = vsel %vm1093_vm2, %v2538_v9, %v2540_v34  ;;  %v6046_v6 = vpop.f32.mrb[112].mxu0 }
 0x1c9   : > { %v5966_v43 = vpop.f32.mrb[112].mxu1  ;;  %v2543_v0 = vrot.slane %v6046_v6, 1  ;;  %v2333_v3 = vpop.f32.mrb[113].mxu0  ;;  %6374 = vmatmul.mubr.msk.f32.gmra.mrb[218].mxu0 %vm199_vm1, %v7577_v49  ;;  %v7998_v1 = vadd.f32 %v2541_v18, %v2100_v59  ;;  %v8000_v36 = vadd.f32 %v2539_v44, %v2099_v56 }
 0x1ca   : > { %v2103_v29 = vadd.f32 %v5966_v43, %v7625_v40  ;;  %6294 = vmatmul.mubr.msk.f32.gmra.mrb[218].mxu1 %vm199_vm1, %v7598_v46  ;;  %v1984_v27 = vpop.f32.mrb[113].mxu1  ;;  %v2542_v54 = vrot.slane %v2333_v3, 1  ;;  %6376 = vmatprep.mubr.msk.f32.mxu0 %vm199_vm1, %v7587_v38 }
 0x1cb   : > { %6296 = vmatprep.mubr.msk.f32.mxu1 %vm199_vm1, %v7609_v39 }
 0x1cc   : > { %v2544_v40 = vsel %vm1093_vm2, %v2542_v54, %v2543_v0  ;;  %v6049_v42 = vpop.f32.mrb[114].mxu0 }
 0x1cd   : > { %v5969_v28 = vpop.f32.mrb[114].mxu1  ;;  %v2343_v41 = vpop.f32.mrb[115].mxu0  ;;  %6377 = vmatmul.mubr.msk.f32.gmra.mrb[220].mxu0 %vm199_vm1, %v7598_v46  ;;  %v8011_v49 = vadd.f32 %v2544_v40, %v2101_v57  ;;  %v2547_v34 = vrot.slane %v6049_v42, 1  ;;  %v8480_v40 = vld [vmem:[#allocation2_spill] sm:$0xff] }
 0x1ce   : > { %v1993_v37 = vpop.f32.mrb[115].mxu1  ;;  %6297 = vmatmul.mubr.msk.f32.gmra.mrb[220].mxu1 %vm199_vm1, %v7619_v31  ;;  %v2545_v20 = vrot.slane %v2343_v41, 1  ;;  %6379 = vmatprep.mubr.msk.f32.mxu0 %vm199_vm1, %v7609_v39 }
 0x1cf   : > { %v2104_v56 = vadd.f32 %v1993_v37, %v7645_v53  ;;  %6299 = vmatprep.mubr.msk.f32.mxu1 %vm199_vm1, %v7629_v58 }
 0x1d0   : > { %v2546_v38 = vsel %vm1093_vm2, %v2543_v0, %v2545_v20  ;;  %v6052_v51 = vpop.f32.mrb[116].mxu0  ;;  %v8481_v20 = vld [vmem:[#allocation4_spill] sm:$0xff] }
 0x1d1   : > { %v5972_v59 = vpop.f32.mrb[116].mxu1  ;;  %v2550_v24 = vrot.slane %v6052_v51, 1  ;;  %v2353_v46 = vpop.f32.mrb[117].mxu0  ;;  %6380 = vmatmul.mubr.msk.f32.gmra.mrb[222].mxu0 %vm199_vm1, %v7619_v31  ;;  %v8024_v53 = vadd.f32 %v2546_v38, %v2102_v60  ;;  %v8482_v51 = vld [vmem:[#allocation6_spill] sm:$0xff] }
 0x1d2   : > { %v2106_v50 = vadd.f32 %v5972_v59, %v7666_v52  ;;  %v2002_v62 = vpop.f32.mrb[117].mxu1  ;;  %6300 = vmatmul.mubr.msk.f32.gmra.mrb[222].mxu1 %vm199_vm1, %v7639_v7  ;;  %v2548_v32 = vrot.slane %v2353_v46, 1  ;;  %6382 = vmatprep.mubr.msk.f32.mxu0 %vm199_vm1, %v7629_v58 }
 0x1d3   : > { %v2105_v39 = vadd.f32 %v2002_v62, %v7668_v33  ;;  %6302 = vmatprep.mubr.msk.f32.mxu1 %vm199_vm1, %v7649_v30  ;;  %v8483_v62 = vld [vmem:[#allocation5_spill] sm:$0xff] }
 0x1d4   : > { %v2549_v52 = vsel %vm1093_vm2, %v2547_v34, %v2548_v32  ;;  %v2551_v14 = vsel %vm1093_vm2, %v2548_v32, %v2550_v24  ;;  %v6055_v57 = vpop.f32.mrb[118].mxu0  ;;  %v8484_v32 = vld [vmem:[#allocation13_spill] sm:$0xff] }
 0x1d5   : > { %v5975_v8 = vpop.f32.mrb[118].mxu1  ;;  %v2553_v60 = vrot.slane %v6055_v57, 1  ;;  %v2363_v9 = vpop.f32.mrb[119].mxu0  ;;  %6383 = vmatmul.mubr.msk.f32.gmra.mrb[224].mxu0 %vm199_vm1, %v7639_v7  ;;  %v8038_v44 = vadd.f32 %v2551_v14, %v2104_v56  ;;  %v8040_v58 = vadd.f32 %v2549_v52, %v2103_v29  ;;  %v8479_v29 = vld [vmem:[#allocation3_spill] sm:$0xff] }
 0x1d6   : > { %v2107_v31 = vadd.f32 %v5975_v8, %v7687_v11  ;;  %6303 = vmatmul.mubr.msk.f32.gmra.mrb[224].mxu1 %vm199_vm1, %v7660_v16  ;;  %v2012_v33 = vpop.f32.mrb[119].mxu1  ;;  %v2552_v18 = vrot.slane %v2363_v9, 1  ;;  %6385 = vmatprep.mubr.msk.f32.mxu0 %vm199_vm1, %v7649_v30  ;;  %v8485_v14 = vld [vmem:[#allocation7_spill] sm:$0xff] }
 0x1d7   : > { %6305 = vmatprep.mubr.msk.f32.mxu1 %vm199_vm1, %v7671_v47  ;;  %v8486_v33 = vld [vmem:[#allocation12_spill] sm:$0xff] }
 0x1d8   : > { %v2554_v11 = vsel %vm1093_vm2, %v2552_v18, %v2553_v60  ;;  %v6058_v6 = vpop.f32.mrb[120].mxu0 }
 0x1d9   : > { %v5978_v43 = vpop.f32.mrb[120].mxu1  ;;  %v2373_v3 = vpop.f32.mrb[121].mxu0  ;;  %6386 = vmatmul.mubr.msk.f32.gmra.mrb[226].mxu0 %vm199_vm1, %v7660_v16  ;;  %v8051_v7 = vadd.f32 %v2554_v11, %v2105_v39  ;;  %v2557_v59 = vrot.slane %v6058_v6, 1 }
 0x1da   : > { %v2021_v0 = vpop.f32.mrb[121].mxu1  ;;  %6306 = vmatmul.mubr.msk.f32.gmra.mrb[226].mxu1 %vm199_vm1, %v7681_v17  ;;  %v2555_v54 = vrot.slane %v2373_v3, 1  ;;  %6388 = vmatprep.mubr.msk.f32.mxu0 %vm199_vm1, %v7671_v47  ;;  %v8487_v3 = vld [vmem:[#allocation9_spill] sm:$0xff] }
 0x1db   : > { %v2108_v27 = vadd.f32 %v2021_v0, %v8479_v29  ;;  %6308 = vmatprep.mubr.msk.f32.mxu1 %vm199_vm1, %v8480_v40 }
 0x1dc   : > { %v2556_v30 = vsel %vm1093_vm2, %v2553_v60, %v2555_v54  ;;  %v6061_v42 = vpop.f32.mrb[122].mxu0 }
 0x1dd   : > { %v5981_v28 = vpop.f32.mrb[122].mxu1  ;;  %v2560_v41 = vrot.slane %v6061_v42, 1  ;;  %v2383_v16 = vpop.f32.mrb[123].mxu0  ;;  %6389 = vmatmul.mubr.msk.f32.gmra.mrb[228].mxu0 %vm199_vm1, %v7681_v17  ;;  %v8064_v38 = vadd.f32 %v2556_v30, %v2106_v50 }
 0x1de   : > { %v2110_v37 = vadd.f32 %v5981_v28, %v7728_v22  ;;  %v2030_v56 = vpop.f32.mrb[123].mxu1  ;;  %6309 = vmatmul.mubr.msk.f32.gmra.mrb[228].mxu1 %vm199_vm1, %v8481_v20  ;;  %v2558_v24 = vrot.slane %v2383_v16, 1  ;;  %6391 = vmatprep.mubr.msk.f32.mxu0 %vm199_vm1, %v8480_v40  ;;  %v8488_v28 = vld [vmem:[#allocation14_spill] sm:$0xff] }
 0x1df   : > { %v2109_v47 = vadd.f32 %v2030_v56, %v8482_v51  ;;  %6311 = vmatprep.mubr.msk.f32.mxu1 %vm199_vm1, %v8483_v62  ;;  %v8490_v51 = vld [vmem:[#allocation15_spill] sm:$0xff] }
 0x1e0   : > { %v2559_v22 = vsel %vm1093_vm2, %v2557_v59, %v2558_v24  ;;  %v2561_v46 = vsel %vm1093_vm2, %v2558_v24, %v2560_v41  ;;  %v6064_v39 = vpop.f32.mrb[124].mxu0 }
 0x1e1   : > { %v5984_v34 = vpop.f32.mrb[124].mxu1  ;;  %v2563_v50 = vrot.slane %v6064_v39, 1  ;;  %v2393_v52 = vpop.f32.mrb[125].mxu0  ;;  %6392 = vmatmul.mubr.msk.f32.gmra.mrb[230].mxu0 %vm199_vm1, %v8481_v20  ;;  %v8078_v57 = vadd.f32 %v2561_v46, %v2108_v27  ;;  %v8080_v60 = vadd.f32 %v2559_v22, %v2107_v31  ;;  %v8489_v20 = vld [vmem:[#allocation8_spill] sm:$0xff] }
 0x1e2   : > { %v2111_v17 = vadd.f32 %v5984_v34, %v8484_v32  ;;  %6312 = vmatmul.mubr.msk.f32.gmra.mrb[230].mxu1 %vm199_vm1, %v8485_v14  ;;  %v2040_v8 = vpop.f32.mrb[125].mxu1  ;;  %v2562_v9 = vrot.slane %v2393_v52, 1  ;;  %6394 = vmatprep.mubr.msk.f32.mxu0 %vm199_vm1, %v8483_v62  ;;  %v8491_v62 = vld [vmem:[#allocation11_spill] sm:$0xff] }
 0x1e3   : > { %6314 = vmatprep.mubr.msk.f32.mxu1 %vm199_vm1, %v8486_v33 }
 0x1e4   : > { %v2564_v18 = vsel %vm1093_vm2, %v2562_v9, %v2563_v50  ;;  %v6067_v43 = vpop.f32.mrb[126].mxu0  ;;  %v8493_v9 = vld [vmem:[#allocation16_spill] sm:$0xff] }
 0x1e5   : > { %v5987_v11 = vpop.f32.mrb[126].mxu1  ;;  %v2403_v0 = vpop.f32.mrb[127].mxu0  ;;  %6395 = vmatmul.mubr.msk.f32.gmra.mrb[232].mxu0 %vm199_vm1, %v8485_v14  ;;  %v8091_v31 = vadd.f32 %v2564_v18, %v2109_v47  ;;  %v2567_v59 = vrot.slane %v6067_v43, 1 }
 0x1e6   : > { %v2049_v6 = vpop.f32.mrb[127].mxu1  ;;  %6315 = vmatmul.mubr.msk.f32.gmra.mrb[232].mxu1 %vm199_vm1, %v8487_v3  ;;  %v2565_v27 = vrot.slane %v2403_v0, 1  ;;  %6397 = vmatprep.mubr.msk.f32.mxu0 %vm199_vm1, %v8486_v33 }
 0x1e7   : > { %v2112_v29 = vadd.f32 %v2049_v6, %v7769_v21  ;;  %6317 = vmatprep.mubr.msk.f32.mxu1 %vm199_vm1, %v7753_v10  ;;  %v8494_v6 = vld [vmem:[#allocation17_spill] sm:$0xff] }
 0x1e8   : > { %v2566_v54 = vsel %vm1093_vm2, %v2563_v50, %v2565_v27  ;;  %v6070_v30 = vpop.f32.mrb[128].mxu0 }
 0x1e9   : > { %v5990_v40 = vpop.f32.mrb[128].mxu1  ;;  %v2570_v41 = vrot.slane %v6070_v30, 1  ;;  %v2413_v16 = vpop.f32.mrb[129].mxu0  ;;  %6398 = vmatmul.mubr.msk.f32.gmra.mrb[234].mxu0 %vm199_vm1, %v8487_v3  ;;  %v8104_v21 = vadd.f32 %v2566_v54, %v2110_v37  ;;  %v8492_v37 = vld [vmem:[#allocation10_spill] sm:$0xff] }
 0x1ea   : > { %v2114_v42 = vadd.f32 %v5990_v40, %v8488_v28  ;;  %v2058_v56 = vpop.f32.mrb[129].mxu1  ;;  %6318 = vmatmul.mubr.msk.f32.gmra.mrb[234].mxu1 %vm199_vm1, %v8489_v20  ;;  %v2568_v24 = vrot.slane %v2413_v16, 1  ;;  %6400 = vmatprep.mubr.msk.f32.mxu0 %vm199_vm1, %v7753_v10  ;;  %v8496_v28 = vld [vmem:[#allocation19_spill] sm:$0xff] }
 0x1eb   : > { %v2113_v47 = vadd.f32 %v2058_v56, %v8490_v51  ;;  %6320 = vmatprep.mubr.msk.f32.mxu1 %vm199_vm1, %v8491_v62 }
 0x1ec   : > { %v2569_v22 = vsel %vm1093_vm2, %v2567_v59, %v2568_v24  ;;  %v2571_v46 = vsel %vm1093_vm2, %v2568_v24, %v2570_v41  ;;  %v6073_v34 = vpop.f32.mrb[130].mxu0 }
 0x1ed   : > { %v5993_v39 = vpop.f32.mrb[130].mxu1  ;;  %v2573_v32 = vrot.slane %v6073_v34, 1  ;;  %v2423_v50 = vpop.f32.mrb[131].mxu0  ;;  %6401 = vmatmul.mubr.msk.f32.gmra.mrb[236].mxu0 %vm199_vm1, %v8489_v20  ;;  %v8117_v14 = vadd.f32 %v2571_v46, %v2112_v29  ;;  %v8119_v8 = vadd.f32 %v2569_v22, %v2111_v17  ;;  %v8495_v29 = vld [vmem:[#allocation18_spill] sm:$0xff] }
 0x1ee   : > { %6321 = vmatmul.mubr.msk.f32.gmra.mrb[236].mxu1 %vm199_vm1, %v8492_v37  ;;  %v2068_v52 = vpop.f32.mrb[131].mxu1  ;;  %v2572_v10 = vrot.slane %v2423_v50, 1  ;;  %6403 = vmatprep.mubr.msk.f32.mxu0 %vm199_vm1, %v8491_v62 }
 0x1ef   : > { %6323 = vmatprep.mubr.msk.f32.mxu1 %vm199_vm1, %v8493_v9 }
 0x1f0   : > { %v2574_v33 = vsel %vm1093_vm2, %v2572_v10, %v2573_v32  ;;  %v6076_v18 = vpop.f32.mrb[132].mxu0 }
 0x1f1   : > { %v5996_v11 = vpop.f32.mrb[132].mxu1  ;;  %v2433_v43 = vpop.f32.mrb[133].mxu0  ;;  %6404 = vmatmul.mubr.msk.f32.gmra.mrb[238].mxu0 %vm199_vm1, %v8492_v37  ;;  %v8130_v0 = vadd.f32 %v2574_v33, %v2113_v47 }
 0x1f2   : > { %6324 = vmatmul.mubr.msk.f32.gmra.mrb[238].mxu1 %vm199_vm1, %v8494_v6  ;;  %v2076_v17 = vpop.f32.mrb[133].mxu1  ;;  %v2575_v3 = vrot.slane %v2433_v43, 1  ;;  %6406 = vmatprep.mubr.msk.f32.mxu0 %vm199_vm1, %v8493_v9 }
 0x1f3   : > { %6326 = vmatprep.mubr.msk.f32.mxu1 %vm199_vm1, %v8495_v29 }
 0x1f4   : > { %v2576_v27 = vsel %vm1093_vm2, %v2573_v32, %v2575_v3  ;;  %v6079_v54 = vpop.f32.mrb[134].mxu0 }
 0x1f5   : > { %v6084_v40 = vpop.f32.mrb[134].mxu1  ;;  %v2442_v30 = vpop.f32.mrb[135].mxu0  ;;  %6407 = vmatmul.mubr.msk.f32.gmra.mrb[240].mxu0 %vm199_vm1, %v8494_v6  ;;  %v8141_v56 = vadd.f32 %v2576_v27, %v2114_v42 }
 0x1f6   : > { %6327 = vmatmul.mubr.msk.f32.gmra.mrb[240].mxu1 %vm199_vm1, %v8496_v28  ;;  %v2712_v41 = vpop.f32.mrb[135].mxu1  ;;  %6409 = vmatprep.mubr.msk.f32.mxu0 %vm199_vm1, %v8495_v29 }
 0x1f8   : > { %v6167_v16 = vpop.f32.mrb[136].mxu0 }
 0x1f9   : > { %v6087_v20 = vpop.f32.mrb[136].mxu1  ;;  %v3238_v59 = vpop.f32.mrb[137].mxu0  ;;  %6410 = vmatmul.mubr.msk.f32.gmra.mrb[242].mxu0 %vm199_vm1, %v8496_v28 }
 0x1fa   : > { %v2720_v51 = vpop.f32.mrb[137].mxu1  ;;  %v3023_v34 = vrot.slane %v6087_v20, 2 }
 0x1fc   : > { %v6170_v24 = vpop.f32.mrb[138].mxu0 }
 0x1fd   : > { %v6090_v47 = vpop.f32.mrb[138].mxu1  ;;  %v3246_v46 = vpop.f32.mrb[139].mxu0 }
 0x1fe   : > { %v3026_v62 = vrot.slane %v6090_v47, 2  ;;  %v2729_v22 = vpop.f32.mrb[139].mxu1 }
 0x1ff   : > { %v3024_v39 = vrot.slane %v2729_v22, 2 }
 0x200   : > { %v6173_v42 = vpop.f32.mrb[140].mxu0 }
 0x201   : > { %v6093_v32 = vpop.f32.mrb[140].mxu1  ;;  %v3027_v50 = vsel %vm1620_vm3, %v3024_v39, %v3026_v62  ;;  %v3025_v37 = vsel %vm1620_vm3, %v3023_v34, %v3024_v39  ;;  %v3254_v9 = vpop.f32.mrb[141].mxu0 }
 0x202   : > { %v3029_v52 = vrot.slane %v6093_v32, 2  ;;  %v2739_v10 = vpop.f32.mrb[141].mxu1  ;;  %v3136_v33 = vadd.f32 %v3027_v50, %v7854_v55  ;;  %v3135_v18 = vadd.f32 %v3025_v37, %v7856_v26 }
 0x203   : > { %v3028_v11 = vrot.slane %v2739_v10, 2 }
 0x204   : > { %v6176_v6 = vpop.f32.mrb[142].mxu0 }
 0x205   : > { %v6096_v43 = vpop.f32.mrb[142].mxu1  ;;  %v3030_v17 = vsel %vm1620_vm3, %v3028_v11, %v3029_v52  ;;  %v8152_v3 = vadd.f32 %v6176_v6, %v3136_v33  ;;  %v3262_v27 = vpop.f32.mrb[143].mxu0 }
 0x206   : > { %v2749_v29 = vpop.f32.mrb[143].mxu1  ;;  %v3137_v54 = vadd.f32 %v3030_v17, %v7865_v4  ;;  %v8155_v30 = vadd.f32 %v3262_v27, %v3135_v18  ;;  %v3033_v47 = vrot.slane %v6096_v43, 2 }
 0x207   : > { %v3031_v40 = vrot.slane %v2749_v29, 2 }
 0x208   : > { %v6179_v41 = vpop.f32.mrb[144].mxu0 }
 0x209   : > { %v6099_v28 = vpop.f32.mrb[144].mxu1  ;;  %v3032_v55 = vsel %vm1620_vm3, %v3029_v52, %v3031_v40  ;;  %v8158_v26 = vadd.f32 %v6179_v41, %v3137_v54  ;;  %v3272_v59 = vpop.f32.mrb[145].mxu0 }
 0x20a   : > { %v3036_v16 = vrot.slane %v6099_v28, 2  ;;  %v2759_v20 = vpop.f32.mrb[145].mxu1  ;;  %v3138_v51 = vadd.f32 %v3032_v55, %v7876_v5 }
 0x20b   : > { %v3034_v24 = vrot.slane %v2759_v20, 2 }
 0x20c   : > { %v6182_v22 = vpop.f32.mrb[146].mxu0 }
 0x20d   : > { %v6102_v62 = vpop.f32.mrb[146].mxu1  ;;  %v3037_v4 = vsel %vm1620_vm3, %v3034_v24, %v3036_v16  ;;  %v3035_v46 = vsel %vm1620_vm3, %v3033_v47, %v3034_v24  ;;  %v3281_v32 = vpop.f32.mrb[147].mxu0 }
 0x20e   : > { %v3039_v34 = vrot.slane %v6102_v62, 2  ;;  %v2769_v39 = vpop.f32.mrb[147].mxu1  ;;  %v3140_v42 = vadd.f32 %v3037_v4, %v7888_v61  ;;  %v3139_v50 = vadd.f32 %v3035_v46, %v7890_v13  ;;  %v8165_v52 = vadd.f32 %v3281_v32, %v3138_v51 }
 0x20f   : > { %v3038_v37 = vrot.slane %v2769_v39, 2 }
 0x210   : > { %v6185_v5 = vpop.f32.mrb[148].mxu0 }
 0x211   : > { %v6105_v10 = vpop.f32.mrb[148].mxu1  ;;  %v3040_v9 = vsel %vm1620_vm3, %v3038_v37, %v3039_v34  ;;  %v8168_v33 = vadd.f32 %v6185_v5, %v3140_v42  ;;  %v3290_v11 = vpop.f32.mrb[149].mxu0 }
 0x212   : > { %v2779_v18 = vpop.f32.mrb[149].mxu1  ;;  %v3141_v43 = vadd.f32 %v3040_v9, %v7899_v48  ;;  %v8171_v17 = vadd.f32 %v3290_v11, %v3139_v50  ;;  %v3043_v55 = vrot.slane %v6105_v10, 2 }
 0x213   : > { %v3041_v6 = vrot.slane %v2779_v18, 2 }
 0x214   : > { %v6188_v61 = vpop.f32.mrb[150].mxu0 }
 0x215   : > { %v6108_v29 = vpop.f32.mrb[150].mxu1  ;;  %v3042_v13 = vsel %vm1620_vm3, %v3039_v34, %v3041_v6  ;;  %v8174_v54 = vadd.f32 %v6188_v61, %v3141_v43  ;;  %v3300_v28 = vpop.f32.mrb[151].mxu0 }
 0x216   : > { %v3046_v27 = vrot.slane %v6108_v29, 2  ;;  %v2789_v40 = vpop.f32.mrb[151].mxu1  ;;  %v3142_v41 = vadd.f32 %v3042_v13, %v7910_v63 }
 0x217   : > { %v3044_v16 = vrot.slane %v2789_v40, 2 }
 0x218   : > { %v6191_v59 = vpop.f32.mrb[152].mxu0 }
 0x219   : > { %v6111_v20 = vpop.f32.mrb[152].mxu1  ;;  %v3047_v48 = vsel %vm1620_vm3, %v3044_v16, %v3046_v27  ;;  %v3045_v51 = vsel %vm1620_vm3, %v3043_v55, %v3044_v16  ;;  %v3309_v62 = vpop.f32.mrb[153].mxu0 }
 0x21a   : > { %v3049_v47 = vrot.slane %v6111_v20, 2  ;;  %v2799_v24 = vpop.f32.mrb[153].mxu1  ;;  %v3144_v22 = vadd.f32 %v3047_v48, %v7922_v23  ;;  %v3143_v4 = vadd.f32 %v3045_v51, %v7924_v25  ;;  %v8181_v34 = vadd.f32 %v3309_v62, %v3142_v41 }
 0x21b   : > { %v3048_v46 = vrot.slane %v2799_v24, 2 }
 0x21c   : > { %v6194_v63 = vpop.f32.mrb[154].mxu0 }
 0x21d   : > { %v6114_v39 = vpop.f32.mrb[154].mxu1  ;;  %v3050_v32 = vsel %vm1620_vm3, %v3048_v46, %v3049_v47  ;;  %v8184_v42 = vadd.f32 %v6194_v63, %v3144_v22  ;;  %v3318_v37 = vpop.f32.mrb[155].mxu0 }
 0x21e   : > { %v2809_v50 = vpop.f32.mrb[155].mxu1  ;;  %v3145_v10 = vadd.f32 %v3050_v32, %v7933_v12  ;;  %v8187_v9 = vadd.f32 %v3318_v37, %v3143_v4  ;;  %v3053_v13 = vrot.slane %v6114_v39, 2 }
 0x21f   : > { %v3051_v5 = vrot.slane %v2809_v50, 2 }
 0x220   : > { %v6197_v23 = vpop.f32.mrb[156].mxu0 }
 0x221   : > { %v6117_v18 = vpop.f32.mrb[156].mxu1  ;;  %v3052_v25 = vsel %vm1620_vm3, %v3049_v47, %v3051_v5  ;;  %v8190_v43 = vadd.f32 %v6197_v23, %v3145_v10  ;;  %v3328_v29 = vpop.f32.mrb[157].mxu0 }
 0x222   : > { %v3056_v11 = vrot.slane %v6117_v18, 2  ;;  %v2819_v6 = vpop.f32.mrb[157].mxu1  ;;  %v3146_v61 = vadd.f32 %v3052_v25, %v7944_v45 }
 0x223   : > { %v3054_v27 = vrot.slane %v2819_v6, 2 }
 0x224   : > { %v6200_v28 = vpop.f32.mrb[158].mxu0 }
 0x225   : > { %v6120_v40 = vpop.f32.mrb[158].mxu1  ;;  %v3057_v12 = vsel %vm1620_vm3, %v3054_v27, %v3056_v11  ;;  %v3055_v41 = vsel %vm1620_vm3, %v3053_v13, %v3054_v27  ;;  %v3337_v20 = vpop.f32.mrb[159].mxu0 }
 0x226   : > { %v3059_v55 = vrot.slane %v6120_v40, 2  ;;  %v2829_v16 = vpop.f32.mrb[159].mxu1  ;;  %v3148_v59 = vadd.f32 %v3057_v12, %v7958_v19  ;;  %v3147_v48 = vadd.f32 %v3055_v41, %v7960_v15  ;;  %v8197_v47 = vadd.f32 %v3337_v20, %v3146_v61 }
 0x227   : > { %v3058_v51 = vrot.slane %v2829_v16, 2 }
 0x228   : > { %v6203_v45 = vpop.f32.mrb[160].mxu0 }
 0x229   : > { %v6123_v24 = vpop.f32.mrb[160].mxu1  ;;  %v3060_v62 = vsel %vm1620_vm3, %v3058_v51, %v3059_v55  ;;  %v8200_v22 = vadd.f32 %v6203_v45, %v3148_v59  ;;  %v3346_v46 = vpop.f32.mrb[161].mxu0 }
 0x22a   : > { %v2839_v4 = vpop.f32.mrb[161].mxu1  ;;  %v3149_v39 = vadd.f32 %v3060_v62, %v7971_v35  ;;  %v8203_v32 = vadd.f32 %v3346_v46, %v3147_v48  ;;  %v3063_v25 = vrot.slane %v6123_v24, 2 }
 0x22b   : > { %v3061_v63 = vrot.slane %v2839_v4, 2 }
 0x22c   : > { %v6206_v19 = vpop.f32.mrb[162].mxu0 }
 0x22d   : > { %v6126_v50 = vpop.f32.mrb[162].mxu1  ;;  %v3062_v15 = vsel %vm1620_vm3, %v3059_v55, %v3061_v63  ;;  %v8206_v10 = vadd.f32 %v6206_v19, %v3149_v39  ;;  %v3356_v18 = vpop.f32.mrb[163].mxu0 }
 0x22e   : > { %v3066_v37 = vrot.slane %v6126_v50, 2  ;;  %v2849_v5 = vpop.f32.mrb[163].mxu1  ;;  %v3150_v23 = vadd.f32 %v3062_v15, %v7984_v2 }
 0x22f   : > { %v3064_v11 = vrot.slane %v2849_v5, 2 }
 0x230   : > { %v6209_v29 = vpop.f32.mrb[164].mxu0 }
 0x231   : > { %v6129_v6 = vpop.f32.mrb[164].mxu1  ;;  %v3067_v35 = vsel %vm1620_vm3, %v3064_v11, %v3066_v37  ;;  %v3065_v61 = vsel %vm1620_vm3, %v3063_v25, %v3064_v11  ;;  %v3365_v40 = vpop.f32.mrb[165].mxu0 }
 0x232   : > { %v3069_v13 = vrot.slane %v6129_v6, 2  ;;  %v2859_v27 = vpop.f32.mrb[165].mxu1  ;;  %v3152_v28 = vadd.f32 %v3067_v35, %v7998_v1  ;;  %v3151_v12 = vadd.f32 %v3065_v61, %v8000_v36  ;;  %v8213_v55 = vadd.f32 %v3365_v40, %v3150_v23 }
 0x233   : > { %v3068_v41 = vrot.slane %v2859_v27, 2 }
 0x234   : > { %v6212_v2 = vpop.f32.mrb[166].mxu0 }
 0x235   : > { %v6132_v16 = vpop.f32.mrb[166].mxu1  ;;  %v3070_v20 = vsel %vm1620_vm3, %v3068_v41, %v3069_v13  ;;  %v8216_v59 = vadd.f32 %v6212_v2, %v3152_v28  ;;  %v3374_v51 = vpop.f32.mrb[167].mxu0 }
 0x236   : > { %v2869_v48 = vpop.f32.mrb[167].mxu1  ;;  %v3153_v24 = vadd.f32 %v3070_v20, %v8011_v49  ;;  %v8219_v62 = vadd.f32 %v3374_v51, %v3151_v12  ;;  %v3073_v15 = vrot.slane %v6132_v16, 2 }
 0x237   : > { %v3071_v45 = vrot.slane %v2869_v48, 2 }
 0x238   : > { %v6215_v1 = vpop.f32.mrb[168].mxu0 }
 0x239   : > { %v6135_v4 = vpop.f32.mrb[168].mxu1  ;;  %v3072_v36 = vsel %vm1620_vm3, %v3069_v13, %v3071_v45  ;;  %v8222_v39 = vadd.f32 %v6215_v1, %v3153_v24  ;;  %v3384_v50 = vpop.f32.mrb[169].mxu0 }
 0x23a   : > { %v3076_v46 = vrot.slane %v6135_v4, 2  ;;  %v2879_v63 = vpop.f32.mrb[169].mxu1  ;;  %v3154_v19 = vadd.f32 %v3072_v36, %v8024_v53 }
 0x23b   : > { %v3074_v37 = vrot.slane %v2879_v63, 2 }
 0x23c   : > { %v6218_v18 = vpop.f32.mrb[170].mxu0 }
 0x23d   : > { %v6138_v5 = vpop.f32.mrb[170].mxu1  ;;  %v3077_v49 = vsel %vm1620_vm3, %v3074_v37, %v3076_v46  ;;  %v3075_v23 = vsel %vm1620_vm3, %v3073_v15, %v3074_v37  ;;  %v3393_v6 = vpop.f32.mrb[171].mxu0 }
 0x23e   : > { %v3079_v25 = vrot.slane %v6138_v5, 2  ;;  %v2889_v11 = vpop.f32.mrb[171].mxu1  ;;  %v3156_v29 = vadd.f32 %v3077_v49, %v8038_v44  ;;  %v3155_v35 = vadd.f32 %v3075_v23, %v8040_v58  ;;  %v8229_v13 = vadd.f32 %v3393_v6, %v3154_v19 }
 0x23f   : > { %v3078_v61 = vrot.slane %v2889_v11, 2 }
 0x240   : > { %v6221_v53 = vpop.f32.mrb[172].mxu0 }
 0x241   : > { %v6141_v27 = vpop.f32.mrb[172].mxu1  ;;  %v3080_v40 = vsel %vm1620_vm3, %v3078_v61, %v3079_v25  ;;  %v8232_v28 = vadd.f32 %v6221_v53, %v3156_v29  ;;  %v3402_v41 = vpop.f32.mrb[173].mxu0 }
 0x242   : > { %v2899_v12 = vpop.f32.mrb[173].mxu1  ;;  %v3157_v16 = vadd.f32 %v3080_v40, %v8051_v7  ;;  %v8235_v20 = vadd.f32 %v3402_v41, %v3155_v35  ;;  %v3083_v36 = vrot.slane %v6141_v27, 2 }
 0x243   : > { %v3081_v2 = vrot.slane %v2899_v12, 2 }
 0x244   : > { %v6224_v44 = vpop.f32.mrb[174].mxu0 }
 0x245   : > { %v6144_v48 = vpop.f32.mrb[174].mxu1  ;;  %v3082_v58 = vsel %vm1620_vm3, %v3079_v25, %v3081_v2  ;;  %v8238_v24 = vadd.f32 %v6224_v44, %v3157_v16  ;;  %v3412_v4 = vpop.f32.mrb[175].mxu0 }
 0x246   : > { %v3086_v51 = vrot.slane %v6144_v48, 2  ;;  %v2909_v45 = vpop.f32.mrb[175].mxu1  ;;  %v3158_v1 = vadd.f32 %v3082_v58, %v8064_v38 }
 0x247   : > { %v3084_v46 = vrot.slane %v2909_v45, 2 }
 0x248   : > { %v6227_v50 = vpop.f32.mrb[176].mxu0 }
 0x249   : > { %v6147_v63 = vpop.f32.mrb[176].mxu1  ;;  %v3087_v7 = vsel %vm1620_vm3, %v3084_v46, %v3086_v51  ;;  %v3085_v19 = vsel %vm1620_vm3, %v3083_v36, %v3084_v46  ;;  %v3421_v5 = vpop.f32.mrb[177].mxu0 }
 0x24a   : > { %v3089_v15 = vrot.slane %v6147_v63, 2  ;;  %v2919_v37 = vpop.f32.mrb[177].mxu1  ;;  %v3160_v18 = vadd.f32 %v3087_v7, %v8078_v57  ;;  %v3159_v49 = vadd.f32 %v3085_v19, %v8080_v60  ;;  %v8245_v25 = vadd.f32 %v3421_v5, %v3158_v1 }
 0x24b   : > { %v3088_v23 = vrot.slane %v2919_v37, 2 }
 0x24c   : > { %v6230_v38 = vpop.f32.mrb[178].mxu0 }
 0x24d   : > { %v6150_v11 = vpop.f32.mrb[178].mxu1  ;;  %v3090_v6 = vsel %vm1620_vm3, %v3088_v23, %v3089_v15  ;;  %v8248_v29 = vadd.f32 %v6230_v38, %v3160_v18  ;;  %v3430_v61 = vpop.f32.mrb[179].mxu0 }
 0x24e   : > { %v2929_v35 = vpop.f32.mrb[179].mxu1  ;;  %v3161_v27 = vadd.f32 %v3090_v6, %v8091_v31  ;;  %v8251_v40 = vadd.f32 %v3430_v61, %v3159_v49  ;;  %v3093_v58 = vrot.slane %v6150_v11, 2 }
 0x24f   : > { %v3091_v53 = vrot.slane %v2929_v35, 2 }
 0x250   : > { %v6233_v57 = vpop.f32.mrb[180].mxu0 }
 0x251   : > { %v6153_v12 = vpop.f32.mrb[180].mxu1  ;;  %v3092_v60 = vsel %vm1620_vm3, %v3089_v15, %v3091_v53  ;;  %v8254_v16 = vadd.f32 %v6233_v57, %v3161_v27  ;;  %v3440_v48 = vpop.f32.mrb[181].mxu0 }
 0x252   : > { %v3096_v41 = vrot.slane %v6153_v12, 2  ;;  %v2939_v2 = vpop.f32.mrb[181].mxu1  ;;  %v3162_v44 = vadd.f32 %v3092_v60, %v8104_v21 }
 0x253   : > { %v3094_v51 = vrot.slane %v2939_v2, 2 }
 0x254   : > { %v6236_v4 = vpop.f32.mrb[182].mxu0 }
 0x255   : > { %v6156_v45 = vpop.f32.mrb[182].mxu1  ;;  %v3097_v31 = vsel %vm1620_vm3, %v3094_v51, %v3096_v41  ;;  %v3095_v1 = vsel %vm1620_vm3, %v3093_v58, %v3094_v51  ;;  %v3449_v63 = vpop.f32.mrb[183].mxu0 }
 0x256   : > { %v3099_v36 = vrot.slane %v6156_v45, 2  ;;  %v2949_v46 = vpop.f32.mrb[183].mxu1  ;;  %v3164_v50 = vadd.f32 %v3097_v31, %v8117_v14  ;;  %v3163_v7 = vadd.f32 %v3095_v1, %v8119_v8  ;;  %v8261_v15 = vadd.f32 %v3449_v63, %v3162_v44 }
 0x257   : > { %v3098_v19 = vrot.slane %v2949_v46, 2 }
 0x258   : > { %v6239_v21 = vpop.f32.mrb[184].mxu0 }
 0x259   : > { %v6159_v37 = vpop.f32.mrb[184].mxu1  ;;  %v3100_v5 = vsel %vm1620_vm3, %v3098_v19, %v3099_v36  ;;  %v8264_v18 = vadd.f32 %v6239_v21, %v3164_v50  ;;  %v3458_v23 = vpop.f32.mrb[185].mxu0 }
 0x25a   : > { %v2959_v49 = vpop.f32.mrb[185].mxu1  ;;  %v3165_v11 = vadd.f32 %v3100_v5, %v8130_v0  ;;  %v8267_v6 = vadd.f32 %v3458_v23, %v3163_v7 }
 0x25b   : > { %v3101_v38 = vrot.slane %v2959_v49, 2 }
 0x25c   : > { %v6242_v35 = vpop.f32.mrb[186].mxu0 }
 0x25d   : > { %v6162_v14 = vpop.f32.mrb[186].mxu1  ;;  %v3102_v8 = vsel %vm1620_vm3, %v3099_v36, %v3101_v38  ;;  %v8270_v61 = vadd.f32 %v6242_v35, %v3165_v11  ;;  %v3468_v27 = vpop.f32.mrb[187].mxu0 }
 0x25e   : > { %v2968_v53 = vpop.f32.mrb[187].mxu1  ;;  %v3166_v12 = vadd.f32 %v3102_v8, %v8141_v56 }
 0x260   : > { %v6245_v57 = vpop.f32.mrb[188].mxu0 }
 0x261   : > { %v6250_v60 = vpop.f32.mrb[188].mxu1  ;;  %v3477_v41 = vpop.f32.mrb[189].mxu0 }
 0x262   : > { %v3588_v2 = vpop.f32.mrb[189].mxu1  ;;  %v8273_v48 = vadd.f32 %v3477_v41, %v3166_v12 }
 0x264   : > { %v6333_v0 = vpop.f32.mrb[190].mxu0 }
 0x265   : > { %v6253_v44 = vpop.f32.mrb[190].mxu1  ;;  %v4114_v58 = vpop.f32.mrb[191].mxu0 }
 0x266   : > { %v3596_v51 = vpop.f32.mrb[191].mxu1 }
 0x268   : > { %v6336_v45 = vpop.f32.mrb[192].mxu0 }
 0x269   : > { %v6256_v4 = vpop.f32.mrb[192].mxu1  ;;  %v4122_v31 = vpop.f32.mrb[193].mxu0 }
 0x26a   : > { %v3604_v1 = vpop.f32.mrb[193].mxu1 }
 0x26c   : > { %v6339_v46 = vpop.f32.mrb[194].mxu0 }
 0x26d   : > { %v6259_v36 = vpop.f32.mrb[194].mxu1  ;;  %v4130_v56 = vpop.f32.mrb[195].mxu0 }
 0x26e   : > { %v3900_v63 = vrot.slane %v6259_v36, 1  ;;  %v3612_v50 = vpop.f32.mrb[195].mxu1 }
 0x26f   : > { %v3899_v7 = vrot.slane %v3612_v50, 1 }
 0x270   : > { %v6342_v21 = vpop.f32.mrb[196].mxu0 }
 0x271   : > { %v3901_v19 = vsel %vm1093_vm2, %v3899_v7, %v3900_v63  ;;  %v6262_v37 = vpop.f32.mrb[196].mxu1  ;;  %v4426_v49 = vrot.slane %v6342_v21, 2  ;;  %v4138_v11 = vpop.f32.mrb[197].mxu0 }
 0x272   : > { %v4011_v5 = vadd.f32 %v3901_v19, %v8155_v30  ;;  %v3622_v23 = vpop.f32.mrb[197].mxu1  ;;  %v4425_v35 = vrot.slane %v4138_v11, 2  ;;  %v3904_v2 = vrot.slane %v6262_v37, 1 }
 0x273   : > { %v3902_v38 = vrot.slane %v3622_v23, 1 }
 0x274   : > { %v4427_v8 = vsel %vm1620_vm3, %v4425_v35, %v4426_v49  ;;  %v6345_v53 = vpop.f32.mrb[198].mxu0 }
 0x275   : > { %v3903_v14 = vsel %vm1093_vm2, %v3900_v63, %v3902_v38  ;;  %v6265_v27 = vpop.f32.mrb[198].mxu1  ;;  %v4537_v12 = vadd.f32 %v4427_v8, %v4011_v5  ;;  %v4148_v41 = vpop.f32.mrb[199].mxu0  ;;  %v4430_v56 = vrot.slane %v6345_v53, 2 }
 0x276   : > { %v4012_v30 = vadd.f32 %v3903_v14, %v8152_v3  ;;  %v3907_v57 = vrot.slane %v6265_v27, 1  ;;  %v3632_v60 = vpop.f32.mrb[199].mxu1  ;;  %v4428_v44 = vrot.slane %v4148_v41, 2 }
 0x277   : > { %v3905_v0 = vrot.slane %v3632_v60, 1  ;;  %4569 = vst [vmem:[%s8282_s8] sm:$0xff] %v4537_v12 }
 0x278   : > { %v4429_v45 = vsel %vm1620_vm3, %v4426_v49, %v4428_v44  ;;  %v6348_v31 = vpop.f32.mrb[200].mxu0 }
 0x279   : > { %v3906_v58 = vsel %vm1093_vm2, %v3904_v2, %v3905_v0  ;;  %v3908_v51 = vsel %vm1093_vm2, %v3905_v0, %v3907_v57  ;;  %v6268_v4 = vpop.f32.mrb[200].mxu1  ;;  %v4538_v36 = vadd.f32 %v4429_v45, %v4012_v30  ;;  %v4158_v50 = vpop.f32.mrb[201].mxu0  ;;  %v4433_v7 = vrot.slane %v6348_v31, 2 }
 0x27a   : > { %v4013_v1 = vadd.f32 %v3906_v58, %v8158_v26  ;;  %v4014_v3 = vadd.f32 %v3908_v51, %v8165_v52  ;;  %v3910_v46 = vrot.slane %v6268_v4, 1  ;;  %v3642_v63 = vpop.f32.mrb[201].mxu1  ;;  %v4431_v37 = vrot.slane %v4158_v50, 2 }
 0x27b   : > { %v3909_v19 = vrot.slane %v3642_v63, 1  ;;  %4570 = vst [vmem:[%s8282_s8 + $0x8] sm:$0xff] %v4538_v36 }
 0x27c   : > { %v4432_v5 = vsel %vm1620_vm3, %v4430_v56, %v4431_v37  ;;  %v4434_v49 = vsel %vm1620_vm3, %v4431_v37, %v4433_v7  ;;  %v6351_v23 = vpop.f32.mrb[202].mxu0 }
 0x27d   : > { %v3911_v21 = vsel %vm1093_vm2, %v3909_v19, %v3910_v46  ;;  %v6271_v26 = vpop.f32.mrb[202].mxu1  ;;  %v4539_v11 = vadd.f32 %v4432_v5, %v4013_v1  ;;  %v4540_v38 = vadd.f32 %v4434_v49, %v4014_v3  ;;  %v4168_v14 = vpop.f32.mrb[203].mxu0  ;;  %v4436_v8 = vrot.slane %v6351_v23, 2 }
 0x27e   : > { %v4015_v52 = vadd.f32 %v3911_v21, %v8171_v17  ;;  %v3652_v35 = vpop.f32.mrb[203].mxu1  ;;  %v4435_v53 = vrot.slane %v4168_v14, 2  ;;  %v3914_v58 = vrot.slane %v6271_v26, 1 }
 0x27f   : > { %v3912_v27 = vrot.slane %v3652_v35, 1  ;;  %4571 = vst [vmem:[%s8282_s8 + $0x10] sm:$0xff] %v4539_v11  ;;  %4572 = vst [vmem:[%s8282_s8 + $0x18] sm:$0xff] %v4540_v38 }
 0x280   : > { %v4437_v12 = vsel %vm1620_vm3, %v4435_v53, %v4436_v8  ;;  %v6354_v60 = vpop.f32.mrb[204].mxu0 }
 0x281   : > { %v3913_v30 = vsel %vm1093_vm2, %v3910_v46, %v3912_v27  ;;  %v6274_v57 = vpop.f32.mrb[204].mxu1  ;;  %v4541_v2 = vadd.f32 %v4437_v12, %v4015_v52  ;;  %v4178_v44 = vpop.f32.mrb[205].mxu0  ;;  %v4440_v19 = vrot.slane %v6354_v60, 2 }
 0x282   : > { %v4016_v41 = vadd.f32 %v3913_v30, %v8168_v33  ;;  %v3917_v17 = vrot.slane %v6274_v57, 1  ;;  %v3662_v0 = vpop.f32.mrb[205].mxu1  ;;  %v4438_v45 = vrot.slane %v4178_v44, 2 }
 0x283   : > { %v3915_v51 = vrot.slane %v3662_v0, 1  ;;  %4573 = vst [vmem:[%s8282_s8 + $0x20] sm:$0xff] %v4541_v2 }
 0x284   : > { %v4439_v1 = vsel %vm1620_vm3, %v4436_v8, %v4438_v45  ;;  %v6357_v36 = vpop.f32.mrb[206].mxu0 }
 0x285   : > { %v3916_v4 = vsel %vm1093_vm2, %v3914_v58, %v3915_v51  ;;  %v3918_v31 = vsel %vm1093_vm2, %v3915_v51, %v3917_v17  ;;  %v6277_v3 = vpop.f32.mrb[206].mxu1  ;;  %v4542_v63 = vadd.f32 %v4439_v1, %v4016_v41  ;;  %v4188_v7 = vpop.f32.mrb[207].mxu0  ;;  %v4443_v37 = vrot.slane %v6357_v36, 2 }
 0x286   : > { %v4017_v46 = vadd.f32 %v3916_v4, %v8174_v54  ;;  %v4018_v33 = vadd.f32 %v3918_v31, %v8181_v34  ;;  %v3920_v50 = vrot.slane %v6277_v3, 1  ;;  %v3672_v56 = vpop.f32.mrb[207].mxu1  ;;  %v4441_v5 = vrot.slane %v4188_v7, 2 }
 0x287   : > { %v3919_v21 = vrot.slane %v3672_v56, 1  ;;  %4574 = vst [vmem:[%s8282_s8 + $0x28] sm:$0xff] %v4542_v63 }
 0x288   : > { %v4442_v26 = vsel %vm1620_vm3, %v4440_v19, %v4441_v5  ;;  %v4444_v23 = vsel %vm1620_vm3, %v4441_v5, %v4443_v37  ;;  %v6360_v52 = vpop.f32.mrb[208].mxu0 }
 0x289   : > { %v3921_v49 = vsel %vm1093_vm2, %v3919_v21, %v3920_v50  ;;  %v6280_v54 = vpop.f32.mrb[208].mxu1  ;;  %v4543_v11 = vadd.f32 %v4442_v26, %v4017_v46  ;;  %v4544_v38 = vadd.f32 %v4444_v23, %v4018_v33  ;;  %v4198_v14 = vpop.f32.mrb[209].mxu0  ;;  %v4446_v8 = vrot.slane %v6360_v52, 2 }
 0x28a   : > { %v4019_v34 = vadd.f32 %v3921_v49, %v8187_v9  ;;  %v3682_v35 = vpop.f32.mrb[209].mxu1  ;;  %v4445_v53 = vrot.slane %v4198_v14, 2  ;;  %v3924_v44 = vrot.slane %v6280_v54, 1 }
 0x28b   : > { %v3922_v27 = vrot.slane %v3682_v35, 1  ;;  %4575 = vst [vmem:[%s8282_s8 + $0x30] sm:$0xff] %v4543_v11  ;;  %4576 = vst [vmem:[%s8282_s8 + $0x38] sm:$0xff] %v4544_v38 }
 0x28c   : > { %v4447_v12 = vsel %vm1620_vm3, %v4445_v53, %v4446_v8  ;;  %v6363_v60 = vpop.f32.mrb[210].mxu0 }
 0x28d   : > { %v3923_v30 = vsel %vm1093_vm2, %v3920_v50, %v3922_v27  ;;  %v6283_v57 = vpop.f32.mrb[210].mxu1  ;;  %v4545_v2 = vadd.f32 %v4447_v12, %v4019_v34  ;;  %v4208_v0 = vpop.f32.mrb[211].mxu0  ;;  %v4450_v56 = vrot.slane %v6363_v60, 2 }
 0x28e   : > { %v4020_v41 = vadd.f32 %v3923_v30, %v8184_v42  ;;  %v3927_v9 = vrot.slane %v6283_v57, 1  ;;  %v3692_v17 = vpop.f32.mrb[211].mxu1  ;;  %v4448_v51 = vrot.slane %v4208_v0, 2 }
 0x28f   : > { %v3925_v58 = vrot.slane %v3692_v17, 1  ;;  %4577 = vst [vmem:[%s8282_s8 + $0x40] sm:$0xff] %v4545_v2 }
 0x290   : > { %v4449_v31 = vsel %vm1620_vm3, %v4446_v8, %v4448_v51  ;;  %v6366_v3 = vpop.f32.mrb[212].mxu0 }
 0x291   : > { %v3926_v45 = vsel %vm1093_vm2, %v3924_v44, %v3925_v58  ;;  %v3928_v4 = vsel %vm1093_vm2, %v3925_v58, %v3927_v9  ;;  %v6286_v1 = vpop.f32.mrb[212].mxu1  ;;  %v4546_v46 = vadd.f32 %v4449_v31, %v4020_v41  ;;  %v4218_v50 = vpop.f32.mrb[213].mxu0  ;;  %v4453_v7 = vrot.slane %v6366_v3, 2 }
 0x292   : > { %v4021_v36 = vadd.f32 %v3926_v45, %v8190_v43  ;;  %v4022_v42 = vadd.f32 %v3928_v4, %v8197_v47  ;;  %v3930_v33 = vrot.slane %v6286_v1, 1  ;;  %v3702_v63 = vpop.f32.mrb[213].mxu1  ;;  %v4451_v37 = vrot.slane %v4218_v50, 2 }
 0x293   : > { %v3929_v19 = vrot.slane %v3702_v63, 1  ;;  %4578 = vst [vmem:[%s8282_s8 + $0x48] sm:$0xff] %v4546_v46 }
 0x294   : > { %v4452_v5 = vsel %vm1620_vm3, %v4450_v56, %v4451_v37  ;;  %v4454_v49 = vsel %vm1620_vm3, %v4451_v37, %v4453_v7  ;;  %v6369_v26 = vpop.f32.mrb[214].mxu0 }
 0x295   : > { %v3931_v21 = vsel %vm1093_vm2, %v3929_v19, %v3930_v33  ;;  %v6289_v43 = vpop.f32.mrb[214].mxu1  ;;  %v4547_v23 = vadd.f32 %v4452_v5, %v4021_v36  ;;  %v4548_v54 = vadd.f32 %v4454_v49, %v4022_v42  ;;  %v4228_v34 = vpop.f32.mrb[215].mxu0  ;;  %v4456_v11 = vrot.slane %v6369_v26, 2 }
 0x296   : > { %v4023_v47 = vadd.f32 %v3931_v21, %v8203_v32  ;;  %v3712_v52 = vpop.f32.mrb[215].mxu1  ;;  %v4455_v35 = vrot.slane %v4228_v34, 2  ;;  %v3934_v41 = vrot.slane %v6289_v43, 1 }
 0x297   : > { %v3932_v38 = vrot.slane %v3712_v52, 1  ;;  %4579 = vst [vmem:[%s8282_s8 + $0x50] sm:$0xff] %v4547_v23  ;;  %4580 = vst [vmem:[%s8282_s8 + $0x58] sm:$0xff] %v4548_v54 }
 0x298   : > { %v4457_v8 = vsel %vm1620_vm3, %v4455_v35, %v4456_v11  ;;  %v6372_v53 = vpop.f32.mrb[216].mxu0 }
 0x299   : > { %v3933_v14 = vsel %vm1093_vm2, %v3930_v33, %v3932_v38  ;;  %v6292_v27 = vpop.f32.mrb[216].mxu1  ;;  %v4549_v12 = vadd.f32 %v4457_v8, %v4023_v47  ;;  %v4238_v60 = vpop.f32.mrb[217].mxu0  ;;  %v4460_v36 = vrot.slane %v6372_v53, 2 }
 0x29a   : > { %v4024_v30 = vadd.f32 %v3933_v14, %v8200_v22  ;;  %v3937_v32 = vrot.slane %v6292_v27, 1  ;;  %v3722_v57 = vpop.f32.mrb[217].mxu1  ;;  %v4458_v9 = vrot.slane %v4238_v60, 2 }
 0x29b   : > { %v3935_v2 = vrot.slane %v3722_v57, 1  ;;  %4581 = vst [vmem:[%s8282_s8 + $0x60] sm:$0xff] %v4549_v12 }
 0x29c   : > { %v4459_v44 = vsel %vm1620_vm3, %v4456_v11, %v4458_v9  ;;  %v6375_v51 = vpop.f32.mrb[218].mxu0 }
 0x29d   : > { %v3936_v17 = vsel %vm1093_vm2, %v3934_v41, %v3935_v2  ;;  %v3938_v0 = vsel %vm1093_vm2, %v3935_v2, %v3937_v32  ;;  %v6295_v58 = vpop.f32.mrb[218].mxu1  ;;  %v4550_v4 = vadd.f32 %v4459_v44, %v4024_v30  ;;  %v4248_v3 = vpop.f32.mrb[219].mxu0  ;;  %v4463_v42 = vrot.slane %v6375_v51, 2 }
 0x29e   : > { %v4025_v45 = vadd.f32 %v3936_v17, %v8206_v10  ;;  %v4026_v22 = vadd.f32 %v3938_v0, %v8213_v55  ;;  %v3940_v31 = vrot.slane %v6295_v58, 1  ;;  %v3732_v1 = vpop.f32.mrb[219].mxu1  ;;  %v4461_v33 = vrot.slane %v4248_v3, 2 }
 0x29f   : > { %v3939_v46 = vrot.slane %v3732_v1, 1  ;;  %4582 = vst [vmem:[%s8282_s8 + $0x68] sm:$0xff] %v4550_v4 }
 0x2a0   : > { %v4462_v50 = vsel %vm1620_vm3, %v4460_v36, %v4461_v33  ;;  %v4464_v56 = vsel %vm1620_vm3, %v4461_v33, %v4463_v42  ;;  %v6378_v7 = vpop.f32.mrb[220].mxu0 }
 0x2a1   : > { %v3941_v63 = vsel %vm1093_vm2, %v3939_v46, %v3940_v31  ;;  %v6298_v10 = vpop.f32.mrb[220].mxu1  ;;  %v4551_v19 = vadd.f32 %v4462_v50, %v4025_v45  ;;  %v4552_v37 = vadd.f32 %v4464_v56, %v4026_v22  ;;  %v4258_v5 = vpop.f32.mrb[221].mxu0  ;;  %v4466_v49 = vrot.slane %v6378_v7, 2 }
 0x2a2   : > { %v4027_v55 = vadd.f32 %v3941_v63, %v8219_v62  ;;  %v3742_v21 = vpop.f32.mrb[221].mxu1  ;;  %v4465_v26 = vrot.slane %v4258_v5, 2  ;;  %v3944_v14 = vrot.slane %v6298_v10, 1 }
 0x2a3   : > { %v3942_v43 = vrot.slane %v3742_v21, 1  ;;  %4583 = vst [vmem:[%s8282_s8 + $0x70] sm:$0xff] %v4551_v19  ;;  %4584 = vst [vmem:[%s8282_s8 + $0x78] sm:$0xff] %v4552_v37 }
 0x2a4   : > { %v4467_v23 = vsel %vm1620_vm3, %v4465_v26, %v4466_v49  ;;  %v6381_v52 = vpop.f32.mrb[222].mxu0 }
 0x2a5   : > { %v3943_v47 = vsel %vm1093_vm2, %v3940_v31, %v3942_v43  ;;  %v6301_v54 = vpop.f32.mrb[222].mxu1  ;;  %v4553_v11 = vadd.f32 %v4467_v23, %v4027_v55  ;;  %v4268_v35 = vpop.f32.mrb[223].mxu0  ;;  %v4470_v0 = vrot.slane %v6381_v52, 2 }
 0x2a6   : > { %v4028_v34 = vadd.f32 %v3943_v47, %v8216_v59  ;;  %v3947_v62 = vrot.slane %v6301_v54, 1  ;;  %v3752_v38 = vpop.f32.mrb[223].mxu1  ;;  %v4468_v27 = vrot.slane %v4268_v35, 2 }
 0x2a7   : > { %v3945_v8 = vrot.slane %v3752_v38, 1  ;;  %4585 = vst [vmem:[%s8282_s8 + $0x80] sm:$0xff] %v4553_v11 }
 0x2a8   : > { %v4469_v12 = vsel %vm1620_vm3, %v4466_v49, %v4468_v27  ;;  %v6384_v57 = vpop.f32.mrb[224].mxu0 }
 0x2a9   : > { %v3946_v53 = vsel %vm1093_vm2, %v3944_v14, %v3945_v8  ;;  %v3948_v30 = vsel %vm1093_vm2, %v3945_v8, %v3947_v62  ;;  %v6304_v32 = vpop.f32.mrb[224].mxu1  ;;  %v4554_v41 = vadd.f32 %v4469_v12, %v4028_v34  ;;  %v4278_v17 = vpop.f32.mrb[225].mxu0  ;;  %v4473_v44 = vrot.slane %v6384_v57, 2 }
 0x2aa   : > { %v4029_v60 = vadd.f32 %v3946_v53, %v8222_v39  ;;  %v4030_v59 = vadd.f32 %v3948_v30, %v8229_v13  ;;  %v3950_v2 = vrot.slane %v6304_v32, 1  ;;  %v3762_v9 = vpop.f32.mrb[225].mxu1  ;;  %v4471_v51 = vrot.slane %v4278_v17, 2 }
 0x2ab   : > { %v3949_v58 = vrot.slane %v3762_v9, 1  ;;  %4586 = vst [vmem:[%s8282_s8 + $0x88] sm:$0xff] %v4554_v41 }
 0x2ac   : > { %v4472_v22 = vsel %vm1620_vm3, %v4470_v0, %v4471_v51  ;;  %v4474_v4 = vsel %vm1620_vm3, %v4471_v51, %v4473_v44  ;;  %v6387_v31 = vpop.f32.mrb[226].mxu0 }
 0x2ad   : > { %v3951_v45 = vsel %vm1093_vm2, %v3949_v58, %v3950_v2  ;;  %v6307_v39 = vpop.f32.mrb[226].mxu1  ;;  %v4555_v1 = vadd.f32 %v4472_v22, %v4029_v60  ;;  %v4556_v3 = vadd.f32 %v4474_v4, %v4030_v59  ;;  %v4288_v42 = vpop.f32.mrb[227].mxu0  ;;  %v4476_v46 = vrot.slane %v6387_v31, 2 }
 0x2ae   : > { %v4031_v13 = vadd.f32 %v3951_v45, %v8235_v20  ;;  %v3772_v36 = vpop.f32.mrb[227].mxu1  ;;  %v4475_v63 = vrot.slane %v4288_v42, 2  ;;  %v3954_v5 = vrot.slane %v6307_v39, 1 }
 0x2af   : > { %v3952_v33 = vrot.slane %v3772_v36, 1  ;;  %4587 = vst [vmem:[%s8282_s8 + $0x90] sm:$0xff] %v4555_v1  ;;  %4588 = vst [vmem:[%s8282_s8 + $0x98] sm:$0xff] %v4556_v3 }
 0x2b0   : > { %v4477_v56 = vsel %vm1620_vm3, %v4475_v63, %v4476_v46  ;;  %v6390_v7 = vpop.f32.mrb[228].mxu0 }
 0x2b1   : > { %v3953_v50 = vsel %vm1093_vm2, %v3950_v2, %v3952_v33  ;;  %v6310_v10 = vpop.f32.mrb[228].mxu1  ;;  %v4557_v19 = vadd.f32 %v4477_v56, %v4031_v13  ;;  %v4298_v21 = vpop.f32.mrb[229].mxu0  ;;  %v4480_v14 = vrot.slane %v6390_v7, 2 }
 0x2b2   : > { %v4032_v55 = vadd.f32 %v3953_v50, %v8232_v28  ;;  %v3957_v20 = vrot.slane %v6310_v10, 1  ;;  %v3782_v37 = vpop.f32.mrb[229].mxu1  ;;  %v4478_v43 = vrot.slane %v4298_v21, 2 }
 0x2b3   : > { %v3955_v49 = vrot.slane %v3782_v37, 1  ;;  %4589 = vst [vmem:[%s8282_s8 + $0xa0] sm:$0xff] %v4557_v19 }
 0x2b4   : > { %v4479_v23 = vsel %vm1620_vm3, %v4476_v46, %v4478_v43  ;;  %v6393_v52 = vpop.f32.mrb[230].mxu0 }
 0x2b5   : > { %v3956_v26 = vsel %vm1093_vm2, %v3954_v5, %v3955_v49  ;;  %v3958_v47 = vsel %vm1093_vm2, %v3955_v49, %v3957_v20  ;;  %v6313_v54 = vpop.f32.mrb[230].mxu1  ;;  %v4558_v11 = vadd.f32 %v4479_v23, %v4032_v55  ;;  %v4308_v35 = vpop.f32.mrb[231].mxu0  ;;  %v4483_v8 = vrot.slane %v6393_v52, 2 }
 0x2b6   : > { %v4033_v34 = vadd.f32 %v3956_v26, %v8238_v24  ;;  %v4034_v28 = vadd.f32 %v3958_v47, %v8245_v25  ;;  %v3960_v62 = vrot.slane %v6313_v54, 1  ;;  %v3792_v38 = vpop.f32.mrb[231].mxu1  ;;  %v4481_v53 = vrot.slane %v4308_v35, 2 }
 0x2b7   : > { %v3959_v27 = vrot.slane %v3792_v38, 1  ;;  %4590 = vst [vmem:[%s8282_s8 + $0xa8] sm:$0xff] %v4558_v11 }
 0x2b8   : > { %v4482_v12 = vsel %vm1620_vm3, %v4480_v14, %v4481_v53  ;;  %v4484_v32 = vsel %vm1620_vm3, %v4481_v53, %v4483_v8  ;;  %v6396_v57 = vpop.f32.mrb[232].mxu0 }
 0x2b9   : > { %v3961_v30 = vsel %vm1093_vm2, %v3959_v27, %v3960_v62  ;;  %v6316_v24 = vpop.f32.mrb[232].mxu1  ;;  %v4559_v60 = vadd.f32 %v4482_v12, %v4033_v34  ;;  %v4560_v59 = vadd.f32 %v4484_v32, %v4034_v28  ;;  %v4318_v2 = vpop.f32.mrb[233].mxu0  ;;  %v4486_v9 = vrot.slane %v6396_v57, 2 }
 0x2ba   : > { %v4035_v25 = vadd.f32 %v3961_v30, %v8251_v40  ;;  %v3802_v41 = vpop.f32.mrb[233].mxu1  ;;  %v4485_v0 = vrot.slane %v4318_v2, 2  ;;  %v3964_v13 = vrot.slane %v6316_v24, 1 }
 0x2bb   : > { %v3962_v17 = vrot.slane %v3802_v41, 1  ;;  %4591 = vst [vmem:[%s8282_s8 + $0xb0] sm:$0xff] %v4559_v60  ;;  %4592 = vst [vmem:[%s8282_s8 + $0xb8] sm:$0xff] %v4560_v59 }
 0x2bc   : > { %v4487_v58 = vsel %vm1620_vm3, %v4485_v0, %v4486_v9  ;;  %v6399_v45 = vpop.f32.mrb[234].mxu0 }
 0x2bd   : > { %v3963_v44 = vsel %vm1093_vm2, %v3960_v62, %v3962_v17  ;;  %v6319_v51 = vpop.f32.mrb[234].mxu1  ;;  %v4561_v4 = vadd.f32 %v4487_v58, %v4035_v25  ;;  %v4328_v31 = vpop.f32.mrb[235].mxu0  ;;  %v4490_v19 = vrot.slane %v6399_v45, 2 }
 0x2be   : > { %v4036_v22 = vadd.f32 %v3963_v44, %v8248_v29  ;;  %v3967_v40 = vrot.slane %v6319_v51, 1  ;;  %v3812_v39 = vpop.f32.mrb[235].mxu1  ;;  %v4488_v3 = vrot.slane %v4328_v31, 2 }
 0x2bf   : > { %v3965_v1 = vrot.slane %v3812_v39, 1  ;;  %4593 = vst [vmem:[%s8282_s8 + $0xc0] sm:$0xff] %v4561_v4 }
 0x2c0   : > { %v4489_v46 = vsel %vm1620_vm3, %v4486_v9, %v4488_v3  ;;  %v6402_v63 = vpop.f32.mrb[236].mxu0 }
 0x2c1   : > { %v3966_v36 = vsel %vm1093_vm2, %v3964_v13, %v3965_v1  ;;  %v3968_v42 = vsel %vm1093_vm2, %v3965_v1, %v3967_v40  ;;  %v6322_v33 = vpop.f32.mrb[236].mxu1  ;;  %v4562_v56 = vadd.f32 %v4489_v46, %v4036_v22  ;;  %v4338_v55 = vpop.f32.mrb[237].mxu0  ;;  %v4493_v20 = vrot.slane %v6402_v63, 2 }
 0x2c2   : > { %v4037_v50 = vadd.f32 %v3966_v36, %v8254_v16  ;;  %v4038_v29 = vadd.f32 %v3968_v42, %v8261_v15  ;;  %v3970_v10 = vrot.slane %v6322_v33, 1  ;;  %v3822_v7 = vpop.f32.mrb[237].mxu1  ;;  %v4491_v21 = vrot.slane %v4338_v55, 2 }
 0x2c3   : > { %v3969_v37 = vrot.slane %v3822_v7, 1  ;;  %4594 = vst [vmem:[%s8282_s8 + $0xc8] sm:$0xff] %v4562_v56 }
 0x2c4   : > { %v4492_v49 = vsel %vm1620_vm3, %v4490_v19, %v4491_v21  ;;  %v4494_v43 = vsel %vm1620_vm3, %v4491_v21, %v4493_v20  ;;  %v6405_v26 = vpop.f32.mrb[238].mxu0 }
 0x2c5   : > { %v3971_v5 = vsel %vm1093_vm2, %v3969_v37, %v3970_v10  ;;  %v6325_v16 = vpop.f32.mrb[238].mxu1  ;;  %v4563_v47 = vadd.f32 %v4492_v49, %v4037_v50  ;;  %v4564_v23 = vadd.f32 %v4494_v43, %v4038_v29  ;;  %v4348_v52 = vpop.f32.mrb[239].mxu0  ;;  %v4496_v34 = vrot.slane %v6405_v26, 2 }
 0x2c6   : > { %v4039_v15 = vadd.f32 %v3971_v5, %v8267_v6  ;;  %v3832_v54 = vpop.f32.mrb[239].mxu1  ;;  %v4495_v11 = vrot.slane %v4348_v52, 2  ;;  %v3974_v12 = vrot.slane %v6325_v16, 1 }
 0x2c7   : > { %v3972_v28 = vrot.slane %v3832_v54, 1  ;;  %4595 = vst [vmem:[%s8282_s8 + $0xd0] sm:$0xff] %v4563_v47  ;;  %4596 = vst [vmem:[%s8282_s8 + $0xd8] sm:$0xff] %v4564_v23 }
 0x2c8   : > { %v4497_v38 = vsel %vm1620_vm3, %v4495_v11, %v4496_v34  ;;  %v6408_v14 = vpop.f32.mrb[240].mxu0 }
 0x2c9   : > { %v3973_v62 = vsel %vm1093_vm2, %v3970_v10, %v3972_v28  ;;  %v6328_v35 = vpop.f32.mrb[240].mxu1  ;;  %v4565_v27 = vadd.f32 %v4497_v38, %v4039_v15  ;;  %v4358_v30 = vpop.f32.mrb[241].mxu0  ;;  %v4500_v0 = vrot.slane %v6408_v14, 2 }
 0x2ca   : > { %v4040_v8 = vadd.f32 %v3973_v62, %v8264_v18  ;;  %v3977_v6 = vrot.slane %v6328_v35, 1  ;;  %v3842_v53 = vpop.f32.mrb[241].mxu1  ;;  %v4498_v24 = vrot.slane %v4358_v30, 2 }
 0x2cb   : > { %v3975_v32 = vrot.slane %v3842_v53, 1  ;;  %4597 = vst [vmem:[%s8282_s8 + $0xe0] sm:$0xff] %v4565_v27 }
 0x2cc   : > { %v4499_v60 = vsel %vm1620_vm3, %v4496_v34, %v4498_v24  ;;  %v6411_v59 = vpop.f32.mrb[242].mxu0 }
 0x2cd   : > { %v3976_v57 = vsel %vm1093_vm2, %v3974_v12, %v3975_v32  ;;  %v3978_v25 = vsel %vm1093_vm2, %v3975_v32, %v3977_v6  ;;  %v4566_v2 = vadd.f32 %v4499_v60, %v4040_v8  ;;  %v4503_v9 = vrot.slane %v6411_v59, 2  ;;  %v4368_v17 = vpop.f32.mrb[243].mxu0 }
 0x2ce   : > { %v4041_v18 = vadd.f32 %v3976_v57, %v8270_v61  ;;  %v4042_v41 = vadd.f32 %v3978_v25, %v8273_v48  ;;  %v4501_v44 = vrot.slane %v4368_v17, 2 }
 0x2cf   : > { %4598 = vst [vmem:[%s8282_s8 + $0xe8] sm:$0xff] %v4566_v2 }
 0x2d0   : > { %v4502_v58 = vsel %vm1620_vm3, %v4500_v0, %v4501_v44  ;;  %v4504_v51 = vsel %vm1620_vm3, %v4501_v44, %v4503_v9 }
 0x2d1   : > { %v4567_v45 = vadd.f32 %v4502_v58, %v4041_v18  ;;  %v4568_v22 = vadd.f32 %v4504_v51, %v4042_v41 }
 0x2d3   : > { %4599 = vst [vmem:[%s8282_s8 + $0xf0] sm:$0xff] %v4567_v45  ;;  %4600 = vst [vmem:[%s8282_s8 + $0xf8] sm:$0xff] %v4568_v22 }
 0x2d4 PF: > { %s12_s9 = sadd.s32 1, %s6483_s9  }
 0x2d5   : > { %p9_p4 = scmp.ge.s32.totalorder %s12_s9, 4  }
 0x2d7   :  { %11 = sbr.rel (!%p9_p4) target bundleno = 1 (0x1), region = 66 }

</bundles_post_ra>
